<compile_context>
chip_gen: v6e
topology: v6e:2x2x1
jax: 0.10.0
libtpu: 0.0.40
codegen_flags: <defaults>
</compile_context>

<pallas_src>
import functools

import jax
import jax.numpy as jnp
from jax.experimental import pallas as pl
from jax.experimental.pallas import tpu as pltpu

H_DIM = 400      # logical hidden width (PyTorch h_dim)
IN_DIM = 2       # input features
H_PAD = 512      # hidden width padded to a lane multiple (400 -> 512)
OUT_PAD = 128    # output width padded to one full lane group (1 -> 128)


def _round_up(n, m):
    return ((n + m - 1) // m) * m


def discriminator_kernel(x_ref,
                         w1_ref, b1_ref,
                         w2_ref, b2_ref,
                         w3_ref, b3_ref,
                         w4_ref, b4_ref,
                         o_ref):
    """Fused 4-layer MLP + sigmoid on one batch tile (all math in f32)."""
    x = x_ref[...]                                             # (bb, 2)

    # ---- Layer 1: in=2 -> 512. K=2 is MXU-hostile; do it as two VPU
    # broadcast FMAs instead of pushing a K=2 contraction through the MXU.
    h = (x[:, 0:1] * w1_ref[0:1, :]
         + x[:, 1:2] * w1_ref[1:2, :]
         + b1_ref[...])                                        # (bb, 512)
    h = jnp.maximum(h, 0.0)                                    # ReLU

    # ---- Layer 2: 512x512 on the MXU, f32 accumulation.
    h = jnp.dot(h, w2_ref[...], preferred_element_type=jnp.float32) + b2_ref[...]
    h = jnp.maximum(h, 0.0)

    # ---- Layer 3: 512x512 on the MXU.
    h = jnp.dot(h, w3_ref[...], preferred_element_type=jnp.float32) + b3_ref[...]
    h = jnp.maximum(h, 0.0)

    # ---- Layer 4: w4 zero-padded to (512, 128) so both the matmul output and
    # the store are lane-dense (128 lanes, unmasked vst). Column 0 is the real
    # logit; padded columns compute sigmoid(0) and are discarded by the wrapper.
    logits = jnp.dot(h, w4_ref[...], preferred_element_type=jnp.float32) + b4_ref[...]

    # Sigmoid: exp and the reciprocal of the denominator both ride the EUP.
    o_ref[...] = 1.0 / (1.0 + jnp.exp(-logits))


def _pad_params(params):
    """Zero-pad PyTorch-shaped params to MXU/lane-friendly shapes."""
    w1, b1, w2, b2, w3, b3, w4, b4 = params
    f32 = jnp.float32
    w1p = jnp.zeros((IN_DIM, H_PAD), f32).at[:, :H_DIM].set(w1.astype(f32))
    b1p = jnp.zeros((1, H_PAD), f32).at[:, :H_DIM].set(b1.astype(f32))
    w2p = jnp.zeros((H_PAD, H_PAD), f32).at[:H_DIM, :H_DIM].set(w2.astype(f32))
    b2p = jnp.zeros((1, H_PAD), f32).at[:, :H_DIM].set(b2.astype(f32))
    w3p = jnp.zeros((H_PAD, H_PAD), f32).at[:H_DIM, :H_DIM].set(w3.astype(f32))
    b3p = jnp.zeros((1, H_PAD), f32).at[:, :H_DIM].set(b3.astype(f32))
    w4p = jnp.zeros((H_PAD, OUT_PAD), f32).at[:H_DIM, :1].set(w4.astype(f32))
    b4p = jnp.zeros((1, OUT_PAD), f32).at[:, :1].set(b4.astype(f32))
    return w1p, b1p, w2p, b2p, w3p, b3p, w4p, b4p


def discriminator_forward(x, params, *, block_b=1024):
    """x: (B, 2) float32.  Returns (B,) float32, matching output.view(-1)."""
    B = x.shape[0]
    x = x.astype(jnp.float32)

    # Batch tile: as large as possible to amortize per-grid-step overhead, but
    # never larger than the (sublane-aligned) batch. For large B this yields
    # multiple "parallel" grid steps, which also shards across v7x's two TCs.
    bb = min(_round_up(block_b, 8), _round_up(B, 8))
    B_pad = _round_up(B, bb)
    if B_pad != B:
        x = jnp.pad(x, ((0, B_pad - B), (0, 0)))

    w1, b1, w2, b2, w3, b3, w4, b4 = _pad_params(params)
    grid = (B_pad // bb,)

    # Weights/biases (~2.3 MiB padded) stay fully resident in VMEM every step.
    def full(arr):
        return pl.BlockSpec(arr.shape, lambda i, _nd=arr.ndim: (0,) * _nd)

    # Advisory cost so XLA schedules this custom call sensibly.
    flops = int(2 * B_pad * (IN_DIM * H_PAD + 2 * H_PAD * H_PAD + H_PAD * OUT_PAD))
    bytes_accessed = int(4 * (B_pad * (IN_DIM + OUT_PAD)
                              + w1.size + b1.size + w2.size + b2.size
                              + w3.size + b3.size + w4.size + b4.size))
    cost = pl.CostEstimate(flops=flops,
                           transcendentals=int(B_pad * OUT_PAD),
                           bytes_accessed=bytes_accessed)

    out = pl.pallas_call(
        discriminator_kernel,
        out_shape=jax.ShapeDtypeStruct((B_pad, OUT_PAD), jnp.float32),
        grid=grid,
        in_specs=[
            pl.BlockSpec((bb, IN_DIM), lambda i: (i, 0)),      # x tile
            full(w1), full(b1),
            full(w2), full(b2),
            full(w3), full(b3),
            full(w4), full(b4),
        ],
        out_specs=pl.BlockSpec((bb, OUT_PAD), lambda i: (i, 0)),  # lane-dense
        compiler_params=pltpu.CompilerParams(
            dimension_semantics=("parallel",)),
        cost_estimate=cost,
    )(x, w1, b1, w2, b2, w3, b3, w4, b4)

    # Column 0 holds the real sigmoid(logit); drop batch padding and flatten.
    return out[:B, 0]


def init_params(key):
    """Deterministic synthetic parameters (PyTorch-Linear-like uniform init)."""
    def linear(key, fan_in, fan_out):
        kw, kb = jax.random.split(key)
        bound = 1.0 / jnp.sqrt(fan_in)
        w = jax.random.uniform(kw, (fan_in, fan_out), jnp.float32, -bound, bound)
        b = jax.random.uniform(kb, (1, fan_out), jnp.float32, -bound, bound)
        return w, b

    k1, k2, k3, k4 = jax.random.split(key, 4)
    w1, b1 = linear(k1, IN_DIM, H_DIM)
    w2, b2 = linear(k2, H_DIM, H_DIM)
    w3, b3 = linear(k3, H_DIM, H_DIM)
    w4, b4 = linear(k4, H_DIM, 1)
    return (w1, b1, w2, b2, w3, b3, w4, b4)


def reference_forward(x, params):
    """Plain-JAX reference of the same forward pass (full-f32 matmuls)."""
    w1, b1, w2, b2, w3, b3, w4, b4 = params
    hi = jax.lax.Precision.HIGHEST
    dot = functools.partial(jnp.dot, precision=hi)
    h = jnp.maximum(dot(x, w1) + b1, 0.0)
    h = jnp.maximum(dot(h, w2) + b2, 0.0)
    h = jnp.maximum(dot(h, w3) + b3, 0.0)
    return jax.nn.sigmoid(dot(h, w4) + b4).reshape(-1)


if __name__ == "__main__":
    key = jax.random.PRNGKey(0)
    kp, kx = jax.random.split(key)

    params = init_params(kp)
    B = 64
    x = jax.random.normal(kx, (B, IN_DIM), dtype=jnp.float32)

    out = discriminator_forward(x, params)
    out = jax.block_until_ready(out)

    ref = reference_forward(x, params)
    assert out.shape == (B,)
    assert jnp.allclose(out, ref, atol=1e-5, rtol=1e-5), "mismatch vs reference"

    print("KERNEL_OK")
</pallas_src>

<mosaic_0001>
module attributes {stable_mosaic.version = 11 : i64} {
  func.func @discriminator_kernel(%arg0: i32, %arg1: memref<64x2xf32, #tpu.memory_space<vmem>>, %arg2: memref<2x512xf32, #tpu.memory_space<vmem>>, %arg3: memref<1x512xf32, #tpu.memory_space<vmem>>, %arg4: memref<512x512xf32, #tpu.memory_space<vmem>>, %arg5: memref<1x512xf32, #tpu.memory_space<vmem>>, %arg6: memref<512x512xf32, #tpu.memory_space<vmem>>, %arg7: memref<1x512xf32, #tpu.memory_space<vmem>>, %arg8: memref<512x128xf32, #tpu.memory_space<vmem>>, %arg9: memref<1x128xf32, #tpu.memory_space<vmem>>, %arg10: memref<64x128xf32, #tpu.memory_space<vmem>>) attributes {dimension_semantics = [#tpu.dimension_semantics<parallel>], iteration_bounds = array<i64: 1>, scalar_prefetch = 0 : i64, scratch_operands = 0 : i64, tpu.core_type = #tpu.core_type<tc>, window_params = [{transform_indices = @transform_0, window_bounds = array<i64: 64, 2>}, {pipeline_mode = #tpu.pipeline_mode<synchronous>, transform_indices = @transform_1, window_bounds = array<i64: 2, 512>}, {pipeline_mode = #tpu.pipeline_mode<synchronous>, transform_indices = @transform_2, window_bounds = array<i64: 1, 512>}, {pipeline_mode = #tpu.pipeline_mode<synchronous>, transform_indices = @transform_3, window_bounds = array<i64: 512, 512>}, {pipeline_mode = #tpu.pipeline_mode<synchronous>, transform_indices = @transform_4, window_bounds = array<i64: 1, 512>}, {pipeline_mode = #tpu.pipeline_mode<synchronous>, transform_indices = @transform_5, window_bounds = array<i64: 512, 512>}, {pipeline_mode = #tpu.pipeline_mode<synchronous>, transform_indices = @transform_6, window_bounds = array<i64: 1, 512>}, {pipeline_mode = #tpu.pipeline_mode<synchronous>, transform_indices = @transform_7, window_bounds = array<i64: 512, 128>}, {pipeline_mode = #tpu.pipeline_mode<synchronous>, transform_indices = @transform_8, window_bounds = array<i64: 1, 128>}, {transform_indices = @transform_9, window_bounds = array<i64: 64, 128>}]} {
    %c0 = arith.constant 0 : index
    %c0_0 = arith.constant 0 : index
    %0 = vector.load %arg1[%c0, %c0_0] : memref<64x2xf32, #tpu.memory_space<vmem>>, vector<64x2xf32>
    %1 = vector.extract_strided_slice %0 {offsets = [0, 0], sizes = [64, 1], strides = [1, 1]} : vector<64x2xf32> to vector<64x1xf32>
    %c0_1 = arith.constant 0 : index
    %c0_2 = arith.constant 0 : index
    %2 = vector.load %arg2[%c0_1, %c0_2] : memref<2x512xf32, #tpu.memory_space<vmem>>, vector<1x512xf32>
    %3 = vector.broadcast %1 : vector<64x1xf32> to vector<64x512xf32>
    %4 = vector.broadcast %2 : vector<1x512xf32> to vector<64x512xf32>
    %5 = arith.mulf %3, %4 : vector<64x512xf32>
    %6 = vector.extract_strided_slice %0 {offsets = [0, 1], sizes = [64, 1], strides = [1, 1]} : vector<64x2xf32> to vector<64x1xf32>
    %c1 = arith.constant 1 : index
    %c0_3 = arith.constant 0 : index
    %7 = vector.load %arg2[%c1, %c0_3] : memref<2x512xf32, #tpu.memory_space<vmem>>, vector<1x512xf32>
    %8 = vector.broadcast %6 : vector<64x1xf32> to vector<64x512xf32>
    %9 = vector.broadcast %7 : vector<1x512xf32> to vector<64x512xf32>
    %10 = arith.mulf %8, %9 : vector<64x512xf32>
    %11 = arith.addf %5, %10 : vector<64x512xf32>
    %c0_4 = arith.constant 0 : index
    %c0_5 = arith.constant 0 : index
    %12 = vector.load %arg3[%c0_4, %c0_5] : memref<1x512xf32, #tpu.memory_space<vmem>>, vector<1x512xf32>
    %13 = vector.broadcast %12 : vector<1x512xf32> to vector<64x512xf32>
    %14 = arith.addf %11, %13 : vector<64x512xf32>
    %cst = arith.constant 0.000000e+00 : f32
    %15 = vector.broadcast %cst : f32 to vector<64x512xf32>
    %16 = arith.maximumf %14, %15 : vector<64x512xf32>
    %c0_6 = arith.constant 0 : index
    %c0_7 = arith.constant 0 : index
    %17 = vector.load %arg4[%c0_6, %c0_7] : memref<512x512xf32, #tpu.memory_space<vmem>>, vector<512x512xf32>
    %cst_8 = arith.constant dense<0.000000e+00> : vector<64x512xf32>
    %18 = tpu.matmul %16, %17, %cst_8 {dimension_numbers = #tpu.dot_dimension_numbers<[1], [0], [0], [1], [0, 0, 1, 1], [], []>} : vector<64x512xf32>, vector<512x512xf32>, vector<64x512xf32> -> vector<64x512xf32>
    %c0_9 = arith.constant 0 : index
    %c0_10 = arith.constant 0 : index
    %19 = vector.load %arg5[%c0_9, %c0_10] : memref<1x512xf32, #tpu.memory_space<vmem>>, vector<1x512xf32>
    %20 = vector.broadcast %19 : vector<1x512xf32> to vector<64x512xf32>
    %21 = arith.addf %18, %20 : vector<64x512xf32>
    %cst_11 = arith.constant 0.000000e+00 : f32
    %22 = vector.broadcast %cst_11 : f32 to vector<64x512xf32>
    %23 = arith.maximumf %21, %22 : vector<64x512xf32>
    %c0_12 = arith.constant 0 : index
    %c0_13 = arith.constant 0 : index
    %24 = vector.load %arg6[%c0_12, %c0_13] : memref<512x512xf32, #tpu.memory_space<vmem>>, vector<512x512xf32>
    %cst_14 = arith.constant dense<0.000000e+00> : vector<64x512xf32>
    %25 = tpu.matmul %23, %24, %cst_14 {dimension_numbers = #tpu.dot_dimension_numbers<[1], [0], [0], [1], [0, 0, 1, 1], [], []>} : vector<64x512xf32>, vector<512x512xf32>, vector<64x512xf32> -> vector<64x512xf32>
    %c0_15 = arith.constant 0 : index
    %c0_16 = arith.constant 0 : index
    %26 = vector.load %arg7[%c0_15, %c0_16] : memref<1x512xf32, #tpu.memory_space<vmem>>, vector<1x512xf32>
    %27 = vector.broadcast %26 : vector<1x512xf32> to vector<64x512xf32>
    %28 = arith.addf %25, %27 : vector<64x512xf32>
    %cst_17 = arith.constant 0.000000e+00 : f32
    %29 = vector.broadcast %cst_17 : f32 to vector<64x512xf32>
    %30 = arith.maximumf %28, %29 : vector<64x512xf32>
    %c0_18 = arith.constant 0 : index
    %c0_19 = arith.constant 0 : index
    %31 = vector.load %arg8[%c0_18, %c0_19] : memref<512x128xf32, #tpu.memory_space<vmem>>, vector<512x128xf32>
    %cst_20 = arith.constant dense<0.000000e+00> : vector<64x128xf32>
    %32 = tpu.matmul %30, %31, %cst_20 {dimension_numbers = #tpu.dot_dimension_numbers<[1], [0], [0], [1], [0, 0, 1, 1], [], []>} : vector<64x512xf32>, vector<512x128xf32>, vector<64x128xf32> -> vector<64x128xf32>
    %c0_21 = arith.constant 0 : index
    %c0_22 = arith.constant 0 : index
    %33 = vector.load %arg9[%c0_21, %c0_22] : memref<1x128xf32, #tpu.memory_space<vmem>>, vector<1x128xf32>
    %34 = vector.broadcast %33 : vector<1x128xf32> to vector<64x128xf32>
    %35 = arith.addf %32, %34 : vector<64x128xf32>
    %cst_23 = arith.constant 0.000000e+00 : f32
    %36 = vector.broadcast %cst_23 : f32 to vector<64x128xf32>
    %37 = arith.subf %36, %35 : vector<64x128xf32>
    %38 = math.exp %37 : vector<64x128xf32>
    %cst_24 = arith.constant 1.000000e+00 : f32
    %39 = vector.broadcast %cst_24 : f32 to vector<64x128xf32>
    %40 = arith.addf %39, %38 : vector<64x128xf32>
    %cst_25 = arith.constant 1.000000e+00 : f32
    %41 = vector.broadcast %cst_25 : f32 to vector<64x128xf32>
    %42 = arith.divf %41, %40 : vector<64x128xf32>
    %c0_26 = arith.constant 0 : index
    %c0_27 = arith.constant 0 : index
    %43 = vector.load %arg10[%c0_26, %c0_27] : memref<64x128xf32, #tpu.memory_space<vmem>>, vector<64x128xf32>
    tpu.vector_store %arg10[%c0_26, %c0_27], %42 {strides = array<i32>} : memref<64x128xf32, #tpu.memory_space<vmem>>, vector<64x128xf32>,
    return
  }
  func.func @transform_0(%arg0: i32) -> (i32, i32) {
    %c0_i32 = arith.constant 0 : i32
    %c0_i32_0 = arith.constant 0 : i32
    return %arg0, %c0_i32 : i32, i32
  }
  func.func @transform_1(%arg0: i32) -> (i32, i32) {
    %c0_i32 = arith.constant 0 : i32
    %c0_i32_0 = arith.constant 0 : i32
    %c0_i32_1 = arith.constant 0 : i32
    return %c0_i32, %c0_i32_0 : i32, i32
  }
  func.func @transform_2(%arg0: i32) -> (i32, i32) {
    %c0_i32 = arith.constant 0 : i32
    %c0_i32_0 = arith.constant 0 : i32
    %c0_i32_1 = arith.constant 0 : i32
    return %c0_i32, %c0_i32_0 : i32, i32
  }
  func.func @transform_3(%arg0: i32) -> (i32, i32) {
    %c0_i32 = arith.constant 0 : i32
    %c0_i32_0 = arith.constant 0 : i32
    %c0_i32_1 = arith.constant 0 : i32
    return %c0_i32, %c0_i32_0 : i32, i32
  }
  func.func @transform_4(%arg0: i32) -> (i32, i32) {
    %c0_i32 = arith.constant 0 : i32
    %c0_i32_0 = arith.constant 0 : i32
    %c0_i32_1 = arith.constant 0 : i32
    return %c0_i32, %c0_i32_0 : i32, i32
  }
  func.func @transform_5(%arg0: i32) -> (i32, i32) {
    %c0_i32 = arith.constant 0 : i32
    %c0_i32_0 = arith.constant 0 : i32
    %c0_i32_1 = arith.constant 0 : i32
    return %c0_i32, %c0_i32_0 : i32, i32
  }
  func.func @transform_6(%arg0: i32) -> (i32, i32) {
    %c0_i32 = arith.constant 0 : i32
    %c0_i32_0 = arith.constant 0 : i32
    %c0_i32_1 = arith.constant 0 : i32
    return %c0_i32, %c0_i32_0 : i32, i32
  }
  func.func @transform_7(%arg0: i32) -> (i32, i32) {
    %c0_i32 = arith.constant 0 : i32
    %c0_i32_0 = arith.constant 0 : i32
    %c0_i32_1 = arith.constant 0 : i32
    return %c0_i32, %c0_i32_0 : i32, i32
  }
  func.func @transform_8(%arg0: i32) -> (i32, i32) {
    %c0_i32 = arith.constant 0 : i32
    %c0_i32_0 = arith.constant 0 : i32
    %c0_i32_1 = arith.constant 0 : i32
    return %c0_i32, %c0_i32_0 : i32, i32
  }
  func.func @transform_9(%arg0: i32) -> (i32, i32) {
    %c0_i32 = arith.constant 0 : i32
    %c0_i32_0 = arith.constant 0 : i32
    return %arg0, %c0_i32 : i32, i32
  }
}

</mosaic_0001>

<bundles_post_ra>
// kernel: tpu_custom_call.1
= control target key start
LH: loop header
LB: loop body
LE: loop exit
PB: predicated region body
PF: predicated region fallthrough
CT: control target
= control target key end

     0   :  { %14 = vsyncpa [#allocation3], 0  ;;  %s3412_s0 = inlined_call_operand.vmem [shape: f32[64,2], index: 0, kind: input, shape index: {}]   ;;  %s3413_s1 = inlined_call_operand.vmem [shape: f32[2,512], index: 1, kind: input, shape index: {}]   ;;  %s3414_s2 = inlined_call_operand.vmem [shape: f32[1,512], index: 2, kind: input, shape index: {}]   ;;  %s3415_s3 = inlined_call_operand.hbm [shape: f32[512,512], index: 3, kind: input, shape index: {}]   ;;  %s3416_s4 = inlined_call_operand.vmem [shape: f32[1,512], index: 4, kind: input, shape index: {}]   ;;  %s3417_s5 = inlined_call_operand.hbm [shape: f32[512,512], index: 5, kind: input, shape index: {}]   ;;  %s3418_s6 = inlined_call_operand.vmem [shape: f32[1,512], index: 6, kind: input, shape index: {}]   ;;  %s3419_s7 = inlined_call_operand.hbm [shape: f32[512,128], index: 7, kind: input, shape index: {}]   ;;  %s3420_s8 = inlined_call_operand.vmem [shape: f32[1,128], index: 8, kind: input, shape index: {}]   ;;  %s3421_s9 = inlined_call_operand.hbm [shape: f32[64,128], index: 9, kind: output, shape index: {}]  }
   0x1   :  { %15 = vsyncpa [#allocation6], 0 }
   0x2   :  { %16 = vsyncpa [#allocation4], 0  ;;  %s2507_s30 = smov [#allocation5]   ;;  %s2508_s11 = smov [#allocation2]  }
   0x3   :  { %s42_s10 = sshll.u32 %s2507_s30, 4  ;;  %s28_s12 = sshll.u32 %s2508_s11, 4  ;;  %s43_s10 = int_to_ptr.vmem [resolvable:$true] %s42_s10  ;;  %s29_s12 = int_to_ptr.vmem [resolvable:$true] %s28_s12 }
   0x4   :  { %s2429_s13 = scalar_lea.vmem %s43_s10, 32768  ;;  %p2434_p1 = scmp.lt.s32.totalorder %s43_s10, %s43_s10 }
   0x5   :  { %p2430_p0 = scmp.ne.s32.totalorder %s43_s10, %s2429_s13  ;;  %p2435_p2 = scmp.lt.s32.totalorder %s2429_s13, %s2429_s13 }
   0x7   :  { %p2436_p3 = por %p2435_p2, %p2434_p1 }
   0x9   :  { %p2437_p4 = pnand %p2436_p3, %p2430_p0 }
   0xb   :  { %2440 = shalt.err (!%p2437_p4)
}
   0xc   :  { %s2509_s14 = smov 512   ;;  %s2510_s15 = smov 32  }
   0xd   :  { %48 = dma.hbm_to_vmem [thread:$0]  %s3417_s5, 32768, %s43_s10, [#allocation6], %s2509_s14, %s2509_s14, %s2510_s15  }
   0xe   :  { %s2449_s18 = scalar_lea.vmem %s29_s12, 32768  ;;  %p2454_p6 = scmp.lt.s32.totalorder %s29_s12, %s29_s12 }
   0xf   :  { %p2450_p5 = scmp.ne.s32.totalorder %s29_s12, %s2449_s18  ;;  %p2455_p7 = scmp.lt.s32.totalorder %s2449_s18, %s2449_s18 }
  0x11   :  { %p2456_p8 = por %p2455_p7, %p2454_p6 }
  0x13   :  { %p2457_p9 = pnand %p2456_p8, %p2450_p5 }
  0x15   :  { %2460 = shalt.err (!%p2457_p9)
}
  0x16   :  { %34 = dma.hbm_to_vmem [thread:$0]  %s3415_s3, 32768, %s29_s12, [#allocation3], %s2509_s14, %s2509_s14, %s2510_s15  }
  0x17   :  { %s2511_s21 = smov [#allocation7]  }
  0x18   :  { %s56_s22 = sshll.u32 %s2511_s21, 4  ;;  %s57_s22 = int_to_ptr.vmem [resolvable:$true] %s56_s22 }
  0x19   :  { %s2469_s23 = scalar_lea.vmem %s57_s22, 8192  ;;  %p2474_p11 = scmp.lt.s32.totalorder %s57_s22, %s57_s22 }
  0x1a   :  { %p2470_p10 = scmp.ne.s32.totalorder %s57_s22, %s2469_s23  ;;  %p2475_p12 = scmp.lt.s32.totalorder %s2469_s23, %s2469_s23 }
  0x1c   :  { %p2476_p13 = por %p2475_p12, %p2474_p11 }
  0x1e   :  { %p2477_p0 = pnand %p2476_p13, %p2470_p10 }
  0x20   :  { %2480 = shalt.err (!%p2477_p0)
}
  0x21   :  { %s2512_s5 = smov 128   ;;  %s2513_s24 = smov 8  }
  0x22   :  { %62 = dma.hbm_to_vmem [thread:$0]  %s3419_s7, 8192, %s57_s22, [#allocation6], %s2512_s5, %s2512_s5, %s2513_s24  }
  0x23   :  { %2501 = dma.done.wait [#allocation3], 32768  }
  0x24   :  { %2502 = vsyncadd [#allocation3], 4294934528 }
  0x25   :  { %2503 = dma.done.wait [#allocation6], 40960  }
  0x26   :  { %2504 = vsyncadd [#allocation6], 4294926336  ;;  %v2514_v0 = vmov 0   ;;  %v75_v1 = vld [vmem:[%s3412_s0 + $0x8] sm:$0xff]  ;;  %v74_v2 = vld [vmem:[%s3412_s0] sm:$0xff]  ;;  %v2515_v8 = vmov 1  }
  0x27   :  { %2386 = vset.pattern.permute.xlu1 %v2514_v0  ;;  %2384 = vset.pattern.permute.xlu0 %v2514_v0  ;;  %v442_v3 = vld [vmem:[#allocation2 + $0x1e8] sm:$0xff]  ;;  %v441_v5 = vld [vmem:[#allocation2 + $0x1e0] sm:$0xff]  ;;  %v76_v13 = vld [vmem:[%s3412_s0 + $0x10] sm:$0xff] }
  0x28   :  { %90 = vperm.xlu1 %2386, %v75_v1   ;;  %85 = vperm.xlu0 %2384, %v74_v2   ;;  %v570_v4 = vld [vmem:[#allocation2 + $0x5e8] sm:$0xff]  ;;  %v569_v6 = vld [vmem:[#allocation2 + $0x5e0] sm:$0xff]  ;;  %v77_v19 = vld [vmem:[%s3412_s0 + $0x18] sm:$0xff] }
  0x29   :  { %659 = vmatprep.subr.mxu0 %v442_v3  ;;  %772 = vmatprep.subr.mxu1 %v570_v4  ;;  %v438_v7 = vld [vmem:[#allocation2 + $0x1c8] sm:$0xff]  ;;  %v437_v10 = vld [vmem:[#allocation2 + $0x1c0] sm:$0xff]  ;;  %v80_v40 = vld [vmem:[%s3412_s0 + $0x30] sm:$0xff] }
  0x2a   :  { %660 = vmatpush1.msra.mxu0 %v441_v5  ;;  %v566_v9 = vld [vmem:[#allocation2 + $0x5c8] sm:$0xff]  ;;  %v565_v11 = vld [vmem:[#allocation2 + $0x5c0] sm:$0xff]  ;;  %773 = vmatpush1.msra.mxu1 %v569_v6  ;;  %v81_v47 = vld [vmem:[%s3412_s0 + $0x38] sm:$0xff] }
  0x2b   :  { %v434_v12 = vld [vmem:[#allocation2 + $0x1a8] sm:$0xff]  ;;  %661 = vmatprep.subr.mxu0 %v438_v7  ;;  %774 = vmatprep.subr.mxu1 %v566_v9  ;;  %v433_v15 = vld [vmem:[#allocation2 + $0x1a0] sm:$0xff] }
  0x2c   :  { %2387 = vset.pattern.permute.xlu1 %v2515_v8  ;;  %2385 = vset.pattern.permute.xlu0 %v2515_v8  ;;  %v562_v14 = vld [vmem:[#allocation2 + $0x5a8] sm:$0xff]  ;;  %v561_v16 = vld [vmem:[#allocation2 + $0x5a0] sm:$0xff] }
  0x2d   :  { %183 = vperm.xlu1 %2387, %v75_v1   ;;  %179 = vperm.xlu0 %2385, %v74_v2   ;;  %v430_v17 = vld [vmem:[#allocation2 + $0x188] sm:$0xff]  ;;  %v429_v20 = vld [vmem:[#allocation2 + $0x180] sm:$0xff] }
  0x2e   :  { %662 = vmatpush1.msra.mxu0 %v437_v10  ;;  %775 = vmatpush1.msra.mxu1 %v565_v11  ;;  %v558_v18 = vld [vmem:[#allocation2 + $0x588] sm:$0xff]  ;;  %v557_v21 = vld [vmem:[#allocation2 + $0x580] sm:$0xff] }
  0x2f   :  { %663 = vmatprep.subr.mxu0 %v434_v12  ;;  %776 = vmatprep.subr.mxu1 %v562_v14  ;;  %v426_v22 = vld [vmem:[#allocation2 + $0x168] sm:$0xff]  ;;  %v425_v24 = vld [vmem:[#allocation2 + $0x160] sm:$0xff] }
  0x30   :  { %664 = vmatpush1.msra.mxu0 %v433_v15  ;;  %777 = vmatpush1.msra.mxu1 %v561_v16  ;;  %v554_v23 = vld [vmem:[#allocation2 + $0x568] sm:$0xff]  ;;  %v553_v25 = vld [vmem:[#allocation2 + $0x560] sm:$0xff] }
  0x31   :  { %2388 = vset.pattern.permute.xlu1 %v2514_v0  ;;  %187 = vperm.xlu0 %2385, %v76_v13   ;;  %v78_v26 = vld [vmem:[%s3412_s0 + $0x20] sm:$0xff]  ;;  %v422_v27 = vld [vmem:[#allocation2 + $0x148] sm:$0xff] }
  0x32   :  { %95 = vperm.xlu1 %2388, %v76_v13   ;;  %665 = vmatprep.subr.mxu0 %v430_v17  ;;  %v550_v28 = vld [vmem:[#allocation2 + $0x548] sm:$0xff]  ;;  %v421_v29 = vld [vmem:[#allocation2 + $0x140] sm:$0xff] }
  0x33   :  { %778 = vmatprep.subr.mxu1 %v558_v18  ;;  %666 = vmatpush1.msra.mxu0 %v429_v20  ;;  %v549_v30 = vld [vmem:[#allocation2 + $0x540] sm:$0xff]  ;;  %v418_v31 = vld [vmem:[#allocation2 + $0x128] sm:$0xff] }
  0x34   :  { %779 = vmatpush1.msra.mxu1 %v557_v21  ;;  %667 = vmatprep.subr.mxu0 %v426_v22  ;;  %v546_v32 = vld [vmem:[#allocation2 + $0x528] sm:$0xff]  ;;  %v417_v34 = vld [vmem:[#allocation2 + $0x120] sm:$0xff] }
  0x35   :  { %191 = vperm.xlu0 %2385, %v77_v19   ;;  %780 = vmatprep.subr.mxu1 %v554_v23  ;;  %v79_v33 = vld [vmem:[%s3412_s0 + $0x28] sm:$0xff]  ;;  %v545_v35 = vld [vmem:[#allocation2 + $0x520] sm:$0xff] }
  0x36   :  { %100 = vperm.xlu1 %2388, %v77_v19   ;;  %668 = vmatpush1.msra.mxu0 %v425_v24  ;;  %v414_v36 = vld [vmem:[#allocation2 + $0x108] sm:$0xff]  ;;  %v413_v38 = vld [vmem:[#allocation2 + $0x100] sm:$0xff] }
  0x37   :  { %781 = vmatpush1.msra.mxu1 %v553_v25  ;;  %669 = vmatprep.subr.mxu0 %v422_v27  ;;  %v542_v37 = vld [vmem:[#allocation2 + $0x508] sm:$0xff]  ;;  %v541_v39 = vld [vmem:[#allocation2 + $0x500] sm:$0xff] }
  0x38   :  { %782 = vmatprep.subr.mxu1 %v550_v28  ;;  %670 = vmatpush1.msra.mxu0 %v421_v29  ;;  %v410_v41 = vld [vmem:[#allocation2 + $0xe8] sm:$0xff]  ;;  %v409_v43 = vld [vmem:[#allocation2 + $0xe0] sm:$0xff] }
  0x39   :  { %195 = vperm.xlu0 %2385, %v78_v26   ;;  %783 = vmatpush1.msra.mxu1 %v549_v30  ;;  %v538_v42 = vld [vmem:[#allocation2 + $0x4e8] sm:$0xff]  ;;  %v537_v44 = vld [vmem:[#allocation2 + $0x4e0] sm:$0xff] }
  0x3a   :  { %105 = vperm.xlu1 %2388, %v78_v26   ;;  %671 = vmatprep.subr.mxu0 %v418_v31  ;;  %v406_v45 = vld [vmem:[#allocation2 + $0xc8] sm:$0xff]  ;;  %v405_v48 = vld [vmem:[#allocation2 + $0xc0] sm:$0xff] }
  0x3b   :  { %784 = vmatprep.subr.mxu1 %v546_v32  ;;  %672 = vmatpush1.msra.mxu0 %v417_v34  ;;  %v534_v46 = vld [vmem:[#allocation2 + $0x4c8] sm:$0xff]  ;;  %v533_v49 = vld [vmem:[#allocation2 + $0x4c0] sm:$0xff] }
  0x3c   :  { %785 = vmatpush1.msra.mxu1 %v545_v35  ;;  %673 = vmatprep.subr.mxu0 %v414_v36  ;;  %v402_v50 = vld [vmem:[#allocation2 + $0xa8] sm:$0xff]  ;;  %v401_v52 = vld [vmem:[#allocation2 + $0xa0] sm:$0xff] }
  0x3d   :  { %199 = vperm.xlu0 %2385, %v79_v33   ;;  %786 = vmatprep.subr.mxu1 %v542_v37  ;;  %v530_v51 = vld [vmem:[#allocation2 + $0x4a8] sm:$0xff]  ;;  %v529_v53 = vld [vmem:[#allocation2 + $0x4a0] sm:$0xff] }
  0x3e   :  { %110 = vperm.xlu1 %2388, %v79_v33   ;;  %674 = vmatpush1.msra.mxu0 %v413_v38  ;;  %v398_v54 = vld [vmem:[#allocation2 + $0x88] sm:$0xff]  ;;  %v397_v56 = vld [vmem:[#allocation2 + $0x80] sm:$0xff] }
  0x3f   :  { %787 = vmatpush1.msra.mxu1 %v541_v39  ;;  %675 = vmatprep.subr.mxu0 %v410_v41  ;;  %v526_v55 = vld [vmem:[#allocation2 + $0x488] sm:$0xff]  ;;  %v525_v57 = vld [vmem:[#allocation2 + $0x480] sm:$0xff] }
  0x40   :  { %788 = vmatprep.subr.mxu1 %v538_v42  ;;  %676 = vmatpush1.msra.mxu0 %v409_v43  ;;  %v394_v58 = vld [vmem:[#allocation2 + $0x68] sm:$0xff]  ;;  %v393_v60 = vld [vmem:[#allocation2 + $0x60] sm:$0xff] }
  0x41   :  { %203 = vperm.xlu0 %2385, %v80_v40   ;;  %789 = vmatpush1.msra.mxu1 %v537_v44  ;;  %v522_v59 = vld [vmem:[#allocation2 + $0x468] sm:$0xff]  ;;  %v521_v61 = vld [vmem:[#allocation2 + $0x460] sm:$0xff] }
  0x42   :  { %115 = vperm.xlu1 %2388, %v80_v40   ;;  %677 = vmatprep.subr.mxu0 %v406_v45  ;;  %v390_v62 = vld [vmem:[#allocation2 + $0x48] sm:$0xff]  ;;  %v389_v0 = vld [vmem:[#allocation2 + $0x40] sm:$0xff] }
  0x43   :  { %790 = vmatprep.subr.mxu1 %v534_v46  ;;  %678 = vmatpush1.msra.mxu0 %v405_v48  ;;  %v518_v63 = vld [vmem:[#allocation2 + $0x448] sm:$0xff]  ;;  %v517_v1 = vld [vmem:[#allocation2 + $0x440] sm:$0xff] }
  0x44   :  { %791 = vmatpush1.msra.mxu1 %v533_v49  ;;  %679 = vmatprep.subr.mxu0 %v402_v50  ;;  %v386_v2 = vld [vmem:[#allocation2 + $0x28] sm:$0xff]  ;;  %v385_v4 = vld [vmem:[#allocation2 + $0x20] sm:$0xff] }
  0x45   :  { %207 = vperm.xlu0 %2385, %v81_v47   ;;  %792 = vmatprep.subr.mxu1 %v530_v51  ;;  %v514_v3 = vld [vmem:[#allocation2 + $0x428] sm:$0xff]  ;;  %v513_v5 = vld [vmem:[#allocation2 + $0x420] sm:$0xff] }
  0x46   :  { %120 = vperm.xlu1 %2388, %v81_v47   ;;  %680 = vmatpush1.msra.mxu0 %v401_v52  ;;  %v382_v6 = vld [vmem:[#allocation2 + $0x8] sm:$0xff]  ;;  %v381_v8 = vld [vmem:[#allocation2] sm:$0xff] }
  0x47   :  { %793 = vmatpush1.msra.mxu1 %v529_v53  ;;  %681 = vmatprep.subr.mxu0 %v398_v54  ;;  %v510_v7 = vld [vmem:[#allocation2 + $0x408] sm:$0xff]  ;;  %v509_v9 = vld [vmem:[#allocation2 + $0x400] sm:$0xff] }
  0x48   :  { %794 = vmatprep.subr.mxu1 %v526_v55  ;;  %682 = vmatpush1.msra.mxu0 %v397_v56  ;;  %v506_v10 = vld [vmem:[#allocation2 + $0x3e8] sm:$0xff]  ;;  %v505_v12 = vld [vmem:[#allocation2 + $0x3e0] sm:$0xff] }
  0x49   :  { %795 = vmatpush1.msra.mxu1 %v525_v57  ;;  %683 = vmatprep.subr.mxu0 %v394_v58  ;;  %v634_v11 = vld [vmem:[#allocation2 + $0x7e8] sm:$0xff]  ;;  %v633_v13 = vld [vmem:[#allocation2 + $0x7e0] sm:$0xff] }
  0x4a   :  { %796 = vmatprep.subr.mxu1 %v522_v59  ;;  %684 = vmatpush1.msra.mxu0 %v393_v60  ;;  %v502_v14 = vld [vmem:[#allocation2 + $0x3c8] sm:$0xff]  ;;  %v501_v16 = vld [vmem:[#allocation2 + $0x3c0] sm:$0xff] }
  0x4b   :  { %797 = vmatpush1.msra.mxu1 %v521_v61  ;;  %685 = vmatprep.subr.mxu0 %v390_v62  ;;  %v630_v15 = vld [vmem:[#allocation2 + $0x7c8] sm:$0xff]  ;;  %v629_v17 = vld [vmem:[#allocation2 + $0x7c0] sm:$0xff] }
  0x4c   :  { %798 = vmatprep.subr.mxu1 %v518_v63  ;;  %686 = vmatpush1.msra.mxu0 %v389_v0  ;;  %v498_v18 = vld [vmem:[#allocation2 + $0x3a8] sm:$0xff]  ;;  %v497_v20 = vld [vmem:[#allocation2 + $0x3a0] sm:$0xff] }
  0x4d   :  { %799 = vmatpush1.msra.mxu1 %v517_v1  ;;  %687 = vmatprep.subr.mxu0 %v386_v2  ;;  %v626_v19 = vld [vmem:[#allocation2 + $0x7a8] sm:$0xff]  ;;  %v625_v21 = vld [vmem:[#allocation2 + $0x7a0] sm:$0xff] }
  0x4e   :  { %800 = vmatprep.subr.mxu1 %v514_v3  ;;  %688 = vmatpush1.msra.mxu0 %v385_v4  ;;  %v494_v22 = vld [vmem:[#allocation2 + $0x388] sm:$0xff]  ;;  %v493_v24 = vld [vmem:[#allocation2 + $0x380] sm:$0xff] }
  0x4f   :  { %801 = vmatpush1.msra.mxu1 %v513_v5  ;;  %689 = vmatprep.subr.mxu0 %v382_v6  ;;  %v622_v23 = vld [vmem:[#allocation2 + $0x788] sm:$0xff]  ;;  %v621_v25 = vld [vmem:[#allocation2 + $0x780] sm:$0xff] }
  0x50   :  { %802 = vmatprep.subr.mxu1 %v510_v7  ;;  %690 = vmatpush1.msra.mxu0 %v381_v8  ;;  %v490_v26 = vld [vmem:[#allocation2 + $0x368] sm:$0xff]  ;;  %v489_v28 = vld [vmem:[#allocation2 + $0x360] sm:$0xff] }
  0x51   :  { %803 = vmatpush1.msra.mxu1 %v509_v9  ;;  %691 = vmatprep.subr.mxu0 %v506_v10  ;;  %v618_v27 = vld [vmem:[#allocation2 + $0x768] sm:$0xff]  ;;  %v617_v29 = vld [vmem:[#allocation2 + $0x760] sm:$0xff]  ;;  %v444_v10 = vld [vmem:[#allocation2 + $0x1f8] sm:$0xff] }
  0x52   :  { %804 = vmatprep.subr.mxu1 %v634_v11  ;;  %692 = vmatpush2.msra.mxu0 %v505_v12  ;;  %v486_v30 = vld [vmem:[#allocation2 + $0x348] sm:$0xff]  ;;  %v485_v32 = vld [vmem:[#allocation2 + $0x340] sm:$0xff]  ;;  %v572_v11 = vld [vmem:[#allocation2 + $0x5f8] sm:$0xff]  ;;  %v124_v12 = vlaneseq }
  0x53   :  { %805 = vmatpush2.msra.mxu1 %v633_v13  ;;  %693 = vmatprep.subr.mxu0 %v502_v14  ;;  %v614_v31 = vld [vmem:[#allocation2 + $0x748] sm:$0xff]  ;;  %v613_v33 = vld [vmem:[#allocation2 + $0x740] sm:$0xff] }
  0x54   :  { %806 = vmatprep.subr.mxu1 %v630_v15  ;;  %694 = vmatpush2.msra.mxu0 %v501_v16  ;;  %v482_v34 = vld [vmem:[#allocation2 + $0x328] sm:$0xff]  ;;  %v481_v36 = vld [vmem:[#allocation2 + $0x320] sm:$0xff]  ;;  %v125_v13 = vshrl.u32 %v124_v12, 7 }
  0x55   :  { %807 = vmatpush2.msra.mxu1 %v629_v17  ;;  %695 = vmatprep.subr.mxu0 %v498_v18  ;;  %v610_v35 = vld [vmem:[#allocation2 + $0x728] sm:$0xff]  ;;  %v609_v37 = vld [vmem:[#allocation2 + $0x720] sm:$0xff] }
  0x56   :  { %808 = vmatprep.subr.mxu1 %v626_v19  ;;  %696 = vmatpush2.msra.mxu0 %v497_v20  ;;  %v478_v38 = vld [vmem:[#allocation2 + $0x308] sm:$0xff]  ;;  %v477_v40 = vld [vmem:[#allocation2 + $0x300] sm:$0xff]  ;;  %v2603_v14 = vsub.s32 0, %v125_v13  ;;  %v2605_v15 = vsub.s32 1, %v125_v13  ;;  %v2610_v17 = vsub.s32 2, %v125_v13  ;;  %v2612_v18 = vsub.s32 3, %v125_v13 }
  0x57   :  { %809 = vmatpush2.msra.mxu1 %v625_v21  ;;  %697 = vmatprep.subr.mxu0 %v494_v22  ;;  %v606_v39 = vld [vmem:[#allocation2 + $0x708] sm:$0xff]  ;;  %v605_v41 = vld [vmem:[#allocation2 + $0x700] sm:$0xff] }
  0x58   :  { %810 = vmatprep.subr.mxu1 %v622_v23  ;;  %698 = vmatpush2.msra.mxu0 %v493_v24  ;;  %v474_v42 = vld [vmem:[#allocation2 + $0x2e8] sm:$0xff]  ;;  %v473_v44 = vld [vmem:[#allocation2 + $0x2e0] sm:$0xff]  ;;  %3444 = vst [vmem:[#allocation12_spill] sm:$0xff] %v2603_v14  ;;  %3445 = vst [vmem:[#allocation13_spill] sm:$0xff] %v2605_v15 }
  0x59   :  { %811 = vmatpush2.msra.mxu1 %v621_v25  ;;  %699 = vmatprep.subr.mxu0 %v490_v26  ;;  %v602_v43 = vld [vmem:[#allocation2 + $0x6e8] sm:$0xff]  ;;  %v601_v45 = vld [vmem:[#allocation2 + $0x6e0] sm:$0xff]  ;;  %3446 = vst [vmem:[#allocation14_spill] sm:$0xff] %v2610_v17  ;;  %3447 = vst [vmem:[#allocation15_spill] sm:$0xff] %v2612_v18 }
  0x5a   :  { %812 = vmatprep.subr.mxu1 %v618_v27  ;;  %700 = vmatpush2.msra.mxu0 %v489_v28  ;;  %v470_v46 = vld [vmem:[#allocation2 + $0x2c8] sm:$0xff]  ;;  %v469_v48 = vld [vmem:[#allocation2 + $0x2c0] sm:$0xff] }
  0x5b   :  { %813 = vmatpush2.msra.mxu1 %v617_v29  ;;  %701 = vmatprep.subr.mxu0 %v486_v30  ;;  %v598_v47 = vld [vmem:[#allocation2 + $0x6c8] sm:$0xff]  ;;  %v597_v49 = vld [vmem:[#allocation2 + $0x6c0] sm:$0xff] }
  0x5c   :  { %814 = vmatprep.subr.mxu1 %v614_v31  ;;  %702 = vmatpush2.msra.mxu0 %v485_v32  ;;  %v466_v50 = vld [vmem:[#allocation2 + $0x2a8] sm:$0xff]  ;;  %v465_v52 = vld [vmem:[#allocation2 + $0x2a0] sm:$0xff] }
  0x5d   :  { %815 = vmatpush2.msra.mxu1 %v613_v33  ;;  %703 = vmatprep.subr.mxu0 %v482_v34  ;;  %v594_v51 = vld [vmem:[#allocation2 + $0x6a8] sm:$0xff]  ;;  %v593_v53 = vld [vmem:[#allocation2 + $0x6a0] sm:$0xff] }
  0x5e   :  { %816 = vmatprep.subr.mxu1 %v610_v35  ;;  %704 = vmatpush2.msra.mxu0 %v481_v36  ;;  %v462_v54 = vld [vmem:[#allocation2 + $0x288] sm:$0xff]  ;;  %v461_v56 = vld [vmem:[#allocation2 + $0x280] sm:$0xff] }
  0x5f   :  { %817 = vmatpush2.msra.mxu1 %v609_v37  ;;  %705 = vmatprep.subr.mxu0 %v478_v38  ;;  %v590_v55 = vld [vmem:[#allocation2 + $0x688] sm:$0xff]  ;;  %v589_v57 = vld [vmem:[#allocation2 + $0x680] sm:$0xff] }
  0x60   :  { %818 = vmatprep.subr.mxu1 %v606_v39  ;;  %706 = vmatpush2.msra.mxu0 %v477_v40  ;;  %v458_v58 = vld [vmem:[#allocation2 + $0x268] sm:$0xff]  ;;  %v457_v60 = vld [vmem:[#allocation2 + $0x260] sm:$0xff] }
  0x61   :  { %819 = vmatpush2.msra.mxu1 %v605_v41  ;;  %707 = vmatprep.subr.mxu0 %v474_v42  ;;  %v586_v59 = vld [vmem:[#allocation2 + $0x668] sm:$0xff]  ;;  %v585_v61 = vld [vmem:[#allocation2 + $0x660] sm:$0xff] }
  0x62   :  { %820 = vmatprep.subr.mxu1 %v602_v43  ;;  %708 = vmatpush2.msra.mxu0 %v473_v44  ;;  %v454_v62 = vld [vmem:[#allocation2 + $0x248] sm:$0xff]  ;;  %v453_v0 = vld [vmem:[#allocation2 + $0x240] sm:$0xff] }
  0x63   :  { %821 = vmatpush2.msra.mxu1 %v601_v45  ;;  %709 = vmatprep.subr.mxu0 %v470_v46  ;;  %v582_v63 = vld [vmem:[#allocation2 + $0x648] sm:$0xff]  ;;  %v581_v1 = vld [vmem:[#allocation2 + $0x640] sm:$0xff] }
  0x64   :  { %822 = vmatprep.subr.mxu1 %v598_v47  ;;  %710 = vmatpush2.msra.mxu0 %v469_v48  ;;  %v450_v2 = vld [vmem:[#allocation2 + $0x228] sm:$0xff]  ;;  %v449_v4 = vld [vmem:[#allocation2 + $0x220] sm:$0xff] }
  0x65   :  { %823 = vmatpush2.msra.mxu1 %v597_v49  ;;  %711 = vmatprep.subr.mxu0 %v466_v50  ;;  %v578_v3 = vld [vmem:[#allocation2 + $0x628] sm:$0xff]  ;;  %v577_v5 = vld [vmem:[#allocation2 + $0x620] sm:$0xff] }
  0x66   :  { %824 = vmatprep.subr.mxu1 %v594_v51  ;;  %712 = vmatpush2.msra.mxu0 %v465_v52  ;;  %v446_v6 = vld [vmem:[#allocation2 + $0x208] sm:$0xff]  ;;  %v445_v8 = vld [vmem:[#allocation2 + $0x200] sm:$0xff] }
  0x67   :  { %825 = vmatpush2.msra.mxu1 %v593_v53  ;;  %713 = vmatprep.subr.mxu0 %v462_v54  ;;  %v574_v7 = vld [vmem:[#allocation2 + $0x608] sm:$0xff]  ;;  %v573_v9 = vld [vmem:[#allocation2 + $0x600] sm:$0xff] }
  0x68   :  { %826 = vmatprep.subr.mxu1 %v590_v55  ;;  %714 = vmatpush2.msra.mxu0 %v461_v56  ;;  %v82_v16 = vld [vmem:[%s3413_s1] ss:$2 sm:$0xf]  ;;  %v2260_v19 = vld [vmem:[%s3413_s1 + $0x1] ss:$2 sm:$0xf] }
  0x69   :  { %827 = vmatpush2.msra.mxu1 %v589_v57  ;;  %715 = vmatprep.subr.mxu0 %v458_v58  ;;  %v2618_v20 = vrot.slane %v82_v16, %v2603_v14  ;;  %v2621_v21 = vrot.slane %v82_v16, %v2605_v15  ;;  %v295_v24 = vld [vmem:[%s3414_s2] sm:$0xf]  ;;  %v2627_v25 = vrot.slane %v82_v16, %v2610_v17 }
  0x6a   :  { %828 = vmatprep.subr.mxu1 %v586_v59  ;;  %716 = vmatpush2.msra.mxu0 %v457_v60  ;;  %v2630_v26 = vrot.slane %v82_v16, %v2612_v18  ;;  %v2633_v27 = vrot.slane %v2260_v19, %v2603_v14  ;;  %v2636_v28 = vrot.slane %v2260_v19, %v2605_v15 }
  0x6b   :  { %829 = vmatpush2.msra.mxu1 %v585_v61  ;;  %717 = vmatprep.subr.mxu0 %v454_v62  ;;  %v2639_v29 = vrot.slane %v2260_v19, %v2610_v17  ;;  %v2642_v30 = vrot.slane %v2260_v19, %v2612_v18  ;;  %v2645_v31 = vrot.slane %v295_v24, %v2605_v15 }
  0x6c   :  { %830 = vmatprep.subr.mxu1 %v582_v63  ;;  %718 = vmatpush2.msra.mxu0 %v453_v0  ;;  %v2648_v32 = vrot.slane %v295_v24, %v2612_v18  ;;  %v2653_v35 = vrot.slane %v295_v24, %v2603_v14  ;;  %v2656_v36 = vrot.slane %v295_v24, %v2610_v17  ;;  %v551_v18 = vld [vmem:[#allocation2 + $0x550] sm:$0xff] }
  0x6d   :  { %831 = vmatpush2.msra.mxu1 %v581_v1  ;;  %719 = vmatprep.subr.mxu0 %v450_v2 }
  0x6e   :  { %832 = vmatprep.subr.mxu1 %v578_v3  ;;  %720 = vmatpush2.msra.mxu0 %v449_v4 }
  0x6f   :  { %833 = vmatpush2.msra.mxu1 %v577_v5  ;;  %721 = vmatprep.subr.mxu0 %v446_v6 }
  0x70   :  { %834 = vmatprep.subr.mxu1 %v574_v7  ;;  %722 = vmatpush2.msra.mxu0 %v445_v8 }
  0x71   :  { %835 = vmatpush2.msra.mxu1 %v573_v9  ;;  %885 = vmatprep.subr.mxu0 %v444_v10 }
  0x72   :  { %998 = vmatprep.subr.mxu1 %v572_v11 }
  0xa3   :  { %v86_v22 = vpop.permute.xlu0 %85  ;;  %v91_v23 = vpop.permute.xlu1 %90 }
  0xa4   :  { %v144_v33 = vmul.f32 %v2618_v20, %v86_v22  ;;  %v145_v34 = vmul.f32 %v2621_v21, %v86_v22  ;;  %v146_v37 = vmul.f32 %v2627_v25, %v86_v22  ;;  %v147_v38 = vmul.f32 %v2630_v26, %v86_v22 }
  0xa5   :  { %v148_v39 = vmul.f32 %v2618_v20, %v91_v23  ;;  %v149_v40 = vmul.f32 %v2621_v21, %v91_v23  ;;  %v151_v47 = vmul.f32 %v2630_v26, %v91_v23  ;;  %v150_v55 = vmul.f32 %v2627_v25, %v91_v23 }
  0xa8   :  { %v180_v41 = vpop.permute.xlu0 %179  ;;  %v184_v42 = vpop.permute.xlu1 %183 }
  0xa9   :  { %v231_v43 = vmul.f32 %v2633_v27, %v180_v41  ;;  %v232_v44 = vmul.f32 %v2636_v28, %v180_v41  ;;  %v233_v45 = vmul.f32 %v2639_v29, %v180_v41  ;;  %v234_v46 = vmul.f32 %v2642_v30, %v180_v41 }
  0xaa   :  { %v235_v48 = vmul.f32 %v2633_v27, %v184_v42  ;;  %v236_v49 = vmul.f32 %v2636_v28, %v184_v42  ;;  %v238_v50 = vmul.f32 %v2642_v30, %v184_v42  ;;  %v237_v56 = vmul.f32 %v2639_v29, %v184_v42 }
  0xab   :  { %v264_v51 = vadd.f32 %v232_v44, %v145_v34  ;;  %v266_v52 = vadd.f32 %v234_v46, %v147_v38  ;;  %v263_v53 = vadd.f32 %v231_v43, %v144_v33  ;;  %v265_v54 = vadd.f32 %v233_v45, %v146_v37  ;;  %v443_v38 = vld [vmem:[#allocation2 + $0x1f0] sm:$0xff]  ;;  %v440_v45 = vld [vmem:[#allocation2 + $0x1d8] sm:$0xff] }
  0xac   :  { %v188_v57 = vpop.permute.xlu0 %187  ;;  %v268_v59 = vadd.f32 %v236_v49, %v149_v40  ;;  %v270_v60 = vadd.f32 %v238_v50, %v151_v47  ;;  %v267_v61 = vadd.f32 %v235_v48, %v148_v39  ;;  %v269_v5 = vadd.f32 %v237_v56, %v150_v55  ;;  %v571_v39 = vld [vmem:[#allocation2 + $0x5f0] sm:$0xff]  ;;  %v568_v46 = vld [vmem:[#allocation2 + $0x5d8] sm:$0xff] }
  0xad   :  { %v96_v58 = vpop.permute.xlu1 %95  ;;  %v2673_v62 = vadd.f32 %v2645_v31, %v264_v51  ;;  %v2676_v63 = vadd.f32 %v2648_v32, %v266_v52  ;;  %v2679_v0 = vadd.f32 %v2653_v35, %v263_v53  ;;  %v2682_v1 = vadd.f32 %v2656_v36, %v265_v54  ;;  %v439_v50 = vld [vmem:[#allocation2 + $0x1d0] sm:$0xff] }
  0xae   :  { %v239_v2 = vmul.f32 %v2633_v27, %v188_v57  ;;  %v240_v3 = vmul.f32 %v2636_v28, %v188_v57  ;;  %v241_v6 = vmul.f32 %v2639_v29, %v188_v57  ;;  %v242_v7 = vmul.f32 %v2642_v30, %v188_v57  ;;  %v567_v51 = vld [vmem:[#allocation2 + $0x5d0] sm:$0xff] }
  0xaf   :  { %v152_v8 = vmul.f32 %v2618_v20, %v96_v58  ;;  %v153_v9 = vmul.f32 %v2621_v21, %v96_v58  ;;  %v154_v11 = vmul.f32 %v2627_v25, %v96_v58  ;;  %v2692_v12 = vadd.f32 %v2645_v31, %v268_v59  ;;  %v564_v59 = vld [vmem:[#allocation2 + $0x5b8] sm:$0xff] }
  0xb0   :  { %v192_v4 = vpop.permute.xlu0 %191  ;;  %v2695_v13 = vadd.f32 %v2648_v32, %v270_v60  ;;  %v2698_v16 = vadd.f32 %v2653_v35, %v267_v61  ;;  %v3431_v19 = vmax.f32 %v2673_v62, 0.0  ;;  %v3430_v22 = vmax.f32 %v2676_v63, 0.0 }
  0xb1   :  { %v101_v10 = vpop.permute.xlu1 %100  ;;  %v3429_v23 = vmax.f32 %v2679_v0, 0.0  ;;  %v3422_v24 = vmax.f32 %v2682_v1, 0.0  ;;  %v155_v33 = vmul.f32 %v2630_v26, %v96_v58  ;;  %v2706_v34 = vmul.f32 %v2633_v27, %v192_v4  ;;  %v436_v58 = vld [vmem:[#allocation2 + $0x1b8] sm:$0xff] }
  0xb2   :  { %v2709_v37 = vmul.f32 %v2636_v28, %v192_v4  ;;  %v2712_v41 = vadd.f32 %v2656_v36, %v269_v5  ;;  %v2715_v42 = vmul.f32 %v2639_v29, %v192_v4  ;;  %v2718_v43 = vmul.f32 %v2642_v30, %v192_v4  ;;  %723 = vmatprep.mubr.f32.mxu0 %v3431_v19  ;;  %v552_v19 = vld [vmem:[#allocation2 + $0x558] sm:$0xff] }
  0xb3   :  { %v2721_v44 = vmul.f32 %v2618_v20, %v101_v10  ;;  %836 = vmatprep.mubr.f32.mxu1 %v3430_v22  ;;  %v157_v48 = vmul.f32 %v2621_v21, %v101_v10  ;;  %v2729_v49 = vmul.f32 %v2627_v25, %v101_v10  ;;  %724 = vmatmul.mubr.f32.vlgmr.msra.gmra.mxu0 %v3429_v23  ;;  %v3426_v52 = vmax.f32 %v2692_v12, 0.0  ;;  %v555_v23 = vld [vmem:[#allocation2 + $0x570] sm:$0xff] }
  0xb4   :  { %v196_v40 = vpop.permute.xlu0 %195  ;;  %837 = vmatmul.mubr.f32.vlgmr.msra.gmra.mxu1 %v3422_v24  ;;  %v3425_v53 = vmax.f32 %v2695_v13, 0.0  ;;  %v159_v54 = vmul.f32 %v2630_v26, %v101_v10  ;;  %886 = vmatpush1.msra.mxu0 %v443_v38  ;;  %v3423_v56 = vmax.f32 %v2698_v16, 0.0  ;;  %v272_v57 = vadd.f32 %v240_v3, %v153_v9 }
  0xb5   :  { %v106_v47 = vpop.permute.xlu1 %105  ;;  %999 = vmatpush1.msra.mxu1 %v571_v39  ;;  %v2739_v55 = vmul.f32 %v2633_v27, %v196_v40  ;;  %887 = vmatprep.subr.mxu0 %v440_v45  ;;  %v3424_v60 = vmax.f32 %v2712_v41, 0.0  ;;  %v274_v61 = vadd.f32 %v242_v7, %v155_v33  ;;  %v271_v5 = vadd.f32 %v239_v2, %v152_v8  ;;  %v435_v2 = vld [vmem:[#allocation2 + $0x1b0] sm:$0xff] }
  0xb6   :  { %1000 = vmatprep.subr.mxu1 %v568_v46  ;;  %v273_v24 = vadd.f32 %v241_v6, %v154_v11  ;;  %888 = vmatpush1.msra.mxu0 %v439_v50  ;;  %v2744_v10 = vmul.f32 %v2636_v28, %v196_v40  ;;  %v2747_v38 = vmul.f32 %v2639_v29, %v196_v40  ;;  %v563_v6 = vld [vmem:[#allocation2 + $0x5b0] sm:$0xff]  ;;  %v432_v50 = vld [vmem:[#allocation2 + $0x198] sm:$0xff] }
  0xb7   :  { %1001 = vmatpush1.msra.mxu1 %v567_v51  ;;  %v2750_v3 = vadd.f32 %v2645_v31, %v272_v57  ;;  %v2753_v9 = vmul.f32 %v2642_v30, %v196_v40  ;;  %v2756_v39 = vmul.f32 %v2618_v20, %v106_v47  ;;  %729 = vmatprep.mubr.f32.mxu0 %v3426_v52  ;;  %v560_v51 = vld [vmem:[#allocation2 + $0x598] sm:$0xff] }
  0xb8   :  { %v200_v4 = vpop.permute.xlu0 %199  ;;  %842 = vmatprep.mubr.f32.mxu1 %v3425_v53  ;;  %v2763_v7 = vadd.f32 %v2648_v32, %v274_v61  ;;  %v161_v11 = vmul.f32 %v2621_v21, %v106_v47  ;;  %v2767_v33 = vmul.f32 %v2627_v25, %v106_v47  ;;  %v163_v40 = vmul.f32 %v2630_v26, %v106_v47  ;;  %v556_v52 = vld [vmem:[#allocation2 + $0x578] sm:$0xff] }
  0xb9   :  { %v111_v8 = vpop.permute.xlu1 %110  ;;  %889 = vmatprep.subr.mxu0 %v436_v58  ;;  %1002 = vmatprep.subr.mxu1 %v564_v59  ;;  %v3428_v45 = vmax.f32 %v2750_v3, 0.0  ;;  %v2777_v57 = vmul.f32 %v2633_v27, %v200_v4  ;;  %v2780_v61 = vadd.f32 %v2653_v35, %v271_v5  ;;  %v2783_v47 = vadd.f32 %v2656_v36, %v273_v24  ;;  %v431_v58 = vld [vmem:[#allocation2 + $0x190] sm:$0xff] }
  0xba   :  { %730 = vmatmul.mubr.f32.gmra.mxu0 %v3423_v56  ;;  %843 = vmatmul.mubr.f32.gmra.mxu1 %v3424_v60  ;;  %v3427_v46 = vmax.f32 %v2763_v7, 0.0  ;;  %v559_v59 = vld [vmem:[#allocation2 + $0x590] sm:$0xff]  ;;  %v2786_v56 = vmul.f32 %v2636_v28, %v200_v4  ;;  %v276_v60 = vadd.f32 %v2709_v37, %v157_v48  ;;  %v278_v53 = vadd.f32 %v2718_v43, %v159_v54 }
  0xbb   :  { %890 = vmatpush1.msra.mxu0 %v435_v2  ;;  %1003 = vmatpush1.msra.mxu1 %v563_v6  ;;  %v2795_v24 = vmul.f32 %v2639_v29, %v200_v4  ;;  %v2798_v5 = vmul.f32 %v2642_v30, %v200_v4  ;;  %v2801_v2 = vmul.f32 %v2618_v20, %v111_v8  ;;  %v428_v6 = vld [vmem:[#allocation2 + $0x178] sm:$0xff] }
  0xbc   :  { %735 = vmatprep.mubr.f32.mxu0 %v3428_v45  ;;  %848 = vmatprep.mubr.f32.mxu1 %v3427_v46  ;;  %v204_v37 = vpop.permute.xlu0 %203  ;;  %v2804_v43 = vmul.f32 %v2621_v21, %v111_v8  ;;  %v2807_v48 = vadd.f32 %v2645_v31, %v276_v60  ;;  %v2810_v54 = vadd.f32 %v2648_v32, %v278_v53  ;;  %v427_v45 = vld [vmem:[#allocation2 + $0x170] sm:$0xff] }
  0xbd   :  { %891 = vmatprep.subr.mxu0 %v432_v50  ;;  %1004 = vmatprep.subr.mxu1 %v560_v51  ;;  %v2813_v4 = vmul.f32 %v2627_v25, %v111_v8  ;;  %v2816_v46 = vmul.f32 %v2630_v26, %v111_v8  ;;  %v3435_v50 = vmax.f32 %v2780_v61, 0.0  ;;  %v3434_v51 = vmax.f32 %v2783_v47, 0.0  ;;  %v116_v22 = vpop.permute.xlu1 %115  ;;  %v423_v53 = vld [vmem:[#allocation2 + $0x150] sm:$0xff] }
  0xbe   :  { %892 = vmatpush1.msra.mxu0 %v431_v58  ;;  %1005 = vmatpush1.msra.mxu1 %v559_v59  ;;  %v2823_v58 = vmul.f32 %v2633_v27, %v204_v37  ;;  %v275_v8 = vadd.f32 %v2706_v34, %v2721_v44  ;;  %v424_v59 = vld [vmem:[#allocation2 + $0x158] sm:$0xff]  ;;  %v282_v60 = vadd.f32 %v2753_v9, %v163_v40 }
  0xbf   :  { %893 = vmatprep.subr.mxu0 %v428_v6  ;;  %1006 = vmatprep.subr.mxu1 %v556_v52  ;;  %v277_v52 = vadd.f32 %v2715_v42, %v2729_v49  ;;  %v280_v6 = vadd.f32 %v2744_v10, %v161_v11  ;;  %v2836_v34 = vmul.f32 %v2636_v28, %v204_v37  ;;  %v3449_v42 = vmax.f32 %v2810_v54, 0.0  ;;  %v420_v49 = vld [vmem:[#allocation2 + $0x138] sm:$0xff] }
  0xc0   :  { %736 = vmatmul.mubr.f32.gmra.mxu0 %v3435_v50  ;;  %849 = vmatmul.mubr.f32.gmra.mxu1 %v3434_v51  ;;  %v2839_v44 = vmul.f32 %v2639_v29, %v204_v37  ;;  %v2842_v51 = vadd.f32 %v2653_v35, %v275_v8  ;;  %v3448_v50 = vmax.f32 %v2807_v48, 0.0  ;;  %v548_v10 = vld [vmem:[#allocation2 + $0x538] sm:$0xff]  ;;  %v2855_v11 = vadd.f32 %v2648_v32, %v282_v60  ;;  %v2857_v40 = vpop.permute.xlu0 %207  ;;  %v547_v60 = vld [vmem:[#allocation2 + $0x530] sm:$0xff] }
  0xc1   :  { %894 = vmatpush1.msra.mxu0 %v427_v45  ;;  %1007 = vmatpush1.msra.mxu1 %v555_v23  ;;  %v2849_v23 = vadd.f32 %v2656_v36, %v277_v52  ;;  %v2852_v9 = vadd.f32 %v2645_v31, %v280_v6  ;;  %v258_v45 = vmul.f32 %v2642_v30, %v204_v37 }
  0xc2   :  { %741 = vmatprep.mubr.f32.mxu0 %v3448_v50  ;;  %854 = vmatprep.mubr.f32.mxu1 %v3449_v42  ;;  %v2861_v50 = vmul.f32 %v2618_v20, %v116_v22  ;;  %v169_v8 = vmul.f32 %v2621_v21, %v116_v22  ;;  %v3443_v52 = vmax.f32 %v2842_v51, 0.0  ;;  %v419_v42 = vld [vmem:[#allocation2 + $0x130] sm:$0xff]  ;;  %v2871_v37 = vmul.f32 %v2627_v25, %v116_v22 }
  0xc3   :  { %895 = vmatprep.subr.mxu0 %v424_v59  ;;  %1008 = vmatprep.subr.mxu1 %v552_v19  ;;  %v3442_v6 = vmax.f32 %v2849_v23, 0.0  ;;  %v2868_v19 = vpop.permute.xlu1 %120  ;;  %v171_v15 = vmul.f32 %v2630_v26, %v116_v22  ;;  %v544_v59 = vld [vmem:[#allocation2 + $0x518] sm:$0xff]  ;;  %v262_v17 = vmul.f32 %v2642_v30, %v2857_v40  ;;  %v279_v14 = vadd.f32 %v2739_v55, %v2756_v39 }
  0xc4   :  { %896 = vmatpush1.msra.mxu0 %v423_v53  ;;  %1009 = vmatpush1.msra.mxu1 %v551_v18  ;;  %v260_v18 = vmul.f32 %v2636_v28, %v2857_v40  ;;  %v416_v53 = vld [vmem:[#allocation2 + $0x118] sm:$0xff]  ;;  %v281_v22 = vadd.f32 %v2747_v38, %v2767_v33  ;;  %v415_v28 = vld [vmem:[#allocation2 + $0x110] sm:$0xff]  ;;  %v3450_v30 = vmax.f32 %v2852_v9, 0.0  ;;  %v3451_v55 = vmax.f32 %v2855_v11, 0.0 }
  0xc5   :  { %897 = vmatprep.subr.mxu0 %v420_v49  ;;  %1010 = vmatprep.subr.mxu1 %v548_v10  ;;  %v543_v49 = vld [vmem:[#allocation2 + $0x510] sm:$0xff]  ;;  %v173_v10 = vmul.f32 %v2621_v21, %v2868_v19  ;;  %v412_v38 = vld [vmem:[#allocation2 + $0xf8] sm:$0xff]  ;;  %v2897_v33 = vadd.f32 %v2653_v35, %v279_v14  ;;  %v286_v21 = vadd.f32 %v2798_v5, %v2816_v46 }
  0xc6   :  { %742 = vmatmul.mubr.f32.gmra.mxu0 %v3443_v52  ;;  %855 = vmatmul.mubr.f32.gmra.mxu1 %v3442_v6  ;;  %v175_v6 = vmul.f32 %v2630_v26, %v2868_v19  ;;  %v284_v52 = vadd.f32 %v2786_v56, %v2804_v43  ;;  %v540_v39 = vld [vmem:[#allocation2 + $0x4f8] sm:$0xff]  ;;  %v283_v56 = vadd.f32 %v2777_v57, %v2801_v2 }
  0xc7   :  { %898 = vmatpush1.msra.mxu0 %v419_v42  ;;  %1011 = vmatpush1.msra.mxu1 %v547_v60  ;;  %v2900_v42 = vadd.f32 %v2656_v36, %v281_v22  ;;  %v285_v43 = vadd.f32 %v2795_v24, %v2813_v4  ;;  %v365_v14 = vmax.f32 %v2897_v33, 0.0  ;;  %v411_v22 = vld [vmem:[#allocation2 + $0xf0] sm:$0xff]  ;;  %v2914_v46 = vadd.f32 %v2648_v32, %v286_v21  ;;  %v408_v4 = vld [vmem:[#allocation2 + $0xd8] sm:$0xff]  ;;  %v1183_v33 = vld [vmem:[#allocation5 + $0x140] sm:$0xff] }
  0xc8   :  { %747 = vmatprep.mubr.f32.mxu0 %v3450_v30  ;;  %860 = vmatprep.mubr.f32.mxu1 %v3451_v55  ;;  %v2905_v26 = vadd.f32 %v2645_v31, %v284_v52  ;;  %v539_v30 = vld [vmem:[#allocation2 + $0x4f0] sm:$0xff]  ;;  %v288_v5 = vadd.f32 %v2836_v34, %v169_v8  ;;  %v290_v2 = vadd.f32 %v258_v45, %v171_v15  ;;  %v536_v52 = vld [vmem:[#allocation2 + $0x4d8] sm:$0xff] }
  0xc9   :  { %899 = vmatprep.subr.mxu0 %v416_v53  ;;  %1012 = vmatprep.subr.mxu1 %v544_v59  ;;  %v367_v60 = vmax.f32 %v2900_v42, 0.0  ;;  %v372_v24 = vmax.f32 %v2914_v46, 0.0  ;;  %v2924_v59 = vadd.f32 %v2653_v35, %v283_v56  ;;  %v2927_v34 = vadd.f32 %v2656_v36, %v285_v43  ;;  %v407_v53 = vld [vmem:[#allocation2 + $0xd0] sm:$0xff]  ;;  %v1312_v42 = vld [vmem:[#allocation5 + $0x548] sm:$0xff] }
  0xca   :  { %900 = vmatpush1.msra.mxu0 %v415_v28  ;;  %1013 = vmatpush1.msra.mxu1 %v543_v49  ;;  %v370_v57 = vmax.f32 %v2905_v26, 0.0  ;;  %v2930_v8 = vadd.f32 %v2645_v31, %v288_v5  ;;  %v259_v15 = vmul.f32 %v2633_v27, %v2857_v40  ;;  %v292_v45 = vadd.f32 %v260_v18, %v173_v10  ;;  %v535_v28 = vld [vmem:[#allocation2 + $0x4d0] sm:$0xff]  ;;  %v1180_v26 = vld [vmem:[#allocation5 + $0x128] sm:$0xff] }
  0xcb   :  { %901 = vmatprep.subr.mxu0 %v412_v38  ;;  %1014 = vmatprep.subr.mxu1 %v540_v39  ;;  %v2935_v49 = vadd.f32 %v2648_v32, %v290_v2  ;;  %v294_v55 = vadd.f32 %v262_v17, %v175_v6  ;;  %v404_v38 = vld [vmem:[#allocation2 + $0xb8] sm:$0xff]  ;;  %v287_v27 = vadd.f32 %v2823_v58, %v2861_v50  ;;  %v369_v21 = vmax.f32 %v2924_v59, 0.0  ;;  %v403_v50 = vld [vmem:[#allocation2 + $0xb0] sm:$0xff]  ;;  %v1308_v46 = vld [vmem:[#allocation5 + $0x528] sm:$0xff] }
  0xcc   :  { %748 = vmatmul.mubr.f32.gmra.mxu0 %v365_v14  ;;  %861 = vmatmul.mubr.f32.gmra.mxu1 %v367_v60  ;;  %v532_v39 = vld [vmem:[#allocation2 + $0x4b8] sm:$0xff]  ;;  %v289_v18 = vadd.f32 %v2839_v44, %v2871_v37  ;;  %v261_v10 = vmul.f32 %v2639_v29, %v2857_v40  ;;  %v172_v17 = vmul.f32 %v2618_v20, %v2868_v19  ;;  %v371_v58 = vmax.f32 %v2927_v34, 0.0  ;;  %v531_v56 = vld [vmem:[#allocation2 + $0x4b0] sm:$0xff]  ;;  %v1175_v59 = vld [vmem:[#allocation5 + $0x100] sm:$0xff] }
  0xcd   :  { %902 = vmatpush1.msra.mxu0 %v411_v22  ;;  %1015 = vmatpush1.msra.mxu1 %v539_v30  ;;  %v174_v6 = vmul.f32 %v2627_v25, %v2868_v19  ;;  %v374_v44 = vmax.f32 %v2930_v8, 0.0  ;;  %v376_v29 = vmax.f32 %v2935_v49, 0.0  ;;  %v2956_v20 = vadd.f32 %v2645_v31, %v292_v45  ;;  %v400_v25 = vld [vmem:[#allocation2 + $0x98] sm:$0xff]  ;;  %v399_v31 = vld [vmem:[#allocation2 + $0x90] sm:$0xff]  ;;  %v1304_v34 = vld [vmem:[#allocation5 + $0x508] sm:$0xff] }
  0xce   :  { %753 = vmatprep.mubr.f32.mxu0 %v370_v57  ;;  %866 = vmatprep.mubr.f32.mxu1 %v372_v24  ;;  %v528_v40 = vld [vmem:[#allocation2 + $0x498] sm:$0xff]  ;;  %v2963_v19 = vadd.f32 %v2653_v35, %v287_v27  ;;  %v2966_v37 = vadd.f32 %v2656_v36, %v289_v18  ;;  %v2969_v43 = vadd.f32 %v2648_v32, %v294_v55  ;;  %v527_v22 = vld [vmem:[#allocation2 + $0x490] sm:$0xff]  ;;  %v1172_v8 = vld [vmem:[#allocation5 + $0xe8] sm:$0xff] }
  0xcf   :  { %903 = vmatprep.subr.mxu0 %v408_v4  ;;  %1016 = vmatprep.subr.mxu1 %v536_v52  ;;  %v291_v30 = vadd.f32 %v259_v15, %v172_v17  ;;  %v293_v5 = vadd.f32 %v261_v10, %v174_v6  ;;  %v396_v2 = vld [vmem:[#allocation2 + $0x78] sm:$0xff]  ;;  %v395_v45 = vld [vmem:[#allocation2 + $0x70] sm:$0xff]  ;;  %v378_v15 = vmax.f32 %v2956_v20, 0.0  ;;  %v1303_v49 = vld [vmem:[#allocation5 + $0x500] sm:$0xff] }
  0xd0   :  { %904 = vmatpush1.msra.mxu0 %v407_v53  ;;  %1017 = vmatpush1.msra.mxu1 %v535_v28  ;;  %v524_v4 = vld [vmem:[#allocation2 + $0x478] sm:$0xff]  ;;  %v373_v32 = vmax.f32 %v2963_v19, 0.0  ;;  %v375_v52 = vmax.f32 %v2966_v37, 0.0  ;;  %v523_v53 = vld [vmem:[#allocation2 + $0x470] sm:$0xff]  ;;  %v380_v28 = vmax.f32 %v2969_v43, 0.0  ;;  %v1167_v20 = vld [vmem:[#allocation5 + $0xc0] sm:$0xff] }
  0xd1   :  { %905 = vmatprep.subr.mxu0 %v404_v38  ;;  %1018 = vmatprep.subr.mxu1 %v532_v39  ;;  %v392_v55 = vld [vmem:[#allocation2 + $0x58] sm:$0xff]  ;;  %v2984_v39 = vadd.f32 %v2653_v35, %v291_v30  ;;  %v2987_v27 = vadd.f32 %v2656_v36, %v293_v5  ;;  %v391_v18 = vld [vmem:[#allocation2 + $0x50] sm:$0xff]  ;;  %v3452_v30 = vmax.f32 %v2673_v62, 0.0  ;;  %v1296_v19 = vld [vmem:[#allocation5 + $0x4c8] sm:$0xff] }
  0xd2   :  { %754 = vmatmul.mubr.f32.gmra.mxu0 %v369_v21  ;;  %867 = vmatmul.mubr.f32.gmra.mxu1 %v371_v58  ;;  %v520_v38 = vld [vmem:[#allocation2 + $0x458] sm:$0xff]  ;;  %v519_v10 = vld [vmem:[#allocation2 + $0x450] sm:$0xff]  ;;  %v1164_v37 = vld [vmem:[#allocation5 + $0xa8] sm:$0xff] }
  0xd3   :  { %906 = vmatpush1.msra.mxu0 %v403_v50  ;;  %1019 = vmatpush1.msra.mxu1 %v531_v56  ;;  %v388_v17 = vld [vmem:[#allocation2 + $0x38] sm:$0xff]  ;;  %v377_v35 = vmax.f32 %v2984_v39, 0.0  ;;  %v379_v36 = vmax.f32 %v2987_v27, 0.0  ;;  %v387_v50 = vld [vmem:[#allocation2 + $0x30] sm:$0xff]  ;;  %v1295_v43 = vld [vmem:[#allocation5 + $0x4c0] sm:$0xff] }
  0xd4   :  { %759 = vmatprep.mubr.f32.mxu0 %v374_v44  ;;  %872 = vmatprep.mubr.f32.mxu1 %v376_v29  ;;  %v516_v6 = vld [vmem:[#allocation2 + $0x438] sm:$0xff]  ;;  %v515_v56 = vld [vmem:[#allocation2 + $0x430] sm:$0xff]  ;;  %v1159_v39 = vld [vmem:[#allocation5 + $0x80] sm:$0xff] }
  0xd5   :  { %907 = vmatprep.subr.mxu0 %v400_v25  ;;  %1020 = vmatprep.subr.mxu1 %v528_v40  ;;  %v384_v25 = vld [vmem:[#allocation2 + $0x18] sm:$0xff]  ;;  %v1288_v27 = vld [vmem:[#allocation5 + $0x488] sm:$0xff] }
  0xd6   :  { %908 = vmatpush1.msra.mxu0 %v399_v31  ;;  %1021 = vmatpush1.msra.mxu1 %v527_v22  ;;  %v512_v40 = vld [vmem:[#allocation2 + $0x418] sm:$0xff]  ;;  %v383_v31 = vld [vmem:[#allocation2 + $0x10] sm:$0xff] }
  0xd7   :  { %909 = vmatprep.subr.mxu0 %v396_v2  ;;  %1022 = vmatprep.subr.mxu1 %v524_v4  ;;  %v511_v22 = vld [vmem:[#allocation2 + $0x410] sm:$0xff]  ;;  %v508_v5 = vld [vmem:[#allocation2 + $0x3f8] sm:$0xff]  ;;  %v3453_v4 = vmax.f32 %v2676_v63, 0.0 }
  0xd8   :  { %760 = vmatmul.mubr.f32.gmra.mxu0 %v373_v32  ;;  %873 = vmatmul.mubr.f32.gmra.mxu1 %v375_v52  ;;  %v636_v2 = vld [vmem:[#allocation2 + $0x7f8] sm:$0xff] }
  0xd9   :  { %910 = vmatpush1.msra.mxu0 %v395_v45  ;;  %1023 = vmatpush1.msra.mxu1 %v523_v53  ;;  %v507_v45 = vld [vmem:[#allocation2 + $0x3f0] sm:$0xff]  ;;  %v500_v62 = vld [vmem:[#allocation2 + $0x3b8] sm:$0xff] }
  0xda   :  { %765 = vmatprep.mubr.f32.mxu0 %v378_v15  ;;  %878 = vmatprep.mubr.f32.mxu1 %v380_v28  ;;  %v635_v53 = vld [vmem:[#allocation2 + $0x7f0] sm:$0xff]  ;;  %v496_v63 = vld [vmem:[#allocation2 + $0x398] sm:$0xff] }
  0xdb   :  { %911 = vmatprep.subr.mxu0 %v392_v55  ;;  %1024 = vmatprep.subr.mxu1 %v520_v38  ;;  %v504_v55 = vld [vmem:[#allocation2 + $0x3d8] sm:$0xff] }
  0xdc   :  { %912 = vmatpush1.msra.mxu0 %v391_v18  ;;  %1025 = vmatpush1.msra.mxu1 %v519_v10  ;;  %v632_v38 = vld [vmem:[#allocation2 + $0x7d8] sm:$0xff]  ;;  %v503_v18 = vld [vmem:[#allocation2 + $0x3d0] sm:$0xff] }
  0xdd   :  { %913 = vmatprep.subr.mxu0 %v388_v17  ;;  %1026 = vmatprep.subr.mxu1 %v516_v6  ;;  %v631_v10 = vld [vmem:[#allocation2 + $0x7d0] sm:$0xff]  ;;  %v628_v17 = vld [vmem:[#allocation2 + $0x7b8] sm:$0xff] }
  0xde   :  { %766 = vmatmul.mubr.f32.gmra.mxu0 %v377_v35  ;;  %879 = vmatmul.mubr.f32.gmra.mxu1 %v379_v36  ;;  %v499_v6 = vld [vmem:[#allocation2 + $0x3b0] sm:$0xff] }
  0xdf   :  { %914 = vmatpush1.msra.mxu0 %v387_v50  ;;  %1027 = vmatpush1.msra.mxu1 %v515_v56  ;;  %v627_v50 = vld [vmem:[#allocation2 + $0x7b0] sm:$0xff]  ;;  %v624_v56 = vld [vmem:[#allocation2 + $0x798] sm:$0xff] }
  0xe0   :  { %915 = vmatprep.subr.mxu0 %v384_v25  ;;  %949 = vmatprep.mubr.f32.mxu0 %v3452_v30  ;;  %v495_v25 = vld [vmem:[#allocation2 + $0x390] sm:$0xff] }
  0xe1   :  { %1028 = vmatprep.subr.mxu1 %v512_v40  ;;  %1062 = vmatprep.mubr.f32.mxu1 %v3453_v4  ;;  %v623_v40 = vld [vmem:[#allocation2 + $0x790] sm:$0xff]  ;;  %v616_v4 = vld [vmem:[#allocation2 + $0x758] sm:$0xff] }
  0xe2   :  { %916 = vmatpush1.msra.mxu0 %v383_v31  ;;  %1029 = vmatpush1.msra.mxu1 %v511_v22  ;;  %v492_v31 = vld [vmem:[#allocation2 + $0x378] sm:$0xff]  ;;  %v491_v30 = vld [vmem:[#allocation2 + $0x370] sm:$0xff] }
  0xe3   :  { %917 = vmatprep.subr.mxu0 %v508_v5  ;;  %1030 = vmatprep.subr.mxu1 %v636_v2  ;;  %v620_v22 = vld [vmem:[#allocation2 + $0x778] sm:$0xff]  ;;  %v619_v5 = vld [vmem:[#allocation2 + $0x770] sm:$0xff] }
  0xe4   :  { %918 = vmatpush2.msra.mxu0 %v507_v45  ;;  %1031 = vmatpush2.msra.mxu1 %v635_v53  ;;  %v488_v2 = vld [vmem:[#allocation2 + $0x358] sm:$0xff]  ;;  %v487_v45 = vld [vmem:[#allocation2 + $0x350] sm:$0xff] }
  0xe5   :  { %919 = vmatprep.subr.mxu0 %v504_v55  ;;  %1032 = vmatprep.subr.mxu1 %v632_v38  ;;  %v615_v53 = vld [vmem:[#allocation2 + $0x750] sm:$0xff]  ;;  %v484_v55 = vld [vmem:[#allocation2 + $0x338] sm:$0xff] }
  0xe6   :  { %920 = vmatpush2.msra.mxu0 %v503_v18  ;;  %1033 = vmatpush2.msra.mxu1 %v631_v10  ;;  %v612_v38 = vld [vmem:[#allocation2 + $0x738] sm:$0xff]  ;;  %v483_v18 = vld [vmem:[#allocation2 + $0x330] sm:$0xff] }
  0xe7   :  { %921 = vmatprep.subr.mxu0 %v500_v62  ;;  %1034 = vmatprep.subr.mxu1 %v628_v17  ;;  %v611_v10 = vld [vmem:[#allocation2 + $0x730] sm:$0xff]  ;;  %v480_v62 = vld [vmem:[#allocation2 + $0x318] sm:$0xff] }
  0xe8   :  { %922 = vmatpush2.msra.mxu0 %v499_v6  ;;  %1035 = vmatpush2.msra.mxu1 %v627_v50  ;;  %v608_v17 = vld [vmem:[#allocation2 + $0x718] sm:$0xff]  ;;  %v479_v6 = vld [vmem:[#allocation2 + $0x310] sm:$0xff] }
  0xe9   :  { %923 = vmatprep.subr.mxu0 %v496_v63  ;;  %1036 = vmatprep.subr.mxu1 %v624_v56  ;;  %v607_v50 = vld [vmem:[#allocation2 + $0x710] sm:$0xff]  ;;  %v476_v63 = vld [vmem:[#allocation2 + $0x2f8] sm:$0xff] }
  0xea   :  { %924 = vmatpush2.msra.mxu0 %v495_v25  ;;  %1037 = vmatpush2.msra.mxu1 %v623_v40  ;;  %v604_v56 = vld [vmem:[#allocation2 + $0x6f8] sm:$0xff]  ;;  %v475_v25 = vld [vmem:[#allocation2 + $0x2f0] sm:$0xff] }
  0xeb   :  { %925 = vmatprep.subr.mxu0 %v492_v31  ;;  %1038 = vmatprep.subr.mxu1 %v620_v22  ;;  %v603_v40 = vld [vmem:[#allocation2 + $0x6f0] sm:$0xff]  ;;  %v472_v31 = vld [vmem:[#allocation2 + $0x2d8] sm:$0xff] }
  0xec   :  { %926 = vmatpush2.msra.mxu0 %v491_v30  ;;  %1039 = vmatpush2.msra.mxu1 %v619_v5  ;;  %v600_v22 = vld [vmem:[#allocation2 + $0x6d8] sm:$0xff]  ;;  %v471_v30 = vld [vmem:[#allocation2 + $0x2d0] sm:$0xff] }
  0xed   :  { %927 = vmatprep.subr.mxu0 %v488_v2  ;;  %1040 = vmatprep.subr.mxu1 %v616_v4  ;;  %v599_v5 = vld [vmem:[#allocation2 + $0x6d0] sm:$0xff]  ;;  %v468_v2 = vld [vmem:[#allocation2 + $0x2b8] sm:$0xff] }
  0xee   :  { %928 = vmatpush2.msra.mxu0 %v487_v45  ;;  %1041 = vmatpush2.msra.mxu1 %v615_v53  ;;  %v596_v4 = vld [vmem:[#allocation2 + $0x6b8] sm:$0xff]  ;;  %v467_v45 = vld [vmem:[#allocation2 + $0x2b0] sm:$0xff] }
  0xef   :  { %929 = vmatprep.subr.mxu0 %v484_v55  ;;  %1042 = vmatprep.subr.mxu1 %v612_v38  ;;  %v595_v53 = vld [vmem:[#allocation2 + $0x6b0] sm:$0xff]  ;;  %v464_v55 = vld [vmem:[#allocation2 + $0x298] sm:$0xff] }
  0xf0   :  { %930 = vmatpush2.msra.mxu0 %v483_v18  ;;  %1043 = vmatpush2.msra.mxu1 %v611_v10  ;;  %v592_v38 = vld [vmem:[#allocation2 + $0x698] sm:$0xff]  ;;  %v463_v18 = vld [vmem:[#allocation2 + $0x290] sm:$0xff] }
  0xf1   :  { %931 = vmatprep.subr.mxu0 %v480_v62  ;;  %1044 = vmatprep.subr.mxu1 %v608_v17  ;;  %v591_v10 = vld [vmem:[#allocation2 + $0x690] sm:$0xff]  ;;  %v460_v62 = vld [vmem:[#allocation2 + $0x278] sm:$0xff] }
  0xf2   :  { %932 = vmatpush2.msra.mxu0 %v479_v6  ;;  %1045 = vmatpush2.msra.mxu1 %v607_v50  ;;  %v588_v17 = vld [vmem:[#allocation2 + $0x678] sm:$0xff]  ;;  %v459_v6 = vld [vmem:[#allocation2 + $0x270] sm:$0xff] }
  0xf3   :  { %933 = vmatprep.subr.mxu0 %v476_v63  ;;  %1046 = vmatprep.subr.mxu1 %v604_v56  ;;  %v587_v50 = vld [vmem:[#allocation2 + $0x670] sm:$0xff]  ;;  %v456_v63 = vld [vmem:[#allocation2 + $0x258] sm:$0xff] }
  0xf4   :  { %934 = vmatpush2.msra.mxu0 %v475_v25  ;;  %1047 = vmatpush2.msra.mxu1 %v603_v40  ;;  %v584_v56 = vld [vmem:[#allocation2 + $0x658] sm:$0xff]  ;;  %v455_v25 = vld [vmem:[#allocation2 + $0x250] sm:$0xff] }
  0xf5   :  { %935 = vmatprep.subr.mxu0 %v472_v31  ;;  %1048 = vmatprep.subr.mxu1 %v600_v22  ;;  %v583_v40 = vld [vmem:[#allocation2 + $0x650] sm:$0xff]  ;;  %v452_v31 = vld [vmem:[#allocation2 + $0x238] sm:$0xff] }
  0xf6   :  { %936 = vmatpush2.msra.mxu0 %v471_v30  ;;  %1049 = vmatpush2.msra.mxu1 %v599_v5  ;;  %v580_v22 = vld [vmem:[#allocation2 + $0x638] sm:$0xff]  ;;  %v451_v30 = vld [vmem:[#allocation2 + $0x230] sm:$0xff] }
  0xf7   :  { %937 = vmatprep.subr.mxu0 %v468_v2  ;;  %1050 = vmatprep.subr.mxu1 %v596_v4  ;;  %v579_v5 = vld [vmem:[#allocation2 + $0x630] sm:$0xff]  ;;  %v448_v2 = vld [vmem:[#allocation2 + $0x218] sm:$0xff] }
  0xf8   :  { %938 = vmatpush2.msra.mxu0 %v467_v45  ;;  %1051 = vmatpush2.msra.mxu1 %v595_v53  ;;  %v576_v4 = vld [vmem:[#allocation2 + $0x618] sm:$0xff]  ;;  %v447_v45 = vld [vmem:[#allocation2 + $0x210] sm:$0xff] }
  0xf9   :  { %939 = vmatprep.subr.mxu0 %v464_v55  ;;  %1052 = vmatprep.subr.mxu1 %v592_v38  ;;  %v575_v53 = vld [vmem:[#allocation2 + $0x610] sm:$0xff]  ;;  %v1204_v55 = vld [vmem:[#allocation5 + $0x1e8] sm:$0xff]  ;;  %v3454_v38 = vmax.f32 %v2679_v0, 0.0  ;;  %v3459_v0 = vmax.f32 %v2712_v41, 0.0  ;;  %v3463_v41 = vmax.f32 %v2783_v47, 0.0  ;;  %v3467_v47 = vmax.f32 %v2849_v23, 0.0 }
  0xfa   :  { %940 = vmatpush2.msra.mxu0 %v463_v18  ;;  %1053 = vmatpush2.msra.mxu1 %v591_v10  ;;  %v3455_v18 = vmax.f32 %v2682_v1, 0.0  ;;  %v1203_v10 = vld [vmem:[#allocation5 + $0x1e0] sm:$0xff]  ;;  %v1316_v23 = vld [vmem:[#allocation5 + $0x568] sm:$0xff] }
  0xfb   :  { %941 = vmatprep.subr.mxu0 %v460_v62  ;;  %1054 = vmatprep.subr.mxu1 %v588_v17  ;;  %v3456_v62 = vmax.f32 %v2692_v12, 0.0  ;;  %v3457_v17 = vmax.f32 %v2695_v13, 0.0  ;;  %v1199_v1 = vld [vmem:[#allocation5 + $0x1c0] sm:$0xff]  ;;  %v3460_v12 = vmax.f32 %v2750_v3, 0.0  ;;  %v3461_v13 = vmax.f32 %v2763_v7, 0.0 }
  0xfc   :  { %942 = vmatpush2.msra.mxu0 %v459_v6  ;;  %1055 = vmatpush2.msra.mxu1 %v587_v50  ;;  %v1332_v6 = vld [vmem:[#allocation5 + $0x5e8] sm:$0xff]  ;;  %v3464_v3 = vmax.f32 %v2807_v48, 0.0  ;;  %v3465_v7 = vmax.f32 %v2810_v54, 0.0  ;;  %v3468_v48 = vmax.f32 %v2852_v9, 0.0  ;;  %v3469_v54 = vmax.f32 %v2855_v11, 0.0  ;;  %v1315_v11 = vld [vmem:[#allocation5 + $0x560] sm:$0xff] }
  0xfd   :  { %943 = vmatprep.subr.mxu0 %v456_v63  ;;  %1056 = vmatprep.subr.mxu1 %v584_v56  ;;  %v1200_v50 = vld [vmem:[#allocation5 + $0x1c8] sm:$0xff]  ;;  %v1331_v63 = vld [vmem:[#allocation5 + $0x5e0] sm:$0xff]  ;;  %v3458_v56 = vmax.f32 %v2698_v16, 0.0  ;;  %v3462_v16 = vmax.f32 %v2780_v61, 0.0  ;;  %v3466_v61 = vmax.f32 %v2842_v51, 0.0 }
  0xfe   :  { %944 = vmatpush2.msra.mxu0 %v455_v25  ;;  %1057 = vmatpush2.msra.mxu1 %v583_v40  ;;  %v1328_v25 = vld [vmem:[#allocation5 + $0x5c8] sm:$0xff]  ;;  %v1187_v51 = vld [vmem:[#allocation5 + $0x160] sm:$0xff] }
  0xff   :  { %945 = vmatprep.subr.mxu0 %v452_v31  ;;  %1058 = vmatprep.subr.mxu1 %v580_v22  ;;  %v1196_v40 = vld [vmem:[#allocation5 + $0x1a8] sm:$0xff]  ;;  %v1327_v31 = vld [vmem:[#allocation5 + $0x5c0] sm:$0xff] }
 0x100   :  { %946 = vmatpush2.msra.mxu0 %v451_v30  ;;  %1059 = vmatpush2.msra.mxu1 %v579_v5  ;;  %v1195_v22 = vld [vmem:[#allocation5 + $0x1a0] sm:$0xff]  ;;  %v1324_v30 = vld [vmem:[#allocation5 + $0x5a8] sm:$0xff] }
 0x101   :  { %947 = vmatprep.subr.mxu0 %v448_v2  ;;  %1060 = vmatprep.subr.mxu1 %v576_v4  ;;  %v1192_v5 = vld [vmem:[#allocation5 + $0x188] sm:$0xff]  ;;  %v1323_v2 = vld [vmem:[#allocation5 + $0x5a0] sm:$0xff] }
 0x102   :  { %948 = vmatpush2.msra.mxu0 %v447_v45  ;;  %1061 = vmatpush2.msra.mxu1 %v575_v53  ;;  %v1191_v4 = vld [vmem:[#allocation5 + $0x180] sm:$0xff]  ;;  %v1320_v45 = vld [vmem:[#allocation5 + $0x588] sm:$0xff] }
 0x103   :  { %950 = vmatmul.mubr.f32.vlgmr.msra.gmra.mxu0 %v3454_v38  ;;  %1063 = vmatmul.mubr.f32.vlgmr.msra.gmra.mxu1 %v3455_v18  ;;  %v1188_v53 = vld [vmem:[#allocation5 + $0x168] sm:$0xff]  ;;  %v1155_v38 = vld [vmem:[#allocation5 + $0x60] sm:$0xff] }
 0x104   :  { %955 = vmatprep.mubr.f32.mxu0 %v3456_v62  ;;  %1068 = vmatprep.mubr.f32.mxu1 %v3457_v17  ;;  %v1184_v9 = vld [vmem:[#allocation5 + $0x148] sm:$0xff]  ;;  %v1283_v62 = vld [vmem:[#allocation5 + $0x460] sm:$0xff] }
 0x105   :  { %1421 = vmatprep.subr.mxu0 %v1204_v55  ;;  %1534 = vmatprep.subr.mxu1 %v1332_v6  ;;  %v1319_v55 = vld [vmem:[#allocation5 + $0x580] sm:$0xff]  ;;  %v1284_v18 = vld [vmem:[#allocation5 + $0x468] sm:$0xff] }
 0x106   :  { %1422 = vmatpush1.msra.mxu0 %v1203_v10  ;;  %1535 = vmatpush1.msra.mxu1 %v1331_v63  ;;  %v1152_v10 = vld [vmem:[#allocation5 + $0x48] sm:$0xff]  ;;  %v1151_v17 = vld [vmem:[#allocation5 + $0x40] sm:$0xff] }
 0x107   :  { %956 = vmatmul.mubr.f32.gmra.mxu0 %v3458_v56  ;;  %1069 = vmatmul.mubr.f32.gmra.mxu1 %v3459_v0  ;;  %v1280_v6 = vld [vmem:[#allocation5 + $0x448] sm:$0xff]  ;;  %v1279_v63 = vld [vmem:[#allocation5 + $0x440] sm:$0xff] }
 0x108   :  { %961 = vmatprep.mubr.f32.mxu0 %v3460_v12  ;;  %1074 = vmatprep.mubr.f32.mxu1 %v3461_v13  ;;  %v1147_v56 = vld [vmem:[#allocation5 + $0x20] sm:$0xff]  ;;  %v1276_v0 = vld [vmem:[#allocation5 + $0x428] sm:$0xff] }
 0x109   :  { %1423 = vmatprep.subr.mxu0 %v1200_v50  ;;  %1536 = vmatprep.subr.mxu1 %v1328_v25  ;;  %v1148_v50 = vld [vmem:[#allocation5 + $0x28] sm:$0xff]  ;;  %v1275_v25 = vld [vmem:[#allocation5 + $0x420] sm:$0xff] }
 0x10a   :  { %1424 = vmatpush1.msra.mxu0 %v1199_v1  ;;  %1537 = vmatpush1.msra.mxu1 %v1327_v31  ;;  %v1144_v1 = vld [vmem:[#allocation5 + $0x8] sm:$0xff]  ;;  %v1143_v12 = vld [vmem:[#allocation5] sm:$0xff] }
 0x10b   :  { %962 = vmatmul.mubr.f32.gmra.mxu0 %v3462_v16  ;;  %1075 = vmatmul.mubr.f32.gmra.mxu1 %v3463_v41  ;;  %v1272_v13 = vld [vmem:[#allocation5 + $0x408] sm:$0xff]  ;;  %v1271_v31 = vld [vmem:[#allocation5 + $0x400] sm:$0xff] }
 0x10c   :  { %967 = vmatprep.mubr.f32.mxu0 %v3464_v3  ;;  %1080 = vmatprep.mubr.f32.mxu1 %v3465_v7  ;;  %v1267_v16 = vld [vmem:[#allocation5 + $0x3e0] sm:$0xff]  ;;  %v1396_v41 = vld [vmem:[#allocation5 + $0x7e8] sm:$0xff] }
 0x10d   :  { %1425 = vmatprep.subr.mxu0 %v1196_v40  ;;  %1538 = vmatprep.subr.mxu1 %v1324_v30  ;;  %v1268_v40 = vld [vmem:[#allocation5 + $0x3e8] sm:$0xff]  ;;  %v1395_v30 = vld [vmem:[#allocation5 + $0x7e0] sm:$0xff] }
 0x10e   :  { %1426 = vmatpush1.msra.mxu0 %v1195_v22  ;;  %1539 = vmatpush1.msra.mxu1 %v1323_v2  ;;  %v1264_v22 = vld [vmem:[#allocation5 + $0x3c8] sm:$0xff]  ;;  %v1263_v3 = vld [vmem:[#allocation5 + $0x3c0] sm:$0xff] }
 0x10f   :  { %968 = vmatmul.mubr.f32.gmra.mxu0 %v3466_v61  ;;  %1081 = vmatmul.mubr.f32.gmra.mxu1 %v3467_v47  ;;  %v1392_v7 = vld [vmem:[#allocation5 + $0x7c8] sm:$0xff]  ;;  %v1391_v2 = vld [vmem:[#allocation5 + $0x7c0] sm:$0xff] }
 0x110   :  { %973 = vmatprep.mubr.f32.mxu0 %v3468_v48  ;;  %1086 = vmatprep.mubr.f32.mxu1 %v3469_v54  ;;  %v1259_v61 = vld [vmem:[#allocation5 + $0x3a0] sm:$0xff]  ;;  %v1388_v47 = vld [vmem:[#allocation5 + $0x7a8] sm:$0xff] }
 0x111   :  { %1427 = vmatprep.subr.mxu0 %v1192_v5  ;;  %1540 = vmatprep.subr.mxu1 %v1320_v45  ;;  %v1260_v5 = vld [vmem:[#allocation5 + $0x3a8] sm:$0xff]  ;;  %v1387_v45 = vld [vmem:[#allocation5 + $0x7a0] sm:$0xff] }
 0x112   :  { %1428 = vmatpush1.msra.mxu0 %v1191_v4  ;;  %1541 = vmatpush1.msra.mxu1 %v1319_v55  ;;  %v1256_v4 = vld [vmem:[#allocation5 + $0x388] sm:$0xff]  ;;  %v1255_v48 = vld [vmem:[#allocation5 + $0x380] sm:$0xff] }
 0x113   :  { %974 = vmatmul.mubr.f32.gmra.mxu0 %v365_v14  ;;  %1087 = vmatmul.mubr.f32.gmra.mxu1 %v367_v60  ;;  %v1311_v14 = vld [vmem:[#allocation5 + $0x540] sm:$0xff]  ;;  %v1384_v54 = vld [vmem:[#allocation5 + $0x788] sm:$0xff] }
 0x114   :  { %979 = vmatprep.mubr.f32.mxu0 %v370_v57  ;;  %1092 = vmatprep.mubr.f32.mxu1 %v372_v24  ;;  %v1179_v60 = vld [vmem:[#allocation5 + $0x120] sm:$0xff]  ;;  %v1176_v57 = vld [vmem:[#allocation5 + $0x108] sm:$0xff] }
 0x115   :  { %1429 = vmatprep.subr.mxu0 %v1188_v53  ;;  %1542 = vmatprep.subr.mxu1 %v1316_v23  ;;  %v1307_v24 = vld [vmem:[#allocation5 + $0x520] sm:$0xff]  ;;  %v1252_v53 = vld [vmem:[#allocation5 + $0x368] sm:$0xff] }
 0x116   :  { %1430 = vmatpush1.msra.mxu0 %v1187_v51  ;;  %1543 = vmatpush1.msra.mxu1 %v1315_v11  ;;  %v1383_v55 = vld [vmem:[#allocation5 + $0x780] sm:$0xff]  ;;  %v1380_v23 = vld [vmem:[#allocation5 + $0x768] sm:$0xff] }
 0x117   :  { %980 = vmatmul.mubr.f32.gmra.mxu0 %v369_v21  ;;  %1093 = vmatmul.mubr.f32.gmra.mxu1 %v371_v58  ;;  %v1171_v21 = vld [vmem:[#allocation5 + $0xe0] sm:$0xff]  ;;  %v1300_v58 = vld [vmem:[#allocation5 + $0x4e8] sm:$0xff] }
 0x118   :  { %985 = vmatprep.mubr.f32.mxu0 %v374_v44  ;;  %1098 = vmatprep.mubr.f32.mxu1 %v376_v29  ;;  %v1168_v44 = vld [vmem:[#allocation5 + $0xc8] sm:$0xff]  ;;  %v1299_v29 = vld [vmem:[#allocation5 + $0x4e0] sm:$0xff] }
 0x119   :  { %1431 = vmatprep.subr.mxu0 %v1184_v9  ;;  %1544 = vmatprep.subr.mxu1 %v1312_v42  ;;  %v1251_v51 = vld [vmem:[#allocation5 + $0x360] sm:$0xff]  ;;  %v1248_v9 = vld [vmem:[#allocation5 + $0x348] sm:$0xff] }
 0x11a   :  { %1432 = vmatpush1.msra.mxu0 %v1183_v33  ;;  %1545 = vmatpush1.msra.mxu1 %v1311_v14  ;;  %v1379_v11 = vld [vmem:[#allocation5 + $0x760] sm:$0xff]  ;;  %v1376_v42 = vld [vmem:[#allocation5 + $0x748] sm:$0xff] }
 0x11b   :  { %986 = vmatmul.mubr.f32.gmra.mxu0 %v373_v32  ;;  %1099 = vmatmul.mubr.f32.gmra.mxu1 %v375_v52  ;;  %v1163_v32 = vld [vmem:[#allocation5 + $0xa0] sm:$0xff]  ;;  %v1292_v52 = vld [vmem:[#allocation5 + $0x4a8] sm:$0xff] }
 0x11c   :  { %991 = vmatprep.mubr.f32.mxu0 %v378_v15  ;;  %1104 = vmatprep.mubr.f32.mxu1 %v380_v28  ;;  %v1160_v15 = vld [vmem:[#allocation5 + $0x88] sm:$0xff]  ;;  %v1291_v28 = vld [vmem:[#allocation5 + $0x4a0] sm:$0xff] }
 0x11d   :  { %1433 = vmatprep.subr.mxu0 %v1180_v26  ;;  %1546 = vmatprep.subr.mxu1 %v1308_v46  ;;  %v1247_v33 = vld [vmem:[#allocation5 + $0x340] sm:$0xff]  ;;  %v1244_v26 = vld [vmem:[#allocation5 + $0x328] sm:$0xff] }
 0x11e   :  { %1434 = vmatpush1.msra.mxu0 %v1179_v60  ;;  %1547 = vmatpush1.msra.mxu1 %v1307_v24  ;;  %v1375_v14 = vld [vmem:[#allocation5 + $0x740] sm:$0xff]  ;;  %v1372_v46 = vld [vmem:[#allocation5 + $0x728] sm:$0xff] }
 0x11f   :  { %992 = vmatmul.mubr.f32.gmra.mxu0 %v377_v35  ;;  %1105 = vmatmul.mubr.f32.gmra.mxu1 %v379_v36  ;;  %v1156_v35 = vld [vmem:[#allocation5 + $0x68] sm:$0xff]  ;;  %v1287_v36 = vld [vmem:[#allocation5 + $0x480] sm:$0xff] }
 0x120   :  { %1435 = vmatprep.subr.mxu0 %v1176_v57  ;;  %1548 = vmatprep.subr.mxu1 %v1304_v34  ;;  %v1243_v60 = vld [vmem:[#allocation5 + $0x320] sm:$0xff]  ;;  %v1240_v57 = vld [vmem:[#allocation5 + $0x308] sm:$0xff] }
 0x121   :  { %1436 = vmatpush1.msra.mxu0 %v1175_v59  ;;  %1549 = vmatpush1.msra.mxu1 %v1303_v49  ;;  %v1371_v24 = vld [vmem:[#allocation5 + $0x720] sm:$0xff]  ;;  %v1368_v34 = vld [vmem:[#allocation5 + $0x708] sm:$0xff] }
 0x122   :  { %1437 = vmatprep.subr.mxu0 %v1172_v8  ;;  %1550 = vmatprep.subr.mxu1 %v1300_v58  ;;  %v1239_v59 = vld [vmem:[#allocation5 + $0x300] sm:$0xff]  ;;  %v1236_v8 = vld [vmem:[#allocation5 + $0x2e8] sm:$0xff] }
 0x123   :  { %1438 = vmatpush1.msra.mxu0 %v1171_v21  ;;  %1551 = vmatpush1.msra.mxu1 %v1299_v29  ;;  %v1367_v49 = vld [vmem:[#allocation5 + $0x700] sm:$0xff]  ;;  %v1364_v58 = vld [vmem:[#allocation5 + $0x6e8] sm:$0xff] }
 0x124   :  { %1439 = vmatprep.subr.mxu0 %v1168_v44  ;;  %1552 = vmatprep.subr.mxu1 %v1296_v19  ;;  %v1235_v21 = vld [vmem:[#allocation5 + $0x2e0] sm:$0xff]  ;;  %v1232_v44 = vld [vmem:[#allocation5 + $0x2c8] sm:$0xff] }
 0x125   :  { %1440 = vmatpush1.msra.mxu0 %v1167_v20  ;;  %1553 = vmatpush1.msra.mxu1 %v1295_v43  ;;  %v1363_v29 = vld [vmem:[#allocation5 + $0x6e0] sm:$0xff]  ;;  %v1360_v19 = vld [vmem:[#allocation5 + $0x6c8] sm:$0xff] }
 0x126   :  { %1441 = vmatprep.subr.mxu0 %v1164_v37  ;;  %1554 = vmatprep.subr.mxu1 %v1292_v52  ;;  %v1231_v20 = vld [vmem:[#allocation5 + $0x2c0] sm:$0xff]  ;;  %v1228_v37 = vld [vmem:[#allocation5 + $0x2a8] sm:$0xff] }
 0x127   :  { %1442 = vmatpush1.msra.mxu0 %v1163_v32  ;;  %1555 = vmatpush1.msra.mxu1 %v1291_v28  ;;  %v1359_v43 = vld [vmem:[#allocation5 + $0x6c0] sm:$0xff]  ;;  %v1356_v52 = vld [vmem:[#allocation5 + $0x6a8] sm:$0xff] }
 0x128   :  { %1443 = vmatprep.subr.mxu0 %v1160_v15  ;;  %1556 = vmatprep.subr.mxu1 %v1288_v27  ;;  %v1227_v32 = vld [vmem:[#allocation5 + $0x2a0] sm:$0xff]  ;;  %v1224_v15 = vld [vmem:[#allocation5 + $0x288] sm:$0xff] }
 0x129   :  { %1444 = vmatpush1.msra.mxu0 %v1159_v39  ;;  %1557 = vmatpush1.msra.mxu1 %v1287_v36  ;;  %v1355_v28 = vld [vmem:[#allocation5 + $0x6a0] sm:$0xff]  ;;  %v1352_v27 = vld [vmem:[#allocation5 + $0x688] sm:$0xff] }
 0x12a   :  { %1445 = vmatprep.subr.mxu0 %v1156_v35  ;;  %1558 = vmatprep.subr.mxu1 %v1284_v18  ;;  %v1223_v39 = vld [vmem:[#allocation5 + $0x280] sm:$0xff]  ;;  %v1220_v35 = vld [vmem:[#allocation5 + $0x268] sm:$0xff] }
 0x12b   :  { %1446 = vmatpush1.msra.mxu0 %v1155_v38  ;;  %1559 = vmatpush1.msra.mxu1 %v1283_v62  ;;  %v1351_v36 = vld [vmem:[#allocation5 + $0x680] sm:$0xff]  ;;  %v1348_v18 = vld [vmem:[#allocation5 + $0x668] sm:$0xff] }
 0x12c   :  { %1447 = vmatprep.subr.mxu0 %v1152_v10  ;;  %1560 = vmatprep.subr.mxu1 %v1280_v6  ;;  %v1219_v38 = vld [vmem:[#allocation5 + $0x260] sm:$0xff]  ;;  %v1216_v10 = vld [vmem:[#allocation5 + $0x248] sm:$0xff] }
 0x12d   :  { %1448 = vmatpush1.msra.mxu0 %v1151_v17  ;;  %1561 = vmatpush1.msra.mxu1 %v1279_v63  ;;  %v1347_v62 = vld [vmem:[#allocation5 + $0x660] sm:$0xff]  ;;  %v1344_v6 = vld [vmem:[#allocation5 + $0x648] sm:$0xff] }
 0x12e   :  { %1449 = vmatprep.subr.mxu0 %v1148_v50  ;;  %1562 = vmatprep.subr.mxu1 %v1276_v0  ;;  %v1215_v17 = vld [vmem:[#allocation5 + $0x240] sm:$0xff]  ;;  %v1212_v50 = vld [vmem:[#allocation5 + $0x228] sm:$0xff] }
 0x12f   :  { %1450 = vmatpush1.msra.mxu0 %v1147_v56  ;;  %1563 = vmatpush1.msra.mxu1 %v1275_v25  ;;  %v1343_v63 = vld [vmem:[#allocation5 + $0x640] sm:$0xff]  ;;  %v1340_v0 = vld [vmem:[#allocation5 + $0x628] sm:$0xff] }
 0x130   :  { %1451 = vmatprep.subr.mxu0 %v1144_v1  ;;  %1564 = vmatprep.subr.mxu1 %v1272_v13  ;;  %v1211_v56 = vld [vmem:[#allocation5 + $0x220] sm:$0xff]  ;;  %v1208_v1 = vld [vmem:[#allocation5 + $0x208] sm:$0xff] }
 0x131   :  { %1452 = vmatpush1.msra.mxu0 %v1143_v12  ;;  %1565 = vmatpush1.msra.mxu1 %v1271_v31  ;;  %v1339_v25 = vld [vmem:[#allocation5 + $0x620] sm:$0xff]  ;;  %v1336_v13 = vld [vmem:[#allocation5 + $0x608] sm:$0xff] }
 0x132   :  { %1453 = vmatprep.subr.mxu0 %v1268_v40  ;;  %1566 = vmatprep.subr.mxu1 %v1396_v41  ;;  %v1207_v12 = vld [vmem:[#allocation5 + $0x200] sm:$0xff]  ;;  %v1206_v40 = vld [vmem:[#allocation5 + $0x1f8] sm:$0xff] }
 0x133   :  { %1454 = vmatpush2.msra.mxu0 %v1267_v16  ;;  %1567 = vmatpush2.msra.mxu1 %v1395_v30  ;;  %v1335_v31 = vld [vmem:[#allocation5 + $0x600] sm:$0xff]  ;;  %v1334_v16 = vld [vmem:[#allocation5 + $0x5f8] sm:$0xff] }
 0x134   :  { %1455 = vmatprep.subr.mxu0 %v1264_v22  ;;  %1568 = vmatprep.subr.mxu1 %v1392_v7  ;;  %v3066_v41 = vld [vmem:[%s3416_s4] sm:$0xf] }
 0x135   :  { %1456 = vmatpush2.msra.mxu0 %v1263_v3  ;;  %1569 = vmatpush2.msra.mxu1 %v1391_v2  ;;  %v3470_v22 = vld [vmem:[#allocation12_spill] sm:$0xff]  ;;  %v3471_v3 = vld [vmem:[#allocation13_spill] sm:$0xff] }
 0x136   :  { %1457 = vmatprep.subr.mxu0 %v1260_v5  ;;  %1570 = vmatprep.subr.mxu1 %v1388_v47  ;;  %v3070_v30 = vrot.slane %v3066_v41, %v3470_v22  ;;  %v3074_v7 = vrot.slane %v3066_v41, %v3471_v3 }
 0x137   :  { %1458 = vmatpush2.msra.mxu0 %v1259_v61  ;;  %1571 = vmatpush2.msra.mxu1 %v1387_v45 }
 0x138   :  { %1459 = vmatprep.subr.mxu0 %v1256_v4  ;;  %1572 = vmatprep.subr.mxu1 %v1384_v54 }
 0x139   :  { %1460 = vmatpush2.msra.mxu0 %v1255_v48  ;;  %1573 = vmatpush2.msra.mxu1 %v1383_v55 }
 0x13a   :  { %1461 = vmatprep.subr.mxu0 %v1252_v53  ;;  %1574 = vmatprep.subr.mxu1 %v1380_v23 }
 0x13b   :  { %1462 = vmatpush2.msra.mxu0 %v1251_v51  ;;  %1575 = vmatpush2.msra.mxu1 %v1379_v11 }
 0x13c   :  { %1463 = vmatprep.subr.mxu0 %v1248_v9  ;;  %1576 = vmatprep.subr.mxu1 %v1376_v42  ;;  %v1205_v42 = vld [vmem:[#allocation5 + $0x1f0] sm:$0xff] }
 0x13d   :  { %1464 = vmatpush2.msra.mxu0 %v1247_v33  ;;  %1577 = vmatpush2.msra.mxu1 %v1375_v14 }
 0x13e   :  { %1465 = vmatprep.subr.mxu0 %v1244_v26  ;;  %1578 = vmatprep.subr.mxu1 %v1372_v46  ;;  %v1201_v46 = vld [vmem:[#allocation5 + $0x1d0] sm:$0xff] }
 0x13f   :  { %1466 = vmatpush2.msra.mxu0 %v1243_v60  ;;  %1579 = vmatpush2.msra.mxu1 %v1371_v24  ;;  %v1202_v60 = vld [vmem:[#allocation5 + $0x1d8] sm:$0xff] }
 0x140   :  { %1467 = vmatprep.subr.mxu0 %v1240_v57  ;;  %1580 = vmatprep.subr.mxu1 %v1368_v34  ;;  %v1198_v24 = vld [vmem:[#allocation5 + $0x1b8] sm:$0xff] }
 0x141   :  { %1468 = vmatpush2.msra.mxu0 %v1239_v59  ;;  %1581 = vmatpush2.msra.mxu1 %v1367_v49  ;;  %v1197_v49 = vld [vmem:[#allocation5 + $0x1b0] sm:$0xff] }
 0x142   :  { %1469 = vmatprep.subr.mxu0 %v1236_v8  ;;  %1582 = vmatprep.subr.mxu1 %v1364_v58 }
 0x143   :  { %1470 = vmatpush2.msra.mxu0 %v1235_v21  ;;  %1583 = vmatpush2.msra.mxu1 %v1363_v29 }
 0x144   :  { %1471 = vmatprep.subr.mxu0 %v1232_v44  ;;  %1584 = vmatprep.subr.mxu1 %v1360_v19  ;;  %v1194_v44 = vld [vmem:[#allocation5 + $0x198] sm:$0xff]  ;;  %v1193_v19 = vld [vmem:[#allocation5 + $0x190] sm:$0xff] }
 0x145   :  { %1472 = vmatpush2.msra.mxu0 %v1231_v20  ;;  %1585 = vmatpush2.msra.mxu1 %v1359_v43  ;;  %v1190_v43 = vld [vmem:[#allocation5 + $0x178] sm:$0xff] }
 0x146   :  { %1473 = vmatprep.subr.mxu0 %v1228_v37  ;;  %1586 = vmatprep.subr.mxu1 %v1356_v52  ;;  %v1189_v52 = vld [vmem:[#allocation5 + $0x170] sm:$0xff] }
 0x147   :  { %1474 = vmatpush2.msra.mxu0 %v1227_v32  ;;  %1587 = vmatpush2.msra.mxu1 %v1355_v28  ;;  %v1186_v28 = vld [vmem:[#allocation5 + $0x158] sm:$0xff] }
 0x148   :  { %1475 = vmatprep.subr.mxu0 %v1224_v15  ;;  %1588 = vmatprep.subr.mxu1 %v1352_v27 }
 0x149   :  { %1476 = vmatpush2.msra.mxu0 %v1223_v39  ;;  %1589 = vmatpush2.msra.mxu1 %v1351_v36 }
 0x14a   :  { %1477 = vmatprep.subr.mxu0 %v1220_v35  ;;  %1590 = vmatprep.subr.mxu1 %v1348_v18  ;;  %v1185_v35 = vld [vmem:[#allocation5 + $0x150] sm:$0xff]  ;;  %v1182_v18 = vld [vmem:[#allocation5 + $0x138] sm:$0xff] }
 0x14b   :  { %1478 = vmatpush2.msra.mxu0 %v1219_v38  ;;  %1591 = vmatpush2.msra.mxu1 %v1347_v62 }
 0x14c   :  { %1479 = vmatprep.subr.mxu0 %v1216_v10  ;;  %1592 = vmatprep.subr.mxu1 %v1344_v6  ;;  %v1181_v6 = vld [vmem:[#allocation5 + $0x130] sm:$0xff] }
 0x14d   :  { %1480 = vmatpush2.msra.mxu0 %v1215_v17  ;;  %1593 = vmatpush2.msra.mxu1 %v1343_v63  ;;  %v1178_v63 = vld [vmem:[#allocation5 + $0x118] sm:$0xff] }
 0x14e   :  { %1481 = vmatprep.subr.mxu0 %v1212_v50  ;;  %1594 = vmatprep.subr.mxu1 %v1340_v0  ;;  %v1177_v0 = vld [vmem:[#allocation5 + $0x110] sm:$0xff] }
 0x14f   :  { %1482 = vmatpush2.msra.mxu0 %v1211_v56  ;;  %1595 = vmatpush2.msra.mxu1 %v1339_v25  ;;  %v1174_v25 = vld [vmem:[#allocation5 + $0xf8] sm:$0xff] }
 0x150   :  { %1483 = vmatprep.subr.mxu0 %v1208_v1  ;;  %1596 = vmatprep.subr.mxu1 %v1336_v13 }
 0x151   :  { %1484 = vmatpush2.msra.mxu0 %v1207_v12  ;;  %1597 = vmatpush2.msra.mxu1 %v1335_v31 }
 0x152   :  { %1647 = vmatprep.subr.mxu0 %v1206_v40  ;;  %1760 = vmatprep.subr.mxu1 %v1334_v16  ;;  %v1173_v40 = vld [vmem:[#allocation5 + $0xf0] sm:$0xff] }
 0x173   :  { %v725_v5 = vpop.f32.mrf.mxu0 }
 0x174   :  { %v838_v2 = vpop.f32.mrf.mxu1  ;;  %v726_v61 = vadd.f32 %v725_v5, %v3070_v30  ;;  %v1170_v5 = vld [vmem:[#allocation5 + $0xd8] sm:$0xff] }
 0x175   :  { %v727_v47 = vpop.f32.mrf.mxu0 }
 0x176   :  { %v840_v4 = vpop.f32.mrf.mxu1  ;;  %v728_v45 = vadd.f32 %v727_v47, %v3074_v7  ;;  %v3078_v48 = vadd.f32 %v838_v2, %v726_v61 }
 0x178   :  { %v3080_v54 = vadd.f32 %v840_v4, %v728_v45  ;;  %v1111_v9 = vmax.f32 %v3078_v48, 0.0  ;;  %v1169_v4 = vld [vmem:[#allocation5 + $0xd0] sm:$0xff] }
 0x17a   :  { %v731_v53 = vpop.f32.mrf.mxu0  ;;  %v844_v55 = vpop.f32.mrf.mxu1  ;;  %v1112_v51 = vmax.f32 %v3080_v54, 0.0  ;;  %v1225_v54 = vld [vmem:[#allocation5 + $0x290] sm:$0xff] }
 0x17b   :  { %v732_v23 = vadd.f32 %v731_v53, %v3070_v30  ;;  %v1166_v53 = vld [vmem:[#allocation5 + $0xb8] sm:$0xff] }
 0x17c   :  { %v733_v11 = vpop.f32.mrf.mxu0  ;;  %v846_v33 = vpop.f32.mrf.mxu1  ;;  %1485 = vmatprep.mubr.f32.mxu0 %v1112_v51 }
 0x17d   :  { %v3085_v26 = vadd.f32 %v844_v55, %v732_v23  ;;  %v734_v14 = vadd.f32 %v733_v11, %v3074_v7  ;;  %1486 = vmatmul.mubr.f32.vlgmr.msra.gmra.mxu0 %v1111_v9  ;;  %v1165_v23 = vld [vmem:[#allocation5 + $0xb0] sm:$0xff] }
 0x17e   :  { %1648 = vmatpush1.msra.mxu0 %v1205_v42 }
 0x17f   :  { %v3092_v57 = vadd.f32 %v846_v33, %v734_v14  ;;  %v1115_v59 = vmax.f32 %v3085_v26, 0.0  ;;  %1649 = vmatprep.subr.mxu0 %v1202_v60  ;;  %v1162_v33 = vld [vmem:[#allocation5 + $0x98] sm:$0xff]  ;;  %v1161_v60 = vld [vmem:[#allocation5 + $0x90] sm:$0xff] }
 0x180   :  { %v737_v34 = vpop.f32.mrf.mxu0  ;;  %v850_v8 = vpop.f32.mrf.mxu1  ;;  %1650 = vmatpush1.msra.mxu0 %v1201_v46 }
 0x181   :  { %v1116_v21 = vmax.f32 %v3092_v57, 0.0  ;;  %v738_v58 = vadd.f32 %v737_v34, %v3070_v30  ;;  %1651 = vmatprep.subr.mxu0 %v1198_v24  ;;  %v1158_v34 = vld [vmem:[#allocation5 + $0x78] sm:$0xff] }
 0x182   :  { %v739_v29 = vpop.f32.mrf.mxu0  ;;  %v852_v20 = vpop.f32.mrf.mxu1  ;;  %1652 = vmatpush1.msra.mxu0 %v1197_v49 }
 0x183   :  { %v740_v37 = vadd.f32 %v739_v29, %v3074_v7  ;;  %1491 = vmatprep.mubr.f32.mxu0 %v1116_v21  ;;  %v3100_v32 = vadd.f32 %v850_v8, %v738_v58  ;;  %1653 = vmatprep.subr.mxu0 %v1194_v44  ;;  %v1157_v44 = vld [vmem:[#allocation5 + $0x70] sm:$0xff] }
 0x184   :  { %1492 = vmatmul.mubr.f32.gmra.mxu0 %v1115_v59 }
 0x185   :  { %v3104_v15 = vadd.f32 %v852_v20, %v740_v37  ;;  %1654 = vmatpush1.msra.mxu0 %v1193_v19  ;;  %v1119_v10 = vmax.f32 %v3100_v32, 0.0  ;;  %v1154_v20 = vld [vmem:[#allocation5 + $0x58] sm:$0xff]  ;;  %v1153_v37 = vld [vmem:[#allocation5 + $0x50] sm:$0xff] }
 0x186   :  { %v743_v39 = vpop.f32.mrf.mxu0  ;;  %v856_v27 = vpop.f32.mrf.mxu1  ;;  %1655 = vmatprep.subr.mxu0 %v1190_v43 }
 0x187   :  { %v1120_v36 = vmax.f32 %v3104_v15, 0.0  ;;  %v744_v38 = vadd.f32 %v743_v39, %v3070_v30  ;;  %1656 = vmatpush1.msra.mxu0 %v1189_v52  ;;  %v1150_v52 = vld [vmem:[#allocation5 + $0x38] sm:$0xff] }
 0x188   :  { %v745_v62 = vpop.f32.mrf.mxu0  ;;  %v858_v17 = vpop.f32.mrf.mxu1  ;;  %1657 = vmatprep.subr.mxu0 %v1186_v28 }
 0x189   :  { %v746_v50 = vadd.f32 %v745_v62, %v3074_v7  ;;  %1497 = vmatprep.mubr.f32.mxu0 %v1120_v36  ;;  %1658 = vmatpush1.msra.mxu0 %v1185_v35  ;;  %v3112_v56 = vadd.f32 %v856_v27, %v744_v38  ;;  %v1149_v27 = vld [vmem:[#allocation5 + $0x30] sm:$0xff] }
 0x18a   :  { %1498 = vmatmul.mubr.f32.gmra.mxu0 %v1119_v10  ;;  %1659 = vmatprep.subr.mxu0 %v1182_v18  ;;  %v1146_v18 = vld [vmem:[#allocation5 + $0x18] sm:$0xff] }
 0x18b   :  { %v3116_v1 = vadd.f32 %v858_v17, %v746_v50  ;;  %1660 = vmatpush1.msra.mxu0 %v1181_v6  ;;  %v1123_v2 = vmax.f32 %v3112_v56, 0.0  ;;  %v1145_v50 = vld [vmem:[#allocation5 + $0x10] sm:$0xff] }
 0x18c   :  { %v749_v12 = vpop.f32.mrf.mxu0  ;;  %v862_v13 = vpop.f32.mrf.mxu1  ;;  %1661 = vmatprep.subr.mxu0 %v1178_v63 }
 0x18d   :  { %v1124_v31 = vmax.f32 %v3116_v1, 0.0  ;;  %v750_v16 = vadd.f32 %v749_v12, %v3070_v30  ;;  %1662 = vmatpush1.msra.mxu0 %v1177_v0  ;;  %v1270_v0 = vld [vmem:[#allocation5 + $0x3f8] sm:$0xff]  ;;  %v1269_v12 = vld [vmem:[#allocation5 + $0x3f0] sm:$0xff] }
 0x18e   :  { %v751_v61 = vpop.f32.mrf.mxu0  ;;  %v864_v47 = vpop.f32.mrf.mxu1  ;;  %1663 = vmatprep.subr.mxu0 %v1174_v25 }
 0x18f   :  { %v752_v45 = vadd.f32 %v751_v61, %v3074_v7  ;;  %1503 = vmatprep.mubr.f32.mxu0 %v1124_v31  ;;  %1664 = vmatpush1.msra.mxu0 %v1173_v40  ;;  %v3124_v55 = vadd.f32 %v862_v13, %v750_v16  ;;  %v1266_v40 = vld [vmem:[#allocation5 + $0x3d8] sm:$0xff]  ;;  %v1265_v61 = vld [vmem:[#allocation5 + $0x3d0] sm:$0xff] }
 0x190   :  { %1504 = vmatmul.mubr.f32.gmra.mxu0 %v1123_v2  ;;  %1665 = vmatprep.subr.mxu0 %v1170_v5 }
 0x191   :  { %v3128_v11 = vadd.f32 %v864_v47, %v752_v45  ;;  %1666 = vmatpush1.msra.mxu0 %v1169_v4  ;;  %v1127_v8 = vmax.f32 %v3124_v55, 0.0  ;;  %v1262_v45 = vld [vmem:[#allocation5 + $0x3b8] sm:$0xff] }
 0x192   :  { %v755_v42 = vpop.f32.mrf.mxu0  ;;  %v868_v14 = vpop.f32.mrf.mxu1  ;;  %1667 = vmatprep.subr.mxu0 %v1166_v53  ;;  %v1322_v55 = vld [vmem:[#allocation5 + $0x598] sm:$0xff] }
 0x193   :  { %v1128_v46 = vmax.f32 %v3128_v11, 0.0  ;;  %v756_v24 = vadd.f32 %v755_v42, %v3070_v30  ;;  %1668 = vmatpush1.msra.mxu0 %v1165_v23  ;;  %v1326_v11 = vld [vmem:[#allocation5 + $0x5b8] sm:$0xff] }
 0x194   :  { %v757_v49 = vpop.f32.mrf.mxu0  ;;  %v870_v58 = vpop.f32.mrf.mxu1  ;;  %1669 = vmatprep.subr.mxu0 %v1162_v33  ;;  %v1261_v33 = vld [vmem:[#allocation5 + $0x3b0] sm:$0xff] }
 0x195   :  { %v758_v29 = vadd.f32 %v757_v49, %v3074_v7  ;;  %1509 = vmatprep.mubr.f32.mxu0 %v1128_v46  ;;  %1670 = vmatpush1.msra.mxu0 %v1161_v60  ;;  %v3136_v19 = vadd.f32 %v868_v14, %v756_v24  ;;  %v1258_v14 = vld [vmem:[#allocation5 + $0x398] sm:$0xff] }
 0x196   :  { %1510 = vmatmul.mubr.f32.gmra.mxu0 %v1127_v8  ;;  %1671 = vmatprep.subr.mxu0 %v1158_v34  ;;  %v1254_v49 = vld [vmem:[#allocation5 + $0x378] sm:$0xff] }
 0x197   :  { %v3140_v43 = vadd.f32 %v870_v58, %v758_v29  ;;  %1672 = vmatpush1.msra.mxu0 %v1157_v44  ;;  %v1131_v62 = vmax.f32 %v3136_v19, 0.0  ;;  %v1253_v58 = vld [vmem:[#allocation5 + $0x370] sm:$0xff]  ;;  %v1250_v44 = vld [vmem:[#allocation5 + $0x358] sm:$0xff] }
 0x198   :  { %v761_v28 = vpop.f32.mrf.mxu0  ;;  %v874_v39 = vpop.f32.mrf.mxu1  ;;  %1673 = vmatprep.subr.mxu0 %v1154_v20  ;;  %v1249_v20 = vld [vmem:[#allocation5 + $0x350] sm:$0xff]  ;;  %v1314_v19 = vld [vmem:[#allocation5 + $0x558] sm:$0xff] }
 0x199   :  { %v1132_v35 = vmax.f32 %v3140_v43, 0.0  ;;  %v762_v38 = vadd.f32 %v761_v28, %v3070_v30  ;;  %1674 = vmatpush1.msra.mxu0 %v1153_v37  ;;  %v1246_v37 = vld [vmem:[#allocation5 + $0x338] sm:$0xff] }
 0x19a   :  { %v763_v17 = vpop.f32.mrf.mxu0  ;;  %v876_v6 = vpop.f32.mrf.mxu1  ;;  %1675 = vmatprep.subr.mxu0 %v1150_v52  ;;  %v1245_v52 = vld [vmem:[#allocation5 + $0x330] sm:$0xff]  ;;  %v1242_v28 = vld [vmem:[#allocation5 + $0x318] sm:$0xff] }
 0x19b   :  { %v764_v63 = vadd.f32 %v763_v17, %v3074_v7  ;;  %1515 = vmatprep.mubr.f32.mxu0 %v1132_v35  ;;  %1676 = vmatpush1.msra.mxu0 %v1149_v27  ;;  %v3148_v25 = vadd.f32 %v874_v39, %v762_v38  ;;  %v1241_v39 = vld [vmem:[#allocation5 + $0x310] sm:$0xff]  ;;  %v1238_v27 = vld [vmem:[#allocation5 + $0x2f8] sm:$0xff] }
 0x19c   :  { %1516 = vmatmul.mubr.f32.gmra.mxu0 %v1131_v62  ;;  %1677 = vmatprep.subr.mxu0 %v1146_v18  ;;  %v1237_v38 = vld [vmem:[#allocation5 + $0x2f0] sm:$0xff]  ;;  %v1234_v18 = vld [vmem:[#allocation5 + $0x2d8] sm:$0xff] }
 0x19d   :  { %v3152_v13 = vadd.f32 %v876_v6, %v764_v63  ;;  %1678 = vmatpush1.msra.mxu0 %v1145_v50  ;;  %v1135_v53 = vmax.f32 %v3148_v25, 0.0  ;;  %v1233_v17 = vld [vmem:[#allocation5 + $0x2d0] sm:$0xff]  ;;  %v1230_v6 = vld [vmem:[#allocation5 + $0x2b8] sm:$0xff] }
 0x19e   :  { %v767_v16 = vpop.f32.mrf.mxu0  ;;  %v880_v5 = vpop.f32.mrf.mxu1  ;;  %1679 = vmatprep.subr.mxu0 %v1270_v0  ;;  %v1229_v50 = vld [vmem:[#allocation5 + $0x2b0] sm:$0xff]  ;;  %v1226_v63 = vld [vmem:[#allocation5 + $0x298] sm:$0xff] }
 0x19f   :  { %v1136_v47 = vmax.f32 %v3152_v13, 0.0  ;;  %v768_v4 = vadd.f32 %v767_v16, %v3070_v30  ;;  %1680 = vmatpush2.msra.mxu0 %v1269_v12  ;;  %v1257_v30 = vld [vmem:[#allocation5 + $0x390] sm:$0xff]  ;;  %v1218_v12 = vld [vmem:[#allocation5 + $0x258] sm:$0xff] }
 0x1a0   :  { %v769_v23 = vpop.f32.mrf.mxu0  ;;  %1681 = vmatprep.subr.mxu0 %v1266_v40  ;;  %v882_v24 = vpop.f32.mrf.mxu1  ;;  %v1221_v0 = vld [vmem:[#allocation5 + $0x270] sm:$0xff]  ;;  %v1214_v16 = vld [vmem:[#allocation5 + $0x238] sm:$0xff] }
 0x1a1   :  { %v770_v42 = vadd.f32 %v769_v23, %v3074_v7  ;;  %1521 = vmatprep.mubr.f32.mxu0 %v1136_v47  ;;  %1682 = vmatpush2.msra.mxu0 %v1265_v61  ;;  %v3160_v60 = vadd.f32 %v880_v5, %v768_v4  ;;  %v1217_v40 = vld [vmem:[#allocation5 + $0x250] sm:$0xff]  ;;  %v1210_v61 = vld [vmem:[#allocation5 + $0x218] sm:$0xff] }
 0x1a2   :  { %1522 = vmatmul.mubr.f32.gmra.mxu0 %v1135_v53  ;;  %1683 = vmatprep.subr.mxu0 %v1262_v45  ;;  %v1213_v5 = vld [vmem:[#allocation5 + $0x230] sm:$0xff]  ;;  %v1306_v25 = vld [vmem:[#allocation5 + $0x518] sm:$0xff] }
 0x1a3   :  { %v3164_v34 = vadd.f32 %v882_v24, %v770_v42  ;;  %1684 = vmatpush2.msra.mxu0 %v1261_v33  ;;  %v1139_v29 = vmax.f32 %v3160_v60, 0.0  ;;  %v1209_v4 = vld [vmem:[#allocation5 + $0x210] sm:$0xff]  ;;  %v3473_v33 = vld [vmem:[#allocation15_spill] sm:$0xff] }
 0x1a4   :  { %1685 = vmatprep.subr.mxu0 %v1258_v14  ;;  %v3472_v45 = vld [vmem:[#allocation14_spill] sm:$0xff]  ;;  %v3184_v42 = vrot.slane %v3066_v41, %v3473_v33 }
 0x1a5   :  { %v1140_v7 = vmax.f32 %v3164_v34, 0.0  ;;  %1686 = vmatpush2.msra.mxu0 %v1257_v30  ;;  %v3180_v23 = vrot.slane %v3066_v41, %v3472_v45 }
 0x1a6   :  { %1687 = vmatprep.subr.mxu0 %v1254_v49 }
 0x1a7   :  { %1527 = vmatprep.mubr.f32.mxu0 %v1140_v7  ;;  %1688 = vmatpush2.msra.mxu0 %v1253_v58 }
 0x1a8   :  { %1528 = vmatmul.mubr.f32.gmra.mxu0 %v1139_v29  ;;  %1689 = vmatprep.subr.mxu0 %v1250_v44 }
 0x1a9   :  { %1711 = vmatprep.mubr.f32.mxu0 %v1112_v51  ;;  %1690 = vmatpush2.msra.mxu0 %v1249_v20  ;;  %v1222_v51 = vld [vmem:[#allocation5 + $0x278] sm:$0xff] }
 0x1aa   :  { %1691 = vmatprep.subr.mxu0 %v1246_v37 }
 0x1ab   :  { %1692 = vmatpush2.msra.mxu0 %v1245_v52 }
 0x1ac   :  { %1693 = vmatprep.subr.mxu0 %v1242_v28  ;;  %v1330_v28 = vld [vmem:[#allocation5 + $0x5d8] sm:$0xff] }
 0x1ad   :  { %1694 = vmatpush2.msra.mxu0 %v1241_v39  ;;  %v1329_v39 = vld [vmem:[#allocation5 + $0x5d0] sm:$0xff] }
 0x1ae   :  { %1695 = vmatprep.subr.mxu0 %v1238_v27 }
 0x1af   :  { %1696 = vmatpush2.msra.mxu0 %v1237_v38 }
 0x1b0   :  { %1697 = vmatprep.subr.mxu0 %v1234_v18 }
 0x1b1   :  { %1698 = vmatpush2.msra.mxu0 %v1233_v17 }
 0x1b2   :  { %1699 = vmatprep.subr.mxu0 %v1230_v6 }
 0x1b3   :  { %1700 = vmatpush2.msra.mxu0 %v1229_v50  ;;  %v1325_v50 = vld [vmem:[#allocation5 + $0x5b0] sm:$0xff] }
 0x1b4   :  { %1701 = vmatprep.subr.mxu0 %v1226_v63 }
 0x1b5   :  { %1702 = vmatpush2.msra.mxu0 %v1225_v54 }
 0x1b6   :  { %1703 = vmatprep.subr.mxu0 %v1222_v51 }
 0x1b7   :  { %1704 = vmatpush2.msra.mxu0 %v1221_v0  ;;  %v1321_v0 = vld [vmem:[#allocation5 + $0x590] sm:$0xff] }
 0x1b8   :  { %1705 = vmatprep.subr.mxu0 %v1218_v12 }
 0x1b9   :  { %1706 = vmatpush2.msra.mxu0 %v1217_v40 }
 0x1ba   :  { %1707 = vmatprep.subr.mxu0 %v1214_v16 }
 0x1bb   :  { %1708 = vmatpush2.msra.mxu0 %v1213_v5 }
 0x1bc   :  { %1709 = vmatprep.subr.mxu0 %v1210_v61 }
 0x1bd   :  { %1710 = vmatpush2.msra.mxu0 %v1209_v4  ;;  %v1317_v4 = vld [vmem:[#allocation5 + $0x570] sm:$0xff] }
 0x1be   :  { %1712 = vmatmul.mubr.f32.vlgmr.msra.gmra.mxu0 %v1111_v9 }
 0x1bf   :  { %1717 = vmatprep.mubr.f32.mxu0 %v1116_v21 }
 0x1c2   :  { %1718 = vmatmul.mubr.f32.gmra.mxu0 %v1115_v59 }
 0x1c3   :  { %v951_v14 = vpop.f32.mrf.mxu0  ;;  %v1064_v24 = vpop.f32.mrf.mxu1  ;;  %1723 = vmatprep.mubr.f32.mxu0 %v1120_v36 }
 0x1c4   :  { %v952_v48 = vadd.f32 %v951_v14, %v3180_v23 }
 0x1c5   :  { %v953_v9 = vpop.f32.mrf.mxu0  ;;  %v1066_v57 = vpop.f32.mrf.mxu1 }
 0x1c6   :  { %v954_v21 = vadd.f32 %v953_v9, %v3184_v42  ;;  %1724 = vmatmul.mubr.f32.gmra.mxu0 %v1119_v10  ;;  %v3194_v30 = vadd.f32 %v1064_v24, %v952_v48  ;;  %v1313_v9 = vld [vmem:[#allocation5 + $0x550] sm:$0xff] }
 0x1c7   :  { %v957_v41 = vpop.f32.mrf.mxu0  ;;  %v1070_v49 = vpop.f32.mrf.mxu1  ;;  %1729 = vmatprep.mubr.f32.mxu0 %v1124_v31  ;;  %v1333_v31 = vld [vmem:[#allocation5 + $0x5f0] sm:$0xff] }
 0x1c8   :  { %v3198_v26 = vadd.f32 %v1066_v57, %v954_v21  ;;  %v958_v59 = vadd.f32 %v957_v41, %v3180_v23  ;;  %v1113_v32 = vmax.f32 %v3194_v30, 0.0  ;;  %v1906_v30 = vld [vmem:[#allocation7 + $0x8] sm:$0xff] }
 0x1c9   :  { %v959_v15 = vpop.f32.mrf.mxu0  ;;  %v1072_v36 = vpop.f32.mrf.mxu1 }
 0x1ca   :  { %v1114_v58 = vmax.f32 %v3198_v26, 0.0  ;;  %v960_v44 = vadd.f32 %v959_v15, %v3184_v42  ;;  %1730 = vmatmul.mubr.f32.gmra.mxu0 %v1123_v2  ;;  %v3206_v10 = vadd.f32 %v1070_v49, %v958_v59  ;;  %v1309_v15 = vld [vmem:[#allocation5 + $0x530] sm:$0xff] }
 0x1cb   :  { %v963_v20 = vpop.f32.mrf.mxu0  ;;  %v1076_v1 = vpop.f32.mrf.mxu1  ;;  %1735 = vmatprep.mubr.f32.mxu0 %v1128_v46  ;;  %v1389_v26 = vld [vmem:[#allocation5 + $0x7b0] sm:$0xff] }
 0x1cc   :  { %v3210_v37 = vadd.f32 %v1072_v36, %v960_v44  ;;  %v964_v52 = vadd.f32 %v963_v20, %v3180_v23  ;;  %1598 = vmatprep.mubr.f32.mxu1 %v1114_v58  ;;  %v1117_v46 = vmax.f32 %v3206_v10, 0.0  ;;  %v1968_v10 = vld [vmem:[#allocation7 + $0x1f8] sm:$0xff] }
 0x1cd   :  { %v965_v56 = vpop.f32.mrf.mxu0  ;;  %v1078_v2 = vpop.f32.mrf.mxu1  ;;  %1599 = vmatmul.mubr.f32.vlgmr.msra.gmra.mxu1 %v1113_v32 }
 0x1ce   :  { %v1118_v27 = vmax.f32 %v3210_v37, 0.0  ;;  %v966_v38 = vadd.f32 %v965_v56, %v3184_v42  ;;  %1761 = vmatpush1.msra.mxu1 %v1333_v31  ;;  %1736 = vmatmul.mubr.f32.gmra.mxu0 %v1127_v8  ;;  %v3222_v18 = vadd.f32 %v1076_v1, %v964_v52  ;;  %v1305_v1 = vld [vmem:[#allocation5 + $0x510] sm:$0xff]  ;;  %v1905_v37 = vld [vmem:[#allocation7] sm:$0xff] }
 0x1cf   :  { %1762 = vmatprep.subr.mxu1 %v1330_v28  ;;  %v969_v17 = vpop.f32.mrf.mxu0  ;;  %v1082_v6 = vpop.f32.mrf.mxu1  ;;  %1741 = vmatprep.mubr.f32.mxu0 %v1132_v35  ;;  %v1318_v35 = vld [vmem:[#allocation5 + $0x578] sm:$0xff] }
 0x1d0   :  { %v3226_v63 = vadd.f32 %v1078_v2, %v966_v38  ;;  %v970_v54 = vadd.f32 %v969_v17, %v3180_v23  ;;  %1763 = vmatpush1.msra.mxu1 %v1329_v39  ;;  %1604 = vmatprep.mubr.f32.mxu1 %v1118_v27  ;;  %v1121_v40 = vmax.f32 %v3222_v18, 0.0  ;;  %v1301_v39 = vld [vmem:[#allocation5 + $0x4f0] sm:$0xff]  ;;  %v1298_v17 = vld [vmem:[#allocation5 + $0x4d8] sm:$0xff] }
 0x1d1   :  { %1764 = vmatprep.subr.mxu1 %v1326_v11  ;;  %v971_v8 = vpop.f32.mrf.mxu0  ;;  %v1084_v51 = vpop.f32.mrf.mxu1  ;;  %1605 = vmatmul.mubr.f32.gmra.mxu1 %v1117_v46  ;;  %v1951_v18 = vld [vmem:[#allocation7 + $0x170] sm:$0xff] }
 0x1d2   :  { %v1122_v12 = vmax.f32 %v3226_v63, 0.0  ;;  %v972_v43 = vadd.f32 %v971_v8, %v3184_v42  ;;  %1765 = vmatpush1.msra.mxu1 %v1325_v50  ;;  %1742 = vmatmul.mubr.f32.gmra.mxu0 %v1131_v62  ;;  %v3238_v16 = vadd.f32 %v1082_v6, %v970_v54  ;;  %v1297_v6 = vld [vmem:[#allocation5 + $0x4d0] sm:$0xff]  ;;  %v1966_v63 = vld [vmem:[#allocation7 + $0x1e8] sm:$0xff] }
 0x1d3   :  { %1766 = vmatprep.subr.mxu1 %v1322_v55  ;;  %v975_v5 = vpop.f32.mrf.mxu0  ;;  %v1088_v61 = vpop.f32.mrf.mxu1  ;;  %1747 = vmatprep.mubr.f32.mxu0 %v1136_v47  ;;  %v1310_v47 = vld [vmem:[#allocation5 + $0x538] sm:$0xff] }
 0x1d4   :  { %v3242_v14 = vadd.f32 %v1084_v51, %v972_v43  ;;  %v976_v24 = vadd.f32 %v975_v5, %v3180_v23  ;;  %1767 = vmatpush1.msra.mxu1 %v1321_v0  ;;  %1610 = vmatprep.mubr.f32.mxu1 %v1122_v12  ;;  %v1125_v21 = vmax.f32 %v3238_v16, 0.0  ;;  %v1294_v55 = vld [vmem:[#allocation5 + $0x4b8] sm:$0xff]  ;;  %v1949_v16 = vld [vmem:[#allocation7 + $0x160] sm:$0xff] }
 0x1d5   :  { %1768 = vmatprep.subr.mxu1 %v1318_v35  ;;  %v977_v62 = vpop.f32.mrf.mxu0  ;;  %v1090_v48 = vpop.f32.mrf.mxu1  ;;  %1611 = vmatmul.mubr.f32.gmra.mxu1 %v1121_v40  ;;  %v1293_v35 = vld [vmem:[#allocation5 + $0x4b0] sm:$0xff] }
 0x1d6   :  { %v1126_v57 = vmax.f32 %v3242_v14, 0.0  ;;  %v978_v13 = vadd.f32 %v977_v62, %v3184_v42  ;;  %1769 = vmatpush1.msra.mxu1 %v1317_v4  ;;  %1748 = vmatmul.mubr.f32.gmra.mxu0 %v1135_v53  ;;  %v3254_v41 = vadd.f32 %v1088_v61, %v976_v24  ;;  %v1290_v4 = vld [vmem:[#allocation5 + $0x498] sm:$0xff] }
 0x1d7   :  { %1770 = vmatprep.subr.mxu1 %v1314_v19  ;;  %v981_v49 = vpop.f32.mrf.mxu0  ;;  %v1094_v59 = vpop.f32.mrf.mxu1  ;;  %1753 = vmatprep.mubr.f32.mxu0 %v1140_v7  ;;  %v1302_v7 = vld [vmem:[#allocation5 + $0x4f8] sm:$0xff]  ;;  %v1289_v19 = vld [vmem:[#allocation5 + $0x490] sm:$0xff] }
 0x1d8   :  { %v3258_v36 = vadd.f32 %v1090_v48, %v978_v13  ;;  %v982_v44 = vadd.f32 %v981_v49, %v3180_v23  ;;  %1771 = vmatpush1.msra.mxu1 %v1313_v9  ;;  %1616 = vmatprep.mubr.f32.mxu1 %v1126_v57  ;;  %v1129_v52 = vmax.f32 %v3254_v41, 0.0  ;;  %v1286_v9 = vld [vmem:[#allocation5 + $0x478] sm:$0xff]  ;;  %v1285_v49 = vld [vmem:[#allocation5 + $0x470] sm:$0xff] }
 0x1d9   :  { %1772 = vmatprep.subr.mxu1 %v1310_v47  ;;  %v983_v53 = vpop.f32.mrf.mxu0  ;;  %v1096_v20 = vpop.f32.mrf.mxu1  ;;  %1617 = vmatmul.mubr.f32.gmra.mxu1 %v1125_v21  ;;  %v1964_v14 = vld [vmem:[#allocation7 + $0x1d8] sm:$0xff]  ;;  %v1947_v41 = vld [vmem:[#allocation7 + $0x150] sm:$0xff] }
 0x1da   :  { %v1130_v31 = vmax.f32 %v3258_v36, 0.0  ;;  %v984_v34 = vadd.f32 %v983_v53, %v3184_v42  ;;  %1773 = vmatpush1.msra.mxu1 %v1309_v15  ;;  %1754 = vmatmul.mubr.f32.gmra.mxu0 %v1139_v29  ;;  %v3270_v28 = vadd.f32 %v1094_v59, %v982_v44  ;;  %v1282_v15 = vld [vmem:[#allocation5 + $0x458] sm:$0xff]  ;;  %v1962_v36 = vld [vmem:[#allocation7 + $0x1c8] sm:$0xff] }
 0x1db   :  { %1774 = vmatprep.subr.mxu1 %v1306_v25  ;;  %v987_v56 = vpop.f32.mrf.mxu0  ;;  %v1100_v2 = vpop.f32.mrf.mxu1  ;;  %v1278_v25 = vld [vmem:[#allocation5 + $0x438] sm:$0xff] }
 0x1dc   :  { %v3272_v38 = vadd.f32 %v1096_v20, %v984_v34  ;;  %v988_v11 = vadd.f32 %v987_v56, %v3180_v23  ;;  %1775 = vmatpush1.msra.mxu1 %v1305_v1  ;;  %1622 = vmatprep.mubr.f32.mxu1 %v1130_v31  ;;  %v1133_v8 = vmax.f32 %v3270_v28, 0.0  ;;  %v1277_v20 = vld [vmem:[#allocation5 + $0x430] sm:$0xff]  ;;  %v1274_v1 = vld [vmem:[#allocation5 + $0x418] sm:$0xff]  ;;  %v1945_v28 = vld [vmem:[#allocation7 + $0x140] sm:$0xff] }
 0x1dd   :  { %1776 = vmatprep.subr.mxu1 %v1302_v7  ;;  %v989_v60 = vpop.f32.mrf.mxu0  ;;  %v1102_v29 = vpop.f32.mrf.mxu1  ;;  %1623 = vmatmul.mubr.f32.gmra.mxu1 %v1129_v52  ;;  %v1273_v34 = vld [vmem:[#allocation5 + $0x410] sm:$0xff]  ;;  %v1398_v7 = vld [vmem:[#allocation5 + $0x7f8] sm:$0xff] }
 0x1de   :  { %v1134_v50 = vmax.f32 %v3272_v38, 0.0  ;;  %v990_v54 = vadd.f32 %v989_v60, %v3184_v42  ;;  %1777 = vmatpush1.msra.mxu1 %v1301_v39  ;;  %v3282_v51 = vadd.f32 %v1100_v2, %v988_v11  ;;  %v1397_v56 = vld [vmem:[#allocation5 + $0x7f0] sm:$0xff]  ;;  %v1936_v2 = vld [vmem:[#allocation7 + $0xf8] sm:$0xff] }
 0x1df   :  { %1778 = vmatprep.subr.mxu1 %v1298_v17  ;;  %v993_v0 = vpop.f32.mrf.mxu0  ;;  %v1106_v43 = vpop.f32.mrf.mxu1  ;;  %v1920_v39 = vld [vmem:[#allocation7 + $0x78] sm:$0xff]  ;;  %v1935_v11 = vld [vmem:[#allocation7 + $0xf0] sm:$0xff]  ;;  %2262 = vmatprep.subr.mxu0 %v1936_v2 }
 0x1e0   :  { %v3284_v5 = vadd.f32 %v1102_v29, %v990_v54  ;;  %v994_v61 = vadd.f32 %v993_v0, %v3180_v23  ;;  %1779 = vmatpush1.msra.mxu1 %v1297_v6  ;;  %1628 = vmatprep.mubr.f32.mxu1 %v1134_v50  ;;  %v1137_v13 = vmax.f32 %v3282_v51, 0.0  ;;  %v1394_v17 = vld [vmem:[#allocation5 + $0x7d8] sm:$0xff]  ;;  %v1919_v60 = vld [vmem:[#allocation7 + $0x70] sm:$0xff]  ;;  %v1934_v6 = vld [vmem:[#allocation7 + $0xe8] sm:$0xff] }
 0x1e1   :  { %1780 = vmatprep.subr.mxu1 %v1294_v55  ;;  %v995_v24 = vpop.f32.mrf.mxu0  ;;  %1629 = vmatmul.mubr.f32.gmra.mxu1 %v1133_v8  ;;  %v1108_v47 = vpop.f32.mrf.mxu1  ;;  %v1393_v29 = vld [vmem:[#allocation5 + $0x7d0] sm:$0xff]  ;;  %v1390_v54 = vld [vmem:[#allocation5 + $0x7b8] sm:$0xff]  ;;  %v1918_v55 = vld [vmem:[#allocation7 + $0x68] sm:$0xff] }
 0x1e2   :  { %v1138_v62 = vmax.f32 %v3284_v5, 0.0  ;;  %v996_v48 = vadd.f32 %v995_v24, %v3184_v42  ;;  %1781 = vmatpush1.msra.mxu1 %v1293_v35  ;;  %v3294_v23 = vadd.f32 %v1106_v43, %v994_v61  ;;  %v1281_v42 = vld [vmem:[#allocation5 + $0x450] sm:$0xff]  ;;  %2263 = vmatpush3.msra.mxu0 %v1920_v39  ;;  %v1386_v0 = vld [vmem:[#allocation5 + $0x798] sm:$0xff]  ;;  %v1917_v43 = vld [vmem:[#allocation7 + $0x60] sm:$0xff] }
 0x1e3   :  { %1782 = vmatprep.subr.mxu1 %v1290_v4  ;;  %2264 = vmatprep.subr.mxu0 %v1935_v11  ;;  %v1385_v35 = vld [vmem:[#allocation5 + $0x790] sm:$0xff]  ;;  %v1932_v61 = vld [vmem:[#allocation7 + $0xd8] sm:$0xff]  ;;  %v1958_v5 = vld [vmem:[#allocation7 + $0x1a8] sm:$0xff] }
 0x1e4   :  { %v3296_v59 = vadd.f32 %v1108_v47, %v996_v48  ;;  %1783 = vmatpush1.msra.mxu1 %v1289_v19  ;;  %1634 = vmatprep.mubr.f32.mxu1 %v1138_v62  ;;  %v1141_v53 = vmax.f32 %v3294_v23, 0.0  ;;  %v1382_v4 = vld [vmem:[#allocation5 + $0x778] sm:$0xff]  ;;  %v1381_v19 = vld [vmem:[#allocation5 + $0x770] sm:$0xff]  ;;  %v1941_v23 = vld [vmem:[#allocation7 + $0x120] sm:$0xff] }
 0x1e5   :  { %1784 = vmatprep.subr.mxu1 %v1286_v9  ;;  %1635 = vmatmul.mubr.f32.gmra.mxu1 %v1137_v13  ;;  %v1916_v24 = vld [vmem:[#allocation7 + $0x58] sm:$0xff]  ;;  %v1931_v48 = vld [vmem:[#allocation7 + $0xd0] sm:$0xff] }
 0x1e6   :  { %v1142_v44 = vmax.f32 %v3296_v59, 0.0  ;;  %1785 = vmatpush1.msra.mxu1 %v1285_v49  ;;  %2265 = vmatpush3.msra.mxu0 %v1919_v60  ;;  %v1378_v9 = vld [vmem:[#allocation5 + $0x758] sm:$0xff]  ;;  %v1915_v47 = vld [vmem:[#allocation7 + $0x50] sm:$0xff] }
 0x1e7   :  { %1786 = vmatprep.subr.mxu1 %v1282_v15  ;;  %2266 = vmatprep.subr.mxu0 %v1934_v6  ;;  %v1377_v49 = vld [vmem:[#allocation5 + $0x750] sm:$0xff]  ;;  %v1930_v15 = vld [vmem:[#allocation7 + $0xc8] sm:$0xff]  ;;  %v1928_v2 = vld [vmem:[#allocation7 + $0xb8] sm:$0xff] }
 0x1e8   :  { %1787 = vmatpush1.msra.mxu1 %v1281_v42  ;;  %1640 = vmatprep.mubr.f32.mxu1 %v1142_v44  ;;  %v1374_v42 = vld [vmem:[#allocation5 + $0x738] sm:$0xff]  ;;  %v1927_v60 = vld [vmem:[#allocation7 + $0xb0] sm:$0xff] }
 0x1e9   :  { %1788 = vmatprep.subr.mxu1 %v1278_v25  ;;  %1641 = vmatmul.mubr.f32.gmra.mxu1 %v1141_v53  ;;  %v1914_v25 = vld [vmem:[#allocation7 + $0x48] sm:$0xff]  ;;  %v1366_v39 = vld [vmem:[#allocation5 + $0x6f8] sm:$0xff]  ;;  %v1911_v6 = vld [vmem:[#allocation7 + $0x30] sm:$0xff] }
 0x1ea   :  { %1789 = vmatpush1.msra.mxu1 %v1277_v20  ;;  %1824 = vmatprep.mubr.f32.mxu1 %v1114_v58  ;;  %v1933_v58 = vld [vmem:[#allocation7 + $0xe0] sm:$0xff]  ;;  %v1373_v20 = vld [vmem:[#allocation5 + $0x730] sm:$0xff]  ;;  %v1912_v11 = vld [vmem:[#allocation7 + $0x38] sm:$0xff] }
 0x1eb   :  { %1790 = vmatprep.subr.mxu1 %v1274_v1  ;;  %2267 = vmatpush3.msra.mxu0 %v1918_v55  ;;  %v1929_v1 = vld [vmem:[#allocation7 + $0xc0] sm:$0xff]  ;;  %v1926_v55 = vld [vmem:[#allocation7 + $0xa8] sm:$0xff]  ;;  %v1960_v38 = vld [vmem:[#allocation7 + $0x1b8] sm:$0xff] }
 0x1ec   :  { %1791 = vmatpush1.msra.mxu1 %v1273_v34  ;;  %2268 = vmatprep.subr.mxu0 %v1933_v58  ;;  %v1370_v34 = vld [vmem:[#allocation5 + $0x718] sm:$0xff]  ;;  %v1910_v58 = vld [vmem:[#allocation7 + $0x28] sm:$0xff]  ;;  %v1943_v51 = vld [vmem:[#allocation7 + $0x130] sm:$0xff] }
 0x1ed   :  { %1792 = vmatprep.subr.mxu1 %v1398_v7  ;;  %2269 = vmatpush3.msra.mxu0 %v1917_v43  ;;  %v1913_v7 = vld [vmem:[#allocation7 + $0x40] sm:$0xff]  ;;  %v1956_v59 = vld [vmem:[#allocation7 + $0x198] sm:$0xff] }
 0x1ee   :  { %1793 = vmatpush2.msra.mxu1 %v1397_v56  ;;  %2270 = vmatprep.subr.mxu0 %v1932_v61  ;;  %v1369_v56 = vld [vmem:[#allocation5 + $0x710] sm:$0xff]  ;;  %v1925_v43 = vld [vmem:[#allocation7 + $0xa0] sm:$0xff] }
 0x1ef   :  { %1794 = vmatprep.subr.mxu1 %v1394_v17  ;;  %2271 = vmatpush3.msra.mxu0 %v1916_v24  ;;  %v1365_v17 = vld [vmem:[#allocation5 + $0x6f0] sm:$0xff]  ;;  %v1909_v61 = vld [vmem:[#allocation7 + $0x20] sm:$0xff]  ;;  %v1350_v24 = vld [vmem:[#allocation5 + $0x678] sm:$0xff] }
 0x1f0   :  { %1795 = vmatpush2.msra.mxu1 %v1393_v29  ;;  %2272 = vmatprep.subr.mxu0 %v1931_v48  ;;  %v1362_v29 = vld [vmem:[#allocation5 + $0x6d8] sm:$0xff] }
 0x1f1   :  { %1796 = vmatprep.subr.mxu1 %v1390_v54  ;;  %2273 = vmatpush3.msra.mxu0 %v1915_v47  ;;  %v1361_v54 = vld [vmem:[#allocation5 + $0x6d0] sm:$0xff]  ;;  %v1346_v48 = vld [vmem:[#allocation5 + $0x658] sm:$0xff] }
 0x1f2   :  { %1797 = vmatpush2.msra.mxu1 %v1389_v26  ;;  %2274 = vmatprep.subr.mxu0 %v1930_v15  ;;  %v1358_v26 = vld [vmem:[#allocation5 + $0x6b8] sm:$0xff] }
 0x1f3   :  { %1798 = vmatprep.subr.mxu1 %v1386_v0  ;;  %2275 = vmatpush3.msra.mxu0 %v1914_v25  ;;  %v1357_v0 = vld [vmem:[#allocation5 + $0x6b0] sm:$0xff]  ;;  %v1342_v47 = vld [vmem:[#allocation5 + $0x638] sm:$0xff] }
 0x1f4   :  { %1799 = vmatpush2.msra.mxu1 %v1385_v35  ;;  %2276 = vmatprep.subr.mxu0 %v1929_v1  ;;  %v1354_v35 = vld [vmem:[#allocation5 + $0x698] sm:$0xff]  ;;  %v1923_v1 = vld [vmem:[#allocation7 + $0x90] sm:$0xff] }
 0x1f5   :  { %1800 = vmatprep.subr.mxu1 %v1382_v4  ;;  %2277 = vmatpush3.msra.mxu0 %v1913_v7  ;;  %v1353_v4 = vld [vmem:[#allocation5 + $0x690] sm:$0xff]  ;;  %v1338_v15 = vld [vmem:[#allocation5 + $0x618] sm:$0xff]  ;;  %v1922_v7 = vld [vmem:[#allocation7 + $0x88] sm:$0xff] }
 0x1f6   :  { %1801 = vmatpush2.msra.mxu1 %v1381_v19  ;;  %2278 = vmatprep.subr.mxu0 %v1928_v2  ;;  %v1349_v19 = vld [vmem:[#allocation5 + $0x670] sm:$0xff]  ;;  %v1924_v25 = vld [vmem:[#allocation7 + $0x98] sm:$0xff]  ;;  %v1954_v2 = vld [vmem:[#allocation7 + $0x188] sm:$0xff] }
 0x1f7   :  { %1802 = vmatprep.subr.mxu1 %v1378_v9  ;;  %2279 = vmatpush3.msra.mxu0 %v1912_v11  ;;  %v1345_v9 = vld [vmem:[#allocation5 + $0x650] sm:$0xff]  ;;  %v1953_v11 = vld [vmem:[#allocation7 + $0x180] sm:$0xff] }
 0x1f8   :  { %1803 = vmatpush2.msra.mxu1 %v1377_v49  ;;  %2280 = vmatprep.subr.mxu0 %v1927_v60  ;;  %v1341_v49 = vld [vmem:[#allocation5 + $0x630] sm:$0xff] }
 0x1f9   :  { %1804 = vmatprep.subr.mxu1 %v1374_v42  ;;  %2281 = vmatpush3.msra.mxu0 %v1911_v6  ;;  %v1337_v42 = vld [vmem:[#allocation5 + $0x610] sm:$0xff] }
 0x1fa   :  { %1805 = vmatpush2.msra.mxu1 %v1373_v20  ;;  %2282 = vmatprep.subr.mxu0 %v1926_v55  ;;  %v1908_v20 = vld [vmem:[#allocation7 + $0x18] sm:$0xff] }
 0x1fb   :  { %1806 = vmatprep.subr.mxu1 %v1370_v34  ;;  %2283 = vmatpush3.msra.mxu0 %v1910_v58  ;;  %v1907_v34 = vld [vmem:[#allocation7 + $0x10] sm:$0xff] }
 0x1fc   :  { %1807 = vmatpush2.msra.mxu1 %v1369_v56  ;;  %2284 = vmatprep.subr.mxu0 %v1925_v43  ;;  %v1939_v56 = vld [vmem:[#allocation7 + $0x110] sm:$0xff] }
 0x1fd   :  { %1808 = vmatprep.subr.mxu1 %v1366_v39  ;;  %2285 = vmatpush3.msra.mxu0 %v1909_v61  ;;  %v1938_v39 = vld [vmem:[#allocation7 + $0x108] sm:$0xff] }
 0x1fe   :  { %1809 = vmatpush2.msra.mxu1 %v1365_v17  ;;  %2286 = vmatprep.subr.mxu0 %v1924_v25  ;;  %v1937_v17 = vld [vmem:[#allocation7 + $0x100] sm:$0xff] }
 0x1ff   :  { %1810 = vmatprep.subr.mxu1 %v1362_v29  ;;  %2287 = vmatpush3.msra.mxu0 %v1908_v20 }
 0x200   :  { %1811 = vmatpush2.msra.mxu1 %v1361_v54  ;;  %2288 = vmatprep.subr.mxu0 %v1923_v1 }
 0x201   :  { %1812 = vmatprep.subr.mxu1 %v1358_v26  ;;  %2289 = vmatpush3.msra.mxu0 %v1907_v34 }
 0x202   :  { %1813 = vmatpush2.msra.mxu1 %v1357_v0  ;;  %2290 = vmatprep.subr.mxu0 %v1922_v7  ;;  %v3343_v0 = vld [vmem:[%s3418_s6] sm:$0xf] }
 0x203   :  { %1814 = vmatprep.subr.mxu1 %v1354_v35  ;;  %2291 = vmatpush3.msra.mxu0 %v1906_v30  ;;  %v3347_v35 = vrot.slane %v3343_v0, %v3470_v22  ;;  %v3351_v61 = vrot.slane %v3343_v0, %v3471_v3 }
 0x204   :  { %1815 = vmatpush2.msra.mxu1 %v1353_v4 }
 0x205   :  { %1816 = vmatprep.subr.mxu1 %v1350_v24 }
 0x206   :  { %1817 = vmatpush2.msra.mxu1 %v1349_v19 }
 0x207   :  { %1818 = vmatprep.subr.mxu1 %v1346_v48 }
 0x208   :  { %1819 = vmatpush2.msra.mxu1 %v1345_v9 }
 0x209   :  { %1820 = vmatprep.subr.mxu1 %v1342_v47 }
 0x20a   :  { %1821 = vmatpush2.msra.mxu1 %v1341_v49 }
 0x20b   :  { %1822 = vmatprep.subr.mxu1 %v1338_v15 }
 0x20c   :  { %1823 = vmatpush2.msra.mxu1 %v1337_v42 }
 0x20d   :  { %1825 = vmatmul.mubr.f32.vlgmr.msra.gmra.mxu1 %v1113_v32  ;;  %v1921_v32 = vld [vmem:[#allocation7 + $0x80] sm:$0xff]  ;;  %2318 = vmatprep.subr.mxu1 %v1968_v10 }
 0x20e   :  { %1830 = vmatprep.mubr.f32.mxu1 %v1118_v27  ;;  %2292 = vmatprep.subr.mxu0 %v1921_v32  ;;  %v1952_v27 = vld [vmem:[#allocation7 + $0x178] sm:$0xff] }
 0x20f   :  { %2293 = vmatpush3.msra.mxu0 %v1905_v37  ;;  %2319 = vmatpush3.msra.mxu1 %v1952_v27 }
 0x211   :  { %1831 = vmatmul.mubr.f32.gmra.mxu1 %v1117_v46  ;;  %v1967_v46 = vld [vmem:[#allocation7 + $0x1f0] sm:$0xff] }
 0x212   :  { %1836 = vmatprep.mubr.f32.mxu1 %v1122_v12  ;;  %2320 = vmatprep.subr.mxu1 %v1967_v46  ;;  %v1950_v12 = vld [vmem:[#allocation7 + $0x168] sm:$0xff] }
 0x213   :  { %2321 = vmatpush3.msra.mxu1 %v1951_v18 }
 0x214   :  { %2322 = vmatprep.subr.mxu1 %v1966_v63 }
 0x215   :  { %1837 = vmatmul.mubr.f32.gmra.mxu1 %v1121_v40  ;;  %v1965_v40 = vld [vmem:[#allocation7 + $0x1e0] sm:$0xff] }
 0x216   :  { %1842 = vmatprep.mubr.f32.mxu1 %v1126_v57  ;;  %2323 = vmatpush3.msra.mxu1 %v1950_v12  ;;  %v1948_v57 = vld [vmem:[#allocation7 + $0x158] sm:$0xff] }
 0x217   :  { %2324 = vmatprep.subr.mxu1 %v1965_v40 }
 0x218   :  { %2325 = vmatpush3.msra.mxu1 %v1949_v16 }
 0x219   :  { %1843 = vmatmul.mubr.f32.gmra.mxu1 %v1125_v21  ;;  %v1963_v21 = vld [vmem:[#allocation7 + $0x1d0] sm:$0xff]  ;;  %2326 = vmatprep.subr.mxu1 %v1964_v14 }
 0x21a   :  { %1848 = vmatprep.mubr.f32.mxu1 %v1130_v31  ;;  %2327 = vmatpush3.msra.mxu1 %v1948_v57  ;;  %v1946_v31 = vld [vmem:[#allocation7 + $0x148] sm:$0xff] }
 0x21b   :  { %2328 = vmatprep.subr.mxu1 %v1963_v21 }
 0x21c   :  { %2329 = vmatpush3.msra.mxu1 %v1947_v41 }
 0x21d   :  { %1849 = vmatmul.mubr.f32.gmra.mxu1 %v1129_v52  ;;  %v1961_v52 = vld [vmem:[#allocation7 + $0x1c0] sm:$0xff]  ;;  %2330 = vmatprep.subr.mxu1 %v1962_v36 }
 0x21e   :  { %1854 = vmatprep.mubr.f32.mxu1 %v1134_v50  ;;  %2331 = vmatpush3.msra.mxu1 %v1946_v31  ;;  %v1944_v50 = vld [vmem:[#allocation7 + $0x138] sm:$0xff] }
 0x21f   :  { %2332 = vmatprep.subr.mxu1 %v1961_v52 }
 0x220   :  { %2333 = vmatpush3.msra.mxu1 %v1945_v28 }
 0x221   :  { %1855 = vmatmul.mubr.f32.gmra.mxu1 %v1133_v8  ;;  %v1959_v8 = vld [vmem:[#allocation7 + $0x1b0] sm:$0xff]  ;;  %2334 = vmatprep.subr.mxu1 %v1960_v38 }
 0x222   :  { %1860 = vmatprep.mubr.f32.mxu1 %v1138_v62  ;;  %2335 = vmatpush3.msra.mxu1 %v1944_v50  ;;  %v1942_v62 = vld [vmem:[#allocation7 + $0x128] sm:$0xff] }
 0x223   :  { %2336 = vmatprep.subr.mxu1 %v1959_v8 }
 0x224   :  { %2337 = vmatpush3.msra.mxu1 %v1943_v51 }
 0x225   :  { %1861 = vmatmul.mubr.f32.gmra.mxu1 %v1137_v13  ;;  %v1957_v13 = vld [vmem:[#allocation7 + $0x1a0] sm:$0xff]  ;;  %2338 = vmatprep.subr.mxu1 %v1958_v5 }
 0x226   :  { %1866 = vmatprep.mubr.f32.mxu1 %v1142_v44  ;;  %2339 = vmatpush3.msra.mxu1 %v1942_v62  ;;  %v1940_v44 = vld [vmem:[#allocation7 + $0x118] sm:$0xff] }
 0x227   :  { %2340 = vmatprep.subr.mxu1 %v1957_v13 }
 0x228   :  { %2341 = vmatpush3.msra.mxu1 %v1941_v23 }
 0x229   :  { %1867 = vmatmul.mubr.f32.gmra.mxu1 %v1141_v53  ;;  %2342 = vmatprep.subr.mxu1 %v1956_v59  ;;  %v1955_v53 = vld [vmem:[#allocation7 + $0x190] sm:$0xff] }
 0x22a   :  { %2343 = vmatpush3.msra.mxu1 %v1940_v44 }
 0x22b   :  { %2344 = vmatprep.subr.mxu1 %v1955_v53 }
 0x22c   :  { %2345 = vmatpush3.msra.mxu1 %v1939_v56 }
 0x22d   :  { %2346 = vmatprep.subr.mxu1 %v1954_v2 }
 0x22e   :  { %2347 = vmatpush3.msra.mxu1 %v1938_v39 }
 0x22f   :  { %2348 = vmatprep.subr.mxu1 %v1953_v11 }
 0x230   :  { %2349 = vmatpush3.msra.mxu1 %v1937_v17 }
 0x23d   :  { %v1487_v60 = vpop.f32.mrf.mxu0 }
 0x23e   :  { %v1488_v24 = vadd.f32 %v1487_v60, %v3347_v35 }
 0x23f   :  { %v1489_v29 = vpop.f32.mrf.mxu0 }
 0x240   :  { %v1490_v48 = vadd.f32 %v1489_v29, %v3351_v61 }
 0x244   :  { %v1493_v6 = vpop.f32.mrf.mxu0 }
 0x245   :  { %v1494_v42 = vadd.f32 %v1493_v6, %v3347_v35 }
 0x246   :  { %v1495_v54 = vpop.f32.mrf.mxu0 }
 0x247   :  { %v1496_v22 = vadd.f32 %v1495_v54, %v3351_v61 }
 0x24a   :  { %v1499_v55 = vpop.f32.mrf.mxu0 }
 0x24b   :  { %v1500_v32 = vadd.f32 %v1499_v55, %v3347_v35 }
 0x24c   :  { %v1501_v26 = vpop.f32.mrf.mxu0 }
 0x24d   :  { %v1502_v10 = vadd.f32 %v1501_v26, %v3351_v61 }
 0x250   :  { %v1505_v58 = vpop.f32.mrf.mxu0 }
 0x251   :  { %v1506_v16 = vadd.f32 %v1505_v58, %v3347_v35 }
 0x252   :  { %v1507_v43 = vpop.f32.mrf.mxu0 }
 0x253   :  { %v1508_v57 = vadd.f32 %v1507_v43, %v3351_v61 }
 0x256   :  { %v1511_v4 = vpop.f32.mrf.mxu0 }
 0x257   :  { %v1512_v38 = vadd.f32 %v1511_v4, %v3347_v35 }
 0x258   :  { %v1513_v9 = vpop.f32.mrf.mxu0 }
 0x259   :  { %v1514_v8 = vadd.f32 %v1513_v9, %v3351_v61 }
 0x25c   :  { %v1517_v1 = vpop.f32.mrf.mxu0 }
 0x25d   :  { %v1518_v44 = vadd.f32 %v1517_v1, %v3347_v35 }
 0x25e   :  { %v1519_v46 = vpop.f32.mrf.mxu0 }
 0x25f   :  { %v1520_v56 = vadd.f32 %v1519_v46, %v3351_v61 }
 0x262   :  { %v1523_v41 = vpop.f32.mrf.mxu0 }
 0x263   :  { %v1524_v6 = vadd.f32 %v1523_v41, %v3347_v35 }
 0x264   :  { %v1525_v5 = vpop.f32.mrf.mxu0 }
 0x265   :  { %v1526_v55 = vadd.f32 %v1525_v5, %v3351_v61 }
 0x268   :  { %v1529_v39 = vpop.f32.mrf.mxu0 }
 0x26a   :  { %v1531_v58 = vpop.f32.mrf.mxu0 }
 0x28d   :  { %v1600_v19 = vpop.f32.mrf.mxu1 }
 0x28e   :  { %v1601_v47 = vadd.f32 %v1600_v19, %v1488_v24 }
 0x28f   :  { %v1602_v49 = vpop.f32.mrf.mxu1 }
 0x290   :  { %v1603_v15 = vadd.f32 %v1602_v49, %v1490_v48  ;;  %v1873_v34 = vmax.f32 %v1601_v47, 0.0  ;;  %v1530_v48 = vadd.f32 %v1529_v39, %v3347_v35  ;;  %v1532_v47 = vadd.f32 %v1531_v58, %v3351_v61 }
 0x291   :  { %v1606_v25 = vpop.f32.mrf.mxu1  ;;  %v3371_v61 = vrot.slane %v3343_v0, %v3472_v45 }
 0x292   :  { %v1874_v20 = vmax.f32 %v1603_v15, 0.0  ;;  %v1607_v3 = vadd.f32 %v1606_v25, %v1494_v42  ;;  %v1713_v15 = vpop.f32.mrf.mxu0 }
 0x293   :  { %v1608_v7 = vpop.f32.mrf.mxu1 }
 0x294   :  { %v1609_v30 = vadd.f32 %v1608_v7, %v1496_v22  ;;  %2040 = vmatprep.mubr.f32.mxu0 %v1874_v20  ;;  %v1877_v18 = vmax.f32 %v1607_v3, 0.0 }
 0x295   :  { %v1612_v37 = vpop.f32.mrf.mxu1  ;;  %2041 = vmatmul.mubr.f32.vlgmr.msra.gmra.mxu0 %v1873_v34  ;;  %v1715_v34 = vpop.f32.mrf.mxu0 }
 0x296   :  { %v1878_v27 = vmax.f32 %v1609_v30, 0.0  ;;  %v1613_v63 = vadd.f32 %v1612_v37, %v1500_v32 }
 0x297   :  { %v1614_v12 = vpop.f32.mrf.mxu1  ;;  %v1719_v7 = vpop.f32.mrf.mxu0 }
 0x298   :  { %v1615_v40 = vadd.f32 %v1614_v12, %v1502_v10  ;;  %2045 = vmatprep.mubr.f32.mxu0 %v1878_v27  ;;  %v1881_v36 = vmax.f32 %v1613_v63, 0.0  ;;  %v3375_v27 = vrot.slane %v3343_v0, %v3473_v33 }
 0x299   :  { %v1618_v14 = vpop.f32.mrf.mxu1  ;;  %2046 = vmatmul.mubr.f32.gmra.mxu0 %v1877_v18  ;;  %v1721_v30 = vpop.f32.mrf.mxu0  ;;  %v1714_v18 = vadd.f32 %v1713_v15, %v3371_v61 }
 0x29a   :  { %v1882_v21 = vmax.f32 %v1615_v40, 0.0  ;;  %v1619_v31 = vadd.f32 %v1618_v14, %v1506_v16  ;;  %v1716_v12 = vadd.f32 %v1715_v34, %v3375_v27  ;;  %v1722_v45 = vadd.f32 %v1721_v30, %v3375_v27 }
 0x29b   :  { %v1620_v52 = vpop.f32.mrf.mxu1  ;;  %v1725_v35 = vpop.f32.mrf.mxu0 }
 0x29c   :  { %v1621_v28 = vadd.f32 %v1620_v52, %v1508_v57  ;;  %2050 = vmatprep.mubr.f32.mxu0 %v1882_v21  ;;  %v1885_v62 = vmax.f32 %v1619_v31, 0.0  ;;  %v1720_v21 = vadd.f32 %v1719_v7, %v3371_v61 }
 0x29d   :  { %v1624_v50 = vpop.f32.mrf.mxu1  ;;  %2051 = vmatmul.mubr.f32.gmra.mxu0 %v1881_v36  ;;  %v1727_v32 = vpop.f32.mrf.mxu0 }
 0x29e   :  { %v1886_v51 = vmax.f32 %v1621_v28, 0.0  ;;  %v1625_v13 = vadd.f32 %v1624_v50, %v1512_v38  ;;  %v1726_v38 = vadd.f32 %v1725_v35, %v3371_v61 }
 0x29f   :  { %v1626_v23 = vpop.f32.mrf.mxu1  ;;  %v1731_v37 = vpop.f32.mrf.mxu0 }
 0x2a0   :  { %v1627_v59 = vadd.f32 %v1626_v23, %v1514_v8  ;;  %2055 = vmatprep.mubr.f32.mxu0 %v1886_v51  ;;  %v1889_v11 = vmax.f32 %v1625_v13, 0.0  ;;  %v1728_v8 = vadd.f32 %v1727_v32, %v3375_v27 }
 0x2a1   :  { %v1630_v53 = vpop.f32.mrf.mxu1  ;;  %2056 = vmatmul.mubr.f32.gmra.mxu0 %v1885_v62  ;;  %v1733_v10 = vpop.f32.mrf.mxu0 }
 0x2a2   :  { %v1890_v2 = vmax.f32 %v1627_v59, 0.0  ;;  %v1631_v17 = vadd.f32 %v1630_v53, %v1518_v44  ;;  %v1732_v44 = vadd.f32 %v1731_v37, %v3371_v61 }
 0x2a3   :  { %v1632_v60 = vpop.f32.mrf.mxu1  ;;  %v1737_v46 = vpop.f32.mrf.mxu0 }
 0x2a4   :  { %v1633_v29 = vadd.f32 %v1632_v60, %v1520_v56  ;;  %2060 = vmatprep.mubr.f32.mxu0 %v1890_v2  ;;  %v1893_v43 = vmax.f32 %v1631_v17, 0.0  ;;  %v1734_v56 = vadd.f32 %v1733_v10, %v3375_v27 }
 0x2a5   :  { %v1636_v54 = vpop.f32.mrf.mxu1  ;;  %2061 = vmatmul.mubr.f32.gmra.mxu0 %v1889_v11  ;;  %v1739_v40 = vpop.f32.mrf.mxu0 }
 0x2a6   :  { %v1894_v26 = vmax.f32 %v1633_v29, 0.0  ;;  %v1637_v4 = vadd.f32 %v1636_v54, %v1524_v6  ;;  %v1738_v6 = vadd.f32 %v1737_v46, %v3371_v61 }
 0x2a7   :  { %v1638_v24 = vpop.f32.mrf.mxu1  ;;  %v1743_v31 = vpop.f32.mrf.mxu0 }
 0x2a8   :  { %v1639_v19 = vadd.f32 %v1638_v24, %v1526_v55  ;;  %2065 = vmatprep.mubr.f32.mxu0 %v1894_v26  ;;  %v1897_v42 = vmax.f32 %v1637_v4, 0.0  ;;  %v1740_v55 = vadd.f32 %v1739_v40, %v3375_v27 }
 0x2a9   :  { %v1642_v9 = vpop.f32.mrf.mxu1  ;;  %2066 = vmatmul.mubr.f32.gmra.mxu0 %v1893_v43  ;;  %v1745_v5 = vpop.f32.mrf.mxu0 }
 0x2aa   :  { %v1898_v49 = vmax.f32 %v1639_v19, 0.0  ;;  %v1643_v25 = vadd.f32 %v1642_v9, %v1530_v48  ;;  %v1744_v48 = vadd.f32 %v1743_v31, %v3371_v61 }
 0x2ab   :  { %v1644_v22 = vpop.f32.mrf.mxu1  ;;  %v1749_v39 = vpop.f32.mrf.mxu0 }
 0x2ac   :  { %v1645_v20 = vadd.f32 %v1644_v22, %v1532_v47  ;;  %2070 = vmatprep.mubr.f32.mxu0 %v1898_v49  ;;  %v1901_v3 = vmax.f32 %v1643_v25, 0.0  ;;  %v1746_v47 = vadd.f32 %v1745_v5, %v3375_v27 }
 0x2ad   :  { %2071 = vmatmul.mubr.f32.gmra.mxu0 %v1897_v42  ;;  %v1751_v58 = vpop.f32.mrf.mxu0 }
 0x2ae   :  { %v1902_v1 = vmax.f32 %v1645_v20, 0.0 }
 0x2af   :  { %v1755_v15 = vpop.f32.mrf.mxu0 }
 0x2b0   :  { %2075 = vmatprep.mubr.f32.mxu0 %v1902_v1  ;;  %v1750_v1 = vadd.f32 %v1749_v39, %v3371_v61  ;;  %v1756_v46 = vadd.f32 %v1755_v15, %v3371_v61 }
 0x2b1   :  { %2076 = vmatmul.mubr.f32.gmra.mxu0 %v1901_v3  ;;  %v1752_v3 = vadd.f32 %v1751_v58, %v3375_v27  ;;  %v1757_v30 = vpop.f32.mrf.mxu0 }
 0x2cd   :  { %v1826_v63 = vpop.f32.mrf.mxu1 }
 0x2ce   :  { %v1827_v16 = vadd.f32 %v1826_v63, %v1714_v18  ;;  %v1758_v63 = vadd.f32 %v1757_v30, %v3375_v27 }
 0x2cf   :  { %v1828_v14 = vpop.f32.mrf.mxu1 }
 0x2d0   :  { %v1829_v57 = vadd.f32 %v1828_v14, %v1716_v12  ;;  %v1875_v52 = vmax.f32 %v1827_v16, 0.0 }
 0x2d1   :  { %v1832_v41 = vpop.f32.mrf.mxu1 }
 0x2d2   :  { %v1876_v36 = vmax.f32 %v1829_v57, 0.0  ;;  %v1833_v33 = vadd.f32 %v1832_v41, %v1720_v21 }
 0x2d3   :  { %v1834_v0 = vpop.f32.mrf.mxu1 }
 0x2d4   :  { %v1835_v28 = vadd.f32 %v1834_v0, %v1722_v45  ;;  %2145 = vmatprep.mubr.f32.mxu1 %v1876_v36  ;;  %v1879_v62 = vmax.f32 %v1833_v33, 0.0 }
 0x2d5   :  { %v1838_v50 = vpop.f32.mrf.mxu1  ;;  %2146 = vmatmul.mubr.f32.vlgmr.msra.gmra.mxu1 %v1875_v52 }
 0x2d6   :  { %v1880_v51 = vmax.f32 %v1835_v28, 0.0  ;;  %v1839_v13 = vadd.f32 %v1838_v50, %v1726_v38  ;;  %v3396_v50 = vld [vmem:[%s3420_s8] ss:$0 sm:$0xff]  ;;  %s2516_s8 = smov [#allocation8]  }
 0x2d7   :  { %v1840_v23 = vpop.f32.mrf.mxu1  ;;  %s2247_s27 = sshll.u32 %s2516_s8, 4  ;;  %s2248_s27 = int_to_ptr.vmem [resolvable:$true] %s2247_s27 }
 0x2d8   :  { %v1841_v59 = vadd.f32 %v1840_v23, %v1728_v8  ;;  %2150 = vmatprep.mubr.f32.mxu1 %v1880_v51  ;;  %v1883_v11 = vmax.f32 %v1839_v13, 0.0  ;;  %s2481_s28 = scalar_lea.vmem %s2248_s27, 1024  ;;  %p2486_p2 = scmp.lt.s32.totalorder %s2248_s27, %s2248_s27 }
 0x2d9   :  { %v1844_v53 = vpop.f32.mrf.mxu1  ;;  %2151 = vmatmul.mubr.f32.gmra.mxu1 %v1879_v62  ;;  %p2482_p1 = scmp.ne.s32.totalorder %s2248_s27, %s2481_s28  ;;  %p2487_p3 = scmp.lt.s32.totalorder %s2481_s28, %s2481_s28 }
 0x2da   :  { %v1884_v2 = vmax.f32 %v1841_v59, 0.0  ;;  %v1845_v17 = vadd.f32 %v1844_v53, %v1732_v44 }
 0x2db   :  { %v1846_v60 = vpop.f32.mrf.mxu1  ;;  %p2488_p4 = por %p2487_p3, %p2486_p2 }
 0x2dc   :  { %v1847_v29 = vadd.f32 %v1846_v60, %v1734_v56  ;;  %2155 = vmatprep.mubr.f32.mxu1 %v1884_v2  ;;  %v1887_v43 = vmax.f32 %v1845_v17, 0.0 }
 0x2dd   :  { %v1850_v54 = vpop.f32.mrf.mxu1  ;;  %2156 = vmatmul.mubr.f32.gmra.mxu1 %v1883_v11  ;;  %p2489_p5 = pnand %p2488_p4, %p2482_p1 }
 0x2de   :  { %v1888_v26 = vmax.f32 %v1847_v29, 0.0  ;;  %v1851_v4 = vadd.f32 %v1850_v54, %v1738_v6 }
 0x2df   :  { %v1852_v24 = vpop.f32.mrf.mxu1 }
 0x2e0   :  { %v1853_v19 = vadd.f32 %v1852_v24, %v1740_v55  ;;  %2160 = vmatprep.mubr.f32.mxu1 %v1888_v26  ;;  %v1891_v42 = vmax.f32 %v1851_v4, 0.0 }
 0x2e1   :  { %v1856_v9 = vpop.f32.mrf.mxu1  ;;  %2161 = vmatmul.mubr.f32.gmra.mxu1 %v1887_v43 }
 0x2e2   :  { %v1892_v49 = vmax.f32 %v1853_v19, 0.0  ;;  %v1857_v25 = vadd.f32 %v1856_v9, %v1744_v48 }
 0x2e3   :  { %v1858_v22 = vpop.f32.mrf.mxu1 }
 0x2e4   :  { %v1859_v20 = vadd.f32 %v1858_v22, %v1746_v47  ;;  %2165 = vmatprep.mubr.f32.mxu1 %v1892_v49  ;;  %v1895_v35 = vmax.f32 %v1857_v25, 0.0 }
 0x2e5   :  { %v1862_v34 = vpop.f32.mrf.mxu1  ;;  %2166 = vmatmul.mubr.f32.gmra.mxu1 %v1891_v42 }
 0x2e6   :  { %v1896_v7 = vmax.f32 %v1859_v20, 0.0  ;;  %v1863_v32 = vadd.f32 %v1862_v34, %v1750_v1 }
 0x2e7   :  { %v1864_v37 = vpop.f32.mrf.mxu1 }
 0x2e8   :  { %v1865_v10 = vadd.f32 %v1864_v37, %v1752_v3  ;;  %2170 = vmatprep.mubr.f32.mxu1 %v1896_v7  ;;  %v1899_v40 = vmax.f32 %v1863_v32, 0.0 }
 0x2e9   :  { %v1868_v18 = vpop.f32.mrf.mxu1  ;;  %2171 = vmatmul.mubr.f32.gmra.mxu1 %v1895_v35 }
 0x2ea   :  { %v1900_v12 = vmax.f32 %v1865_v10, 0.0  ;;  %v1869_v16 = vadd.f32 %v1868_v18, %v1756_v46 }
 0x2eb   :  { %v1870_v14 = vpop.f32.mrf.mxu1 }
 0x2ec   :  { %v1871_v57 = vadd.f32 %v1870_v14, %v1758_v63  ;;  %2175 = vmatprep.mubr.f32.mxu1 %v1900_v12  ;;  %v1903_v41 = vmax.f32 %v1869_v16, 0.0 }
 0x2ed   :  { %2176 = vmatmul.mubr.f32.gmra.mxu1 %v1899_v40 }
 0x2ee   :  { %v1904_v21 = vmax.f32 %v1871_v57, 0.0 }
 0x2f0   :  { %2180 = vmatprep.mubr.f32.mxu1 %v1904_v21 }
 0x2f1   :  { %2181 = vmatmul.mubr.f32.gmra.mxu1 %v1903_v41 }
 0x355   :  { %v2294_v45 = vpop.f32.mrf.mxu0 }
 0x357   :  { %v2295_v36 = vpop.f32.mrf.mxu0 }
 0x358   :  { %v2296_v38 = vadd.f32 %v2295_v36, %v2294_v45 }
 0x359   :  { %v2297_v31 = vpop.f32.mrf.mxu0 }
 0x35a   :  { %v2043_v62 = vadd.f32 %v2296_v38, %v3396_v50 }
 0x35b   :  { %v2298_v52 = vpop.f32.mrf.mxu0 }
 0x35c   :  { %v2299_v13 = vadd.f32 %v2298_v52, %v2297_v31 }
 0x35d   :  { %v2300_v61 = vpop.f32.mrf.mxu0 }
 0x35e   :  { %v2048_v39 = vadd.f32 %v2299_v13, %v3396_v50 }
 0x35f   :  { %v2301_v33 = vpop.f32.mrf.mxu0 }
 0x360   :  { %v2302_v56 = vadd.f32 %v2301_v33, %v2300_v61 }
 0x361   :  { %v2303_v0 = vpop.f32.mrf.mxu0 }
 0x362   :  { %v2053_v55 = vadd.f32 %v2302_v56, %v3396_v50 }
 0x363   :  { %v2304_v28 = vpop.f32.mrf.mxu0 }
 0x364   :  { %v2305_v58 = vadd.f32 %v2304_v28, %v2303_v0 }
 0x365   :  { %v2306_v27 = vpop.f32.mrf.mxu0 }
 0x366   :  { %v2058_v15 = vadd.f32 %v2305_v58, %v3396_v50 }
 0x367   :  { %v2307_v8 = vpop.f32.mrf.mxu0 }
 0x368   :  { %v2308_v47 = vadd.f32 %v2307_v8, %v2306_v27 }
 0x369   :  { %v2309_v59 = vpop.f32.mrf.mxu0 }
 0x36a   :  { %v2063_v3 = vadd.f32 %v2308_v47, %v3396_v50 }
 0x36b   :  { %v2310_v60 = vpop.f32.mrf.mxu0 }
 0x36c   :  { %v2311_v30 = vadd.f32 %v2310_v60, %v2309_v59 }
 0x36d   :  { %v2312_v24 = vpop.f32.mrf.mxu0 }
 0x36e   :  { %v2068_v40 = vadd.f32 %v2311_v30, %v3396_v50 }
 0x36f   :  { %v2313_v22 = vpop.f32.mrf.mxu0 }
 0x370   :  { %v2314_v63 = vadd.f32 %v2313_v22, %v2312_v24 }
 0x371   :  { %v2315_v37 = vpop.f32.mrf.mxu0 }
 0x372   :  { %v2073_v52 = vadd.f32 %v2314_v63, %v3396_v50 }
 0x373   :  { %v2316_v21 = vpop.f32.mrf.mxu0 }
 0x374   :  { %v2317_v33 = vadd.f32 %v2316_v21, %v2315_v37 }
 0x376   :  { %v2078_v13 = vadd.f32 %v2317_v33, %v3396_v50 }
 0x395   :  { %v2350_v51 = vpop.f32.mrf.mxu1 }
 0x397   :  { %v2351_v5 = vpop.f32.mrf.mxu1 }
 0x398   :  { %v2352_v23 = vadd.f32 %v2351_v5, %v2350_v51 }
 0x399   :  { %v2353_v44 = vpop.f32.mrf.mxu1 }
 0x39a   :  { %v2148_v53 = vadd.f32 %v2352_v23, %v2043_v62 }
 0x39b   :  { %v2354_v2 = vpop.f32.mrf.mxu1 }
 0x39c   :  { %v2186_v11 = vsub.f32 0.0, %v2148_v53  ;;  %v2355_v17 = vadd.f32 %v2354_v2, %v2353_v44 }
 0x39d   :  { %v2356_v29 = vpop.f32.mrf.mxu1 }
 0x39e   :  { %v2194_v6 = vmul.f32 1.442695, %v2186_v11  ;;  %v2153_v54 = vadd.f32 %v2355_v17, %v2048_v39 }
 0x39f   :  { %v2357_v26 = vpop.f32.mrf.mxu1 }
 0x3a0   :  { %2389 = vpow2.f32 %v2194_v6  ;;  %v2187_v43 = vsub.f32 0.0, %v2153_v54  ;;  %v2358_v4 = vadd.f32 %v2357_v26, %v2356_v29 }
 0x3a1   :  { %v2359_v19 = vpop.f32.mrf.mxu1 }
 0x3a2   :  { %v2196_v48 = vmul.f32 1.442695, %v2187_v43  ;;  %v2158_v9 = vadd.f32 %v2358_v4, %v2053_v55 }
 0x3a3   :  { %v2360_v49 = vpop.f32.mrf.mxu1 }
 0x3a4   :  { %2391 = vpow2.f32 %v2196_v48  ;;  %v2188_v42 = vsub.f32 0.0, %v2158_v9  ;;  %v2361_v25 = vadd.f32 %v2360_v49, %v2359_v19 }
 0x3a5   :  { %v2362_v20 = vpop.f32.mrf.mxu1 }
 0x3a6   :  { %v2198_v1 = vmul.f32 1.442695, %v2188_v42  ;;  %v2163_v34 = vadd.f32 %v2361_v25, %v2058_v15 }
 0x3a7   :  { %v2363_v7 = vpop.f32.mrf.mxu1 }
 0x3a8   :  { %2393 = vpow2.f32 %v2198_v1  ;;  %v2189_v35 = vsub.f32 0.0, %v2163_v34  ;;  %v2364_v32 = vadd.f32 %v2363_v7, %v2362_v20 }
 0x3a9   :  { %v2365_v10 = vpop.f32.mrf.mxu1 }
 0x3aa   :  { %v2200_v46 = vmul.f32 1.442695, %v2189_v35  ;;  %v2168_v18 = vadd.f32 %v2364_v32, %v2063_v3 }
 0x3ab   :  { %v2366_v12 = vpop.f32.mrf.mxu1 }
 0x3ac   :  { %2395 = vpow2.f32 %v2200_v46  ;;  %v2190_v16 = vsub.f32 0.0, %v2168_v18  ;;  %v2367_v14 = vadd.f32 %v2366_v12, %v2365_v10 }
 0x3ad   :  { %v2390_v57 = vpop.eup %2389  ;;  %v2368_v41 = vpop.f32.mrf.mxu1 }
 0x3ae   :  { %v2210_v45 = vadd.f32 1.0, %v2390_v57  ;;  %v2202_v36 = vmul.f32 1.442695, %v2190_v16  ;;  %v2173_v31 = vadd.f32 %v2367_v14, %v2068_v40 }
 0x3af   :  { %v2369_v61 = vpop.f32.mrf.mxu1 }
 0x3b0   :  { %2397 = vrcp.f32 %v2210_v45  ;;  %v2191_v0 = vsub.f32 0.0, %v2173_v31  ;;  %v2370_v28 = vadd.f32 %v2369_v61, %v2368_v41 }
 0x3b1   :  { %v2392_v27 = vpop.eup %2391  ;;  %2399 = vpow2.f32 %v2202_v36  ;;  %v2371_v38 = vpop.f32.mrf.mxu1 }
 0x3b2   :  { %v2211_v8 = vadd.f32 1.0, %v2392_v27  ;;  %v2204_v51 = vmul.f32 1.442695, %v2191_v0  ;;  %v2178_v5 = vadd.f32 %v2370_v28, %v2073_v52 }
 0x3b3   :  { %v2372_v62 = vpop.f32.mrf.mxu1 }
 0x3b4   :  { %2401 = vrcp.f32 %v2211_v8  ;;  %v2192_v23 = vsub.f32 0.0, %v2178_v5  ;;  %v2373_v59 = vadd.f32 %v2372_v62, %v2371_v38 }
 0x3b5   :  { %v2394_v44 = vpop.eup %2393  ;;  %2403 = vpow2.f32 %v2204_v51 }
 0x3b6   :  { %v2212_v53 = vadd.f32 1.0, %v2394_v44  ;;  %v2206_v56 = vmul.f32 1.442695, %v2192_v23  ;;  %v2183_v2 = vadd.f32 %v2373_v59, %v2078_v13 }
 0x3b8   :  { %2405 = vrcp.f32 %v2212_v53  ;;  %v2193_v39 = vsub.f32 0.0, %v2183_v2 }
 0x3b9   :  { %v2396_v11 = vpop.eup %2395  ;;  %2407 = vpow2.f32 %v2206_v56 }
 0x3ba   :  { %v2213_v17 = vadd.f32 1.0, %v2396_v11  ;;  %v2208_v60 = vmul.f32 1.442695, %v2193_v39 }
 0x3bc   :  { %2409 = vrcp.f32 %v2213_v17 }
 0x3bd   :  { %v2398_v29 = vpop.eup %2397  ;;  %2411 = vpow2.f32 %v2208_v60 }
 0x3be   :  { %v2400_v6 = vpop.eup %2399  ;;  %2234 = vst [vmem:[#allocation8] sm:$0xff] %v2398_v29 }
 0x3bf   :  { %v2214_v50 = vadd.f32 1.0, %v2400_v6 }
 0x3c1   :  { %v2402_v54 = vpop.eup %2401  ;;  %2413 = vrcp.f32 %v2214_v50 }
 0x3c2   :  { %v2404_v55 = vpop.eup %2403  ;;  %2235 = vst [vmem:[#allocation8 + $0x8] sm:$0xff] %v2402_v54 }
 0x3c3   :  { %v2215_v26 = vadd.f32 1.0, %v2404_v55 }
 0x3c5   :  { %v2406_v58 = vpop.eup %2405  ;;  %2415 = vrcp.f32 %v2215_v26 }
 0x3c6   :  { %v2408_v43 = vpop.eup %2407  ;;  %2236 = vst [vmem:[#allocation8 + $0x10] sm:$0xff] %v2406_v58 }
 0x3c7   :  { %v2216_v4 = vadd.f32 1.0, %v2408_v43 }
 0x3c9   :  { %v2410_v24 = vpop.eup %2409  ;;  %2417 = vrcp.f32 %v2216_v4 }
 0x3ca   :  { %v2412_v19 = vpop.eup %2411  ;;  %2237 = vst [vmem:[#allocation8 + $0x18] sm:$0xff] %v2410_v24 }
 0x3cb   :  { %v2217_v48 = vadd.f32 1.0, %v2412_v19 }
 0x3cd   :  { %2419 = vrcp.f32 %v2217_v48 }
 0x3ce   :  { %v2414_v9 = vpop.eup %2413 }
 0x3cf   :  { %2238 = vst [vmem:[#allocation8 + $0x20] sm:$0xff] %v2414_v9 }
 0x3d2   :  { %v2416_v47 = vpop.eup %2415 }
 0x3d3   :  { %2239 = vst [vmem:[#allocation8 + $0x28] sm:$0xff] %v2416_v47 }
 0x3d6   :  { %v2418_v49 = vpop.eup %2417 }
 0x3d7   :  { %2240 = vst [vmem:[#allocation8 + $0x30] sm:$0xff] %v2418_v49 }
 0x3da   :  { %v2420_v15 = vpop.eup %2419 }
 0x3db   :  { %2241 = vst [vmem:[#allocation8 + $0x38] sm:$0xff] %v2420_v15 }
 0x3dc   :  { %2492 = shalt.err (!%p2489_p5)
}
 0x3dd   :  { %2253 = dma.vmem_to_hbm [thread:$0]  %s2248_s27, 1024, %s3421_s9, [#allocation4], %s2512_s5, %s2512_s5, %s2513_s24  }
 0x3de   :  { %2505 = dma.done.wait [#allocation4], 1024  }
 0x3df   :  { %2506 = vsyncadd [#allocation4], 4294966272 }
 0x3e0   :  { %2257 = vsyncpa [#allocation3], 1 }
 0x3e1   :  { %2258 = vsyncpa [#allocation6], 1 }
 0x3e2   :  { %2259 = vsyncpa [#allocation4], 1 }

</bundles_post_ra>
